<compile_context>
chip_gen: v7x
topology: tpu7x:2x2x1
jax: 0.10.0
libtpu: 0.0.40
codegen_flags: <defaults>
</compile_context>

<pallas_src>
import numpy as np

import jax
import jax.numpy as jnp
from jax.experimental import pallas as pl
from jax.experimental.pallas import tpu as pltpu

_BN_EPS = 1e-5
_LANE = 128


def _round_up(x, m):
    return (x + m - 1) // m * m


def _is_pow2(n):
    return n > 0 and (n & (n - 1)) == 0


# ---------------------------------------------------------------------------
# Fused kernel: conv1+bn1+relu -> conv2+bn2 -> (conv3+bn3 | identity) -> add+relu
# ---------------------------------------------------------------------------
def _make_fused_kernel(ho, wo, m, cp, use_skip, inkernel_masks):
    """ho/wo: conv2 spatial dims; m = N*Ho*Wo rows; cp = lane-padded channels."""
    f32 = jnp.float32
    bf16 = jnp.bfloat16
    inv_m = 1.0 / m

    def bn(z, g, b):
        # training-mode BatchNorm: single-pass batch stats (sum / sumsq),
        # f32, biased variance, eps = 1e-5; var clamped to >= 0.
        s = jnp.sum(z, axis=0, keepdims=True)
        ss = jnp.sum(z * z, axis=0, keepdims=True)
        mean = s * inv_m
        var = jnp.maximum(ss * inv_m - mean * mean, 0.0)
        return (z - mean) * jax.lax.rsqrt(var + _BN_EPS) * g + b

    def kernel(*refs):
        refs = list(refs)
        o_ref = refs.pop()                     # single output, last positional
        it = iter(refs)
        p1_ref = next(it)
        w1_ref = next(it)
        w2_ref = next(it)
        xs_ref = next(it)
        msk_ref = None if inkernel_masks else next(it)
        w3_ref = next(it) if use_skip else None
        g1_ref = next(it)
        b1_ref = next(it)
        g2_ref = next(it)
        b2_ref = next(it)
        g3_ref = next(it) if use_skip else None
        b3_ref = next(it) if use_skip else None

        # ---- conv1 (3x3, stride s) as one lane-dense im2col matmul ---------
        z1 = jnp.dot(p1_ref[...], w1_ref[...], preferred_element_type=f32)
        z1 = jnp.maximum(bn(z1, g1_ref[...], b1_ref[...]), 0.0)     # (m, cp) f32

        # ---- per-row tap-validity coordinates (computed once) --------------
        if inkernel_masks:
            r = jax.lax.broadcasted_iota(jnp.int32, (m, 1), 0)
            shift_w = int(wo).bit_length() - 1          # wo is a power of two
            jj = jnp.bitwise_and(r, wo - 1)             # r %  wo
            ii = jnp.bitwise_and(r >> shift_w, ho - 1)  # (r // wo) % ho
        else:
            msk = msk_ref[...]                          # (m, 9) f32 row masks

        # ---- conv2 (3x3, stride 1, pad 1): 9 rolled/masked taps, one dot ---
        # z1 stays VMEM/vreg resident; tap t is z1 rolled by its flattened row
        # offset (XLU), with invalid (cross-row / cross-image / wrapped) rows
        # zeroed -- exactly the spatial zero padding of the conv.
        taps = []
        for t in range(9):                               # static unroll
            dh, dw = t // 3 - 1, t % 3 - 1
            off = dh * wo + dw
            rolled = z1 if off == 0 else pltpu.roll(z1, shift=(-off) % m, axis=0)
            if inkernel_masks:
                valid = ((ii + dh >= 0) & (ii + dh < ho) &
                         (jj + dw >= 0) & (jj + dw < wo))          # (m, 1) bool
                tap = jnp.where(valid, rolled, 0.0)
            else:
                tap = rolled * msk[:, t:t + 1]
            taps.append(tap.astype(bf16))
        # Deep contraction: K = 9*cp fills the 256-deep MXU on v6e/v7x and
        # keeps the accumulation inside the MXU (no 9x pop/add chain).
        z2 = jnp.dot(jnp.concatenate(taps, axis=1), w2_ref[...],
                     preferred_element_type=f32)
        z2 = bn(z2, g2_ref[...], b2_ref[...])
        # TODO(synk): Dropout2d only implemented for p=0.0 (identity).

        # ---- skip path ------------------------------------------------------
        if use_skip:
            y = jnp.dot(xs_ref[...], w3_ref[...],        # 1x1 conv, stride s (bf16)
                        preferred_element_type=f32)
            y = bn(y, g3_ref[...], b3_ref[...])
        else:
            y = xs_ref[...]                              # identity skip (f32)

        o_ref[...] = jnp.maximum(y + z2, 0.0).astype(o_ref.dtype)

    return kernel


# ---------------------------------------------------------------------------
# JAX glue: im2col for conv1, weight reshaping, lane/K padding, tap masks
# ---------------------------------------------------------------------------
def _im2col(x_nhwc, ksize, stride, padding):
    """x: [N,H,W,C] -> patches [N*Ho*Wo, ksize*ksize*C], plus (N,Ho,Wo)."""
    x = jnp.pad(x_nhwc, ((0, 0), (padding, padding), (padding, padding), (0, 0)))
    N, Hp, Wp, C = x.shape
    Ho = (Hp - ksize) // stride + 1
    Wo = (Wp - ksize) // stride + 1
    taps = []
    for kh in range(ksize):
        for kw in range(ksize):
            taps.append(x[:, kh:kh + stride * Ho:stride,
                          kw:kw + stride * Wo:stride, :])
    p = jnp.stack(taps, axis=-2)                       # [N,Ho,Wo,k*k,C]
    return p.reshape(N * Ho * Wo, ksize * ksize * C), (N, Ho, Wo)
# TODO(synk): at production scale, build conv1 patches in VMEM (or apply the
# same roll/mask tap trick) instead of materializing the im2col in HBM.


def _conv_weight_to_mat(w_oihw):
    """[Cout,Cin,KH,KW] -> [KH*KW*Cin, Cout] matching _im2col ordering."""
    cout = w_oihw.shape[0]
    return jnp.transpose(w_oihw, (2, 3, 1, 0)).reshape(-1, cout)


def _pad2(a, rows, cols):
    return jnp.pad(a, ((0, rows - a.shape[0]), (0, cols - a.shape[1])))


def _bn_vec(v, cp):
    return jnp.pad(v.reshape(1, -1), ((0, 0), (0, cp - v.shape[0]))).astype(jnp.float32)


def _conv2_tap_masks(ho, wo, m):
    """(m, 9) f32 row-validity masks (fallback path for non-pow2 spatial dims)."""
    r = np.arange(m)
    jj = r % wo
    ii = (r // wo) % ho
    cols = []
    for t in range(9):
        dh, dw = t // 3 - 1, t % 3 - 1
        cols.append((ii + dh >= 0) & (ii + dh < ho) &
                    (jj + dw >= 0) & (jj + dw < wo))
    return jnp.asarray(np.stack(cols, axis=1), dtype=jnp.float32)


# ---------------------------------------------------------------------------
# ResidualBlock forward (single fused pallas_call)
# ---------------------------------------------------------------------------
def residual_block_forward(x_nhwc, params, stride, padding):
    """x: [N,H,W,Cin] -> [N,Ho,Wo,Cout] (NHWC, training-mode BatchNorm)."""
    assert padding == 1, "ResidualBlock is only shape-consistent for padding=1"
    N, H, W, Cin = x_nhwc.shape
    Cout = params["w1"].shape[0]
    cp = _round_up(Cout, _LANE)                 # lane-dense channel padding

    # conv1 im2col (contraction dim padded to a lane-aligned width)
    p1, (N, Ho, Wo) = _im2col(x_nhwc, 3, stride, padding)
    M = N * Ho * Wo
    k1p = _round_up(p1.shape[1], _LANE)
    p1 = _pad2(p1, M, k1p).astype(jnp.bfloat16)
    w1 = _pad2(_conv_weight_to_mat(params["w1"]), k1p, cp).astype(jnp.bfloat16)

    # conv2 weights as 9 stacked (cp, cp) per-tap matrices -> (9*cp, cp)
    w2 = jnp.transpose(params["w2"], (2, 3, 1, 0))               # (3,3,Cin2,Cout)
    w2 = jnp.pad(w2, ((0, 0), (0, 0),
                      (0, cp - w2.shape[2]), (0, cp - w2.shape[3])))
    w2 = w2.reshape(9 * cp, cp).astype(jnp.bfloat16)

    use_skip = stride > 1
    k3p = 0
    if use_skip:
        # 1x1 stride-s conv input -- shipped as bf16 (halves DMA + VMEM)
        xs = x_nhwc[:, :stride * Ho:stride, :stride * Wo:stride, :]
        xs = xs.reshape(M, Cin)
        k3p = _round_up(Cin, _LANE)
        xs = _pad2(xs, M, k3p).astype(jnp.bfloat16)
        w3 = _pad2(params["w3"][:, :, 0, 0].T, k3p, cp).astype(jnp.bfloat16)
    else:
        assert Cin == Cout, "identity skip requires in_channels == out_channels"
        xs = _pad2(x_nhwc.reshape(M, Cin), M, cp).astype(jnp.float32)

    g1 = _bn_vec(params["g1"], cp); b1 = _bn_vec(params["b1"], cp)
    g2 = _bn_vec(params["g2"], cp); b2 = _bn_vec(params["b2"], cp)

    # In-kernel masks (iota + shift/and) when spatial dims are powers of two;
    # otherwise fall back to shipping the (M, 9) row-mask table.
    inkernel_masks = _is_pow2(Ho) and _is_pow2(Wo)

    operands = [p1, w1, w2, xs]
    if not inkernel_masks:
        operands.append(_conv2_tap_masks(Ho, Wo, M))
    if use_skip:
        operands.append(w3)
    operands += [g1, b1, g2, b2]
    if use_skip:
        operands += [_bn_vec(params["g3"], cp), _bn_vec(params["b3"], cp)]

    kernel = _make_fused_kernel(Ho, Wo, M, cp, use_skip, inkernel_masks)

    flops = 2 * M * k1p * cp + 2 * M * (9 * cp) * cp
    if use_skip:
        flops += 2 * M * k3p * cp
    bytes_accessed = sum(int(a.size) * a.dtype.itemsize for a in operands) + M * cp * 4
    cost = pl.CostEstimate(flops=flops,
                           transcendentals=(3 if use_skip else 2) * cp,
                           bytes_accessed=bytes_accessed)

    def _full(a):
        return pl.BlockSpec(a.shape, lambda i: (0, 0))

    out = pl.pallas_call(
        kernel,
        out_shape=jax.ShapeDtypeStruct((M, cp), jnp.float32),
        grid=(1,),
        in_specs=[_full(a) for a in operands],
        out_specs=pl.BlockSpec((M, cp), lambda i: (0, 0)),
        compiler_params=pltpu.CompilerParams(
            dimension_semantics=("arbitrary",),
            vmem_limit_bytes=32 * 1024 * 1024),
        cost_estimate=cost,
    )(*operands)
    # TODO(synk): for production-scale N*Ho*Wo, tile the M axis with a
    # "parallel" grid (v7x megacore) + two-pass (sum/sumsq) BatchNorm
    # accumulation so the batch statistics stay global across M blocks; at
    # these shapes the whole block fits comfortably in VMEM, so one fused
    # launch (no HBM round trips for z1 / taps / skip) wins.

    return out[:, :Cout].reshape(N, Ho, Wo, Cout)


# ---------------------------------------------------------------------------
# Pure-JAX reference (matching bf16 MXU-operand rounding, f32 accumulation)
# ---------------------------------------------------------------------------
def residual_block_reference(x, params, stride, padding):
    def conv(inp, w_oihw, s, p):
        w = jnp.transpose(w_oihw, (2, 3, 1, 0)).astype(jnp.bfloat16)
        return jax.lax.conv_general_dilated(
            inp.astype(jnp.bfloat16), w, (s, s), [(p, p), (p, p)],
            dimension_numbers=("NHWC", "HWIO", "NHWC"),
            preferred_element_type=jnp.float32)

    def bn(z, g, b):
        mean = z.mean(axis=(0, 1, 2), keepdims=True)
        var = ((z - mean) ** 2).mean(axis=(0, 1, 2), keepdims=True)
        return (z - mean) * jax.lax.rsqrt(var + _BN_EPS) * g + b

    z = jax.nn.relu(bn(conv(x, params["w1"], stride, padding),
                       params["g1"], params["b1"]))
    z = bn(conv(z, params["w2"], 1, padding), params["g2"], params["b2"])
    if stride > 1:
        y = bn(conv(x, params["w3"], stride, 0), params["g3"], params["b3"])
    else:
        y = x
    return jax.nn.relu(y + z)


# ---------------------------------------------------------------------------
def _make_params(key, cin, cout, skip):
    ks = jax.random.split(key, 9)
    p = {
        "w1": 0.1 * jax.random.normal(ks[0], (cout, cin, 3, 3), jnp.float32),
        "g1": 1.0 + 0.1 * jax.random.normal(ks[1], (cout,), jnp.float32),
        "b1": 0.1 * jax.random.normal(ks[2], (cout,), jnp.float32),
        "w2": 0.1 * jax.random.normal(ks[3], (cout, cout, 3, 3), jnp.float32),
        "g2": 1.0 + 0.1 * jax.random.normal(ks[4], (cout,), jnp.float32),
        "b2": 0.1 * jax.random.normal(ks[5], (cout,), jnp.float32),
    }
    if skip:
        p.update({
            "w3": 0.1 * jax.random.normal(ks[6], (cout, cin, 1, 1), jnp.float32),
            "g3": 1.0 + 0.1 * jax.random.normal(ks[7], (cout,), jnp.float32),
            "b3": 0.1 * jax.random.normal(ks[8], (cout,), jnp.float32),
        })
    return p


if __name__ == "__main__":
    fwd = jax.jit(residual_block_forward, static_argnames=("stride", "padding"))

    key = jax.random.PRNGKey(0)
    k1, k2, k3, k4 = jax.random.split(key, 4)

    # --- stride-2 block (conv3/bn3 skip path): N=2, Cin=4, Cout=8, 16x16 ----
    N, Cin, Cout, H, W = 2, 4, 8, 16, 16
    x = jax.random.normal(k1, (N, H, W, Cin), jnp.float32)
    params = _make_params(k2, Cin, Cout, skip=True)
    out = jax.block_until_ready(fwd(x, params, stride=2, padding=1))
    ref = residual_block_reference(x, params, 2, 1)
    assert out.shape == (N, H // 2, W // 2, Cout), out.shape
    err = float(jnp.max(jnp.abs(out - ref)))
    assert err < 1e-2, f"stride-2 mismatch: {err}"

    # --- stride-1 block (identity skip): Cin == Cout = 8 --------------------
    x1 = jax.random.normal(k3, (N, H, W, Cout), jnp.float32)
    params1 = _make_params(k4, Cout, Cout, skip=False)
    out1 = jax.block_until_ready(fwd(x1, params1, stride=1, padding=1))
    ref1 = residual_block_reference(x1, params1, 1, 1)
    assert out1.shape == (N, H, W, Cout), out1.shape
    err1 = float(jnp.max(jnp.abs(out1 - ref1)))
    assert err1 < 1e-2, f"stride-1 mismatch: {err1}"

    print("KERNEL_OK")
</pallas_src>

<mosaic_0001>
module attributes {stable_mosaic.version = 11 : i64} {
  func.func @kernel(%arg0: i32, %arg1: memref<128x128xbf16, #tpu.memory_space<vmem>>, %arg2: memref<128x128xbf16, #tpu.memory_space<vmem>>, %arg3: memref<1152x128xbf16, #tpu.memory_space<vmem>>, %arg4: memref<128x128xbf16, #tpu.memory_space<vmem>>, %arg5: memref<128x128xbf16, #tpu.memory_space<vmem>>, %arg6: memref<1x128xf32, #tpu.memory_space<vmem>>, %arg7: memref<1x128xf32, #tpu.memory_space<vmem>>, %arg8: memref<1x128xf32, #tpu.memory_space<vmem>>, %arg9: memref<1x128xf32, #tpu.memory_space<vmem>>, %arg10: memref<1x128xf32, #tpu.memory_space<vmem>>, %arg11: memref<1x128xf32, #tpu.memory_space<vmem>>, %arg12: memref<128x128xf32, #tpu.memory_space<vmem>>) attributes {dimension_semantics = [#tpu.dimension_semantics<arbitrary>], iteration_bounds = array<i64: 1>, scalar_prefetch = 0 : i64, scratch_operands = 0 : i64, tpu.core_type = #tpu.core_type<tc>, window_params = [{pipeline_mode = #tpu.pipeline_mode<synchronous>, transform_indices = @transform_0, window_bounds = array<i64: 128, 128>}, {pipeline_mode = #tpu.pipeline_mode<synchronous>, transform_indices = @transform_1, window_bounds = array<i64: 128, 128>}, {pipeline_mode = #tpu.pipeline_mode<synchronous>, transform_indices = @transform_2, window_bounds = array<i64: 1152, 128>}, {pipeline_mode = #tpu.pipeline_mode<synchronous>, transform_indices = @transform_3, window_bounds = array<i64: 128, 128>}, {pipeline_mode = #tpu.pipeline_mode<synchronous>, transform_indices = @transform_4, window_bounds = array<i64: 128, 128>}, {pipeline_mode = #tpu.pipeline_mode<synchronous>, transform_indices = @transform_5, window_bounds = array<i64: 1, 128>}, {pipeline_mode = #tpu.pipeline_mode<synchronous>, transform_indices = @transform_6, window_bounds = array<i64: 1, 128>}, {pipeline_mode = #tpu.pipeline_mode<synchronous>, transform_indices = @transform_7, window_bounds = array<i64: 1, 128>}, {pipeline_mode = #tpu.pipeline_mode<synchronous>, transform_indices = @transform_8, window_bounds = array<i64: 1, 128>}, {pipeline_mode = #tpu.pipeline_mode<synchronous>, transform_indices = @transform_9, window_bounds = array<i64: 1, 128>}, {pipeline_mode = #tpu.pipeline_mode<synchronous>, transform_indices = @transform_10, window_bounds = array<i64: 1, 128>}, {pipeline_mode = #tpu.pipeline_mode<synchronous>, transform_indices = @transform_11, window_bounds = array<i64: 128, 128>}]} {
    %c0 = arith.constant 0 : index
    %c0_0 = arith.constant 0 : index
    %0 = vector.load %arg1[%c0, %c0_0] : memref<128x128xbf16, #tpu.memory_space<vmem>>, vector<128x128xbf16>
    %c0_1 = arith.constant 0 : index
    %c0_2 = arith.constant 0 : index
    %1 = vector.load %arg2[%c0_1, %c0_2] : memref<128x128xbf16, #tpu.memory_space<vmem>>, vector<128x128xbf16>
    %cst = arith.constant dense<0.000000e+00> : vector<128x128xf32>
    %2 = tpu.matmul %0, %1, %cst {dimension_numbers = #tpu.dot_dimension_numbers<[1], [0], [0], [1], [0, 0, 1, 1], [], []>} : vector<128x128xbf16>, vector<128x128xbf16>, vector<128x128xf32> -> vector<128x128xf32>
    %c0_3 = arith.constant 0 : index
    %c0_4 = arith.constant 0 : index
    %3 = vector.load %arg6[%c0_3, %c0_4] : memref<1x128xf32, #tpu.memory_space<vmem>>, vector<1x128xf32>
    %c0_5 = arith.constant 0 : index
    %c0_6 = arith.constant 0 : index
    %4 = vector.load %arg7[%c0_5, %c0_6] : memref<1x128xf32, #tpu.memory_space<vmem>>, vector<1x128xf32>
    %cst_7 = arith.constant dense<0.000000e+00> : vector<128xf32>
    %5 = vector.multi_reduction <add>, %2, %cst_7 [0] : vector<128x128xf32> to vector<128xf32>
    %6 = vector.shape_cast %5 : vector<128xf32> to vector<1x128xf32>
    %7 = arith.mulf %2, %2 : vector<128x128xf32>
    %cst_8 = arith.constant dense<0.000000e+00> : vector<128xf32>
    %8 = vector.multi_reduction <add>, %7, %cst_8 [0] : vector<128x128xf32> to vector<128xf32>
    %9 = vector.shape_cast %8 : vector<128xf32> to vector<1x128xf32>
    %cst_9 = arith.constant 7.812500e-03 : f32
    %10 = vector.broadcast %cst_9 : f32 to vector<1x128xf32>
    %11 = arith.mulf %6, %10 : vector<1x128xf32>
    %cst_10 = arith.constant 7.812500e-03 : f32
    %12 = vector.broadcast %cst_10 : f32 to vector<1x128xf32>
    %13 = arith.mulf %9, %12 : vector<1x128xf32>
    %14 = arith.mulf %11, %11 : vector<1x128xf32>
    %15 = arith.subf %13, %14 : vector<1x128xf32>
    %cst_11 = arith.constant 0.000000e+00 : f32
    %16 = vector.broadcast %cst_11 : f32 to vector<1x128xf32>
    %17 = arith.maximumf %15, %16 : vector<1x128xf32>
    %18 = vector.broadcast %11 : vector<1x128xf32> to vector<128x128xf32>
    %19 = arith.subf %2, %18 : vector<128x128xf32>
    %cst_12 = arith.constant 9.99999974E-6 : f32
    %20 = vector.broadcast %cst_12 : f32 to vector<1x128xf32>
    %21 = arith.addf %17, %20 : vector<1x128xf32>
    %22 = math.rsqrt %21 : vector<1x128xf32>
    %23 = vector.broadcast %22 : vector<1x128xf32> to vector<128x128xf32>
    %24 = arith.mulf %19, %23 : vector<128x128xf32>
    %25 = vector.broadcast %3 : vector<1x128xf32> to vector<128x128xf32>
    %26 = arith.mulf %24, %25 : vector<128x128xf32>
    %27 = vector.broadcast %4 : vector<1x128xf32> to vector<128x128xf32>
    %28 = arith.addf %26, %27 : vector<128x128xf32>
    %cst_13 = arith.constant 0.000000e+00 : f32
    %29 = vector.broadcast %cst_13 : f32 to vector<128x128xf32>
    %30 = arith.maximumf %28, %29 : vector<128x128xf32>
    %31 = tpu.iota {dimensions = array<i32: 0>} : vector<128x1xi32>
    %c7_i32 = arith.constant 7 : i32
    %32 = vector.broadcast %c7_i32 : i32 to vector<128x1xi32>
    %33 = arith.andi %31, %32 : vector<128x1xi32>
    %c3_i32 = arith.constant 3 : i32
    %34 = vector.broadcast %c3_i32 : i32 to vector<128x1xi32>
    %35 = arith.shrsi %31, %34 : vector<128x1xi32>
    %c7_i32_14 = arith.constant 7 : i32
    %36 = vector.broadcast %c7_i32_14 : i32 to vector<128x1xi32>
    %37 = arith.andi %35, %36 : vector<128x1xi32>
    %c9_i32 = arith.constant 9 : i32
    %38 = tpu.dynamic_rotate %30 by %c9_i32 dim 0 : vector<128x128xf32>, i32 -> vector<128x128xf32>
    %c-1_i32 = arith.constant -1 : i32
    %39 = vector.broadcast %c-1_i32 : i32 to vector<128x1xi32>
    %40 = arith.addi %37, %39 : vector<128x1xi32>
    %c0_i32 = arith.constant 0 : i32
    %41 = vector.broadcast %c0_i32 : i32 to vector<128x1xi32>
    %42 = arith.cmpi sge, %40, %41 : vector<128x1xi32>
    %c-1_i32_15 = arith.constant -1 : i32
    %43 = vector.broadcast %c-1_i32_15 : i32 to vector<128x1xi32>
    %44 = arith.addi %37, %43 : vector<128x1xi32>
    %c8_i32 = arith.constant 8 : i32
    %45 = vector.broadcast %c8_i32 : i32 to vector<128x1xi32>
    %46 = arith.cmpi slt, %44, %45 : vector<128x1xi32>
    %47 = arith.andi %42, %46 : vector<128x1xi1>
    %c-1_i32_16 = arith.constant -1 : i32
    %48 = vector.broadcast %c-1_i32_16 : i32 to vector<128x1xi32>
    %49 = arith.addi %33, %48 : vector<128x1xi32>
    %c0_i32_17 = arith.constant 0 : i32
    %50 = vector.broadcast %c0_i32_17 : i32 to vector<128x1xi32>
    %51 = arith.cmpi sge, %49, %50 : vector<128x1xi32>
    %52 = arith.andi %47, %51 : vector<128x1xi1>
    %c-1_i32_18 = arith.constant -1 : i32
    %53 = vector.broadcast %c-1_i32_18 : i32 to vector<128x1xi32>
    %54 = arith.addi %33, %53 : vector<128x1xi32>
    %c8_i32_19 = arith.constant 8 : i32
    %55 = vector.broadcast %c8_i32_19 : i32 to vector<128x1xi32>
    %56 = arith.cmpi slt, %54, %55 : vector<128x1xi32>
    %57 = arith.andi %52, %56 : vector<128x1xi1>
    %cst_20 = arith.constant 0.000000e+00 : f32
    %58 = vector.shape_cast %57 : vector<128x1xi1> to vector<128x1xi1>
    %59 = vector.broadcast %58 : vector<128x1xi1> to vector<128x128xi1>
    %60 = vector.broadcast %cst_20 : f32 to vector<128x128xf32>
    %61 = arith.select %59, %38, %60 : vector<128x128xi1>, vector<128x128xf32>
    %62 = arith.truncf %61 : vector<128x128xf32> to vector<128x128xbf16>
    %c8_i32_21 = arith.constant 8 : i32
    %63 = tpu.dynamic_rotate %30 by %c8_i32_21 dim 0 : vector<128x128xf32>, i32 -> vector<128x128xf32>
    %c-1_i32_22 = arith.constant -1 : i32
    %64 = vector.broadcast %c-1_i32_22 : i32 to vector<128x1xi32>
    %65 = arith.addi %37, %64 : vector<128x1xi32>
    %c0_i32_23 = arith.constant 0 : i32
    %66 = vector.broadcast %c0_i32_23 : i32 to vector<128x1xi32>
    %67 = arith.cmpi sge, %65, %66 : vector<128x1xi32>
    %c-1_i32_24 = arith.constant -1 : i32
    %68 = vector.broadcast %c-1_i32_24 : i32 to vector<128x1xi32>
    %69 = arith.addi %37, %68 : vector<128x1xi32>
    %c8_i32_25 = arith.constant 8 : i32
    %70 = vector.broadcast %c8_i32_25 : i32 to vector<128x1xi32>
    %71 = arith.cmpi slt, %69, %70 : vector<128x1xi32>
    %72 = arith.andi %67, %71 : vector<128x1xi1>
    %c0_i32_26 = arith.constant 0 : i32
    %73 = vector.broadcast %c0_i32_26 : i32 to vector<128x1xi32>
    %74 = arith.addi %33, %73 : vector<128x1xi32>
    %c0_i32_27 = arith.constant 0 : i32
    %75 = vector.broadcast %c0_i32_27 : i32 to vector<128x1xi32>
    %76 = arith.cmpi sge, %74, %75 : vector<128x1xi32>
    %77 = arith.andi %72, %76 : vector<128x1xi1>
    %c0_i32_28 = arith.constant 0 : i32
    %78 = vector.broadcast %c0_i32_28 : i32 to vector<128x1xi32>
    %79 = arith.addi %33, %78 : vector<128x1xi32>
    %c8_i32_29 = arith.constant 8 : i32
    %80 = vector.broadcast %c8_i32_29 : i32 to vector<128x1xi32>
    %81 = arith.cmpi slt, %79, %80 : vector<128x1xi32>
    %82 = arith.andi %77, %81 : vector<128x1xi1>
    %cst_30 = arith.constant 0.000000e+00 : f32
    %83 = vector.shape_cast %82 : vector<128x1xi1> to vector<128x1xi1>
    %84 = vector.broadcast %83 : vector<128x1xi1> to vector<128x128xi1>
    %85 = vector.broadcast %cst_30 : f32 to vector<128x128xf32>
    %86 = arith.select %84, %63, %85 : vector<128x128xi1>, vector<128x128xf32>
    %87 = arith.truncf %86 : vector<128x128xf32> to vector<128x128xbf16>
    %c7_i32_31 = arith.constant 7 : i32
    %88 = tpu.dynamic_rotate %30 by %c7_i32_31 dim 0 : vector<128x128xf32>, i32 -> vector<128x128xf32>
    %c-1_i32_32 = arith.constant -1 : i32
    %89 = vector.broadcast %c-1_i32_32 : i32 to vector<128x1xi32>
    %90 = arith.addi %37, %89 : vector<128x1xi32>
    %c0_i32_33 = arith.constant 0 : i32
    %91 = vector.broadcast %c0_i32_33 : i32 to vector<128x1xi32>
    %92 = arith.cmpi sge, %90, %91 : vector<128x1xi32>
    %c-1_i32_34 = arith.constant -1 : i32
    %93 = vector.broadcast %c-1_i32_34 : i32 to vector<128x1xi32>
    %94 = arith.addi %37, %93 : vector<128x1xi32>
    %c8_i32_35 = arith.constant 8 : i32
    %95 = vector.broadcast %c8_i32_35 : i32 to vector<128x1xi32>
    %96 = arith.cmpi slt, %94, %95 : vector<128x1xi32>
    %97 = arith.andi %92, %96 : vector<128x1xi1>
    %c1_i32 = arith.constant 1 : i32
    %98 = vector.broadcast %c1_i32 : i32 to vector<128x1xi32>
    %99 = arith.addi %33, %98 : vector<128x1xi32>
    %c0_i32_36 = arith.constant 0 : i32
    %100 = vector.broadcast %c0_i32_36 : i32 to vector<128x1xi32>
    %101 = arith.cmpi sge, %99, %100 : vector<128x1xi32>
    %102 = arith.andi %97, %101 : vector<128x1xi1>
    %c1_i32_37 = arith.constant 1 : i32
    %103 = vector.broadcast %c1_i32_37 : i32 to vector<128x1xi32>
    %104 = arith.addi %33, %103 : vector<128x1xi32>
    %c8_i32_38 = arith.constant 8 : i32
    %105 = vector.broadcast %c8_i32_38 : i32 to vector<128x1xi32>
    %106 = arith.cmpi slt, %104, %105 : vector<128x1xi32>
    %107 = arith.andi %102, %106 : vector<128x1xi1>
    %cst_39 = arith.constant 0.000000e+00 : f32
    %108 = vector.shape_cast %107 : vector<128x1xi1> to vector<128x1xi1>
    %109 = vector.broadcast %108 : vector<128x1xi1> to vector<128x128xi1>
    %110 = vector.broadcast %cst_39 : f32 to vector<128x128xf32>
    %111 = arith.select %109, %88, %110 : vector<128x128xi1>, vector<128x128xf32>
    %112 = arith.truncf %111 : vector<128x128xf32> to vector<128x128xbf16>
    %c1_i32_40 = arith.constant 1 : i32
    %113 = tpu.dynamic_rotate %30 by %c1_i32_40 dim 0 : vector<128x128xf32>, i32 -> vector<128x128xf32>
    %c0_i32_41 = arith.constant 0 : i32
    %114 = vector.broadcast %c0_i32_41 : i32 to vector<128x1xi32>
    %115 = arith.addi %37, %114 : vector<128x1xi32>
    %c0_i32_42 = arith.constant 0 : i32
    %116 = vector.broadcast %c0_i32_42 : i32 to vector<128x1xi32>
    %117 = arith.cmpi sge, %115, %116 : vector<128x1xi32>
    %c0_i32_43 = arith.constant 0 : i32
    %118 = vector.broadcast %c0_i32_43 : i32 to vector<128x1xi32>
    %119 = arith.addi %37, %118 : vector<128x1xi32>
    %c8_i32_44 = arith.constant 8 : i32
    %120 = vector.broadcast %c8_i32_44 : i32 to vector<128x1xi32>
    %121 = arith.cmpi slt, %119, %120 : vector<128x1xi32>
    %122 = arith.andi %117, %121 : vector<128x1xi1>
    %c-1_i32_45 = arith.constant -1 : i32
    %123 = vector.broadcast %c-1_i32_45 : i32 to vector<128x1xi32>
    %124 = arith.addi %33, %123 : vector<128x1xi32>
    %c0_i32_46 = arith.constant 0 : i32
    %125 = vector.broadcast %c0_i32_46 : i32 to vector<128x1xi32>
    %126 = arith.cmpi sge, %124, %125 : vector<128x1xi32>
    %127 = arith.andi %122, %126 : vector<128x1xi1>
    %c-1_i32_47 = arith.constant -1 : i32
    %128 = vector.broadcast %c-1_i32_47 : i32 to vector<128x1xi32>
    %129 = arith.addi %33, %128 : vector<128x1xi32>
    %c8_i32_48 = arith.constant 8 : i32
    %130 = vector.broadcast %c8_i32_48 : i32 to vector<128x1xi32>
    %131 = arith.cmpi slt, %129, %130 : vector<128x1xi32>
    %132 = arith.andi %127, %131 : vector<128x1xi1>
    %cst_49 = arith.constant 0.000000e+00 : f32
    %133 = vector.shape_cast %132 : vector<128x1xi1> to vector<128x1xi1>
    %134 = vector.broadcast %133 : vector<128x1xi1> to vector<128x128xi1>
    %135 = vector.broadcast %cst_49 : f32 to vector<128x128xf32>
    %136 = arith.select %134, %113, %135 : vector<128x128xi1>, vector<128x128xf32>
    %137 = arith.truncf %136 : vector<128x128xf32> to vector<128x128xbf16>
    %c0_i32_50 = arith.constant 0 : i32
    %138 = vector.broadcast %c0_i32_50 : i32 to vector<128x1xi32>
    %139 = arith.addi %37, %138 : vector<128x1xi32>
    %c0_i32_51 = arith.constant 0 : i32
    %140 = vector.broadcast %c0_i32_51 : i32 to vector<128x1xi32>
    %141 = arith.cmpi sge, %139, %140 : vector<128x1xi32>
    %c0_i32_52 = arith.constant 0 : i32
    %142 = vector.broadcast %c0_i32_52 : i32 to vector<128x1xi32>
    %143 = arith.addi %37, %142 : vector<128x1xi32>
    %c8_i32_53 = arith.constant 8 : i32
    %144 = vector.broadcast %c8_i32_53 : i32 to vector<128x1xi32>
    %145 = arith.cmpi slt, %143, %144 : vector<128x1xi32>
    %146 = arith.andi %141, %145 : vector<128x1xi1>
    %c0_i32_54 = arith.constant 0 : i32
    %147 = vector.broadcast %c0_i32_54 : i32 to vector<128x1xi32>
    %148 = arith.addi %33, %147 : vector<128x1xi32>
    %c0_i32_55 = arith.constant 0 : i32
    %149 = vector.broadcast %c0_i32_55 : i32 to vector<128x1xi32>
    %150 = arith.cmpi sge, %148, %149 : vector<128x1xi32>
    %151 = arith.andi %146, %150 : vector<128x1xi1>
    %c0_i32_56 = arith.constant 0 : i32
    %152 = vector.broadcast %c0_i32_56 : i32 to vector<128x1xi32>
    %153 = arith.addi %33, %152 : vector<128x1xi32>
    %c8_i32_57 = arith.constant 8 : i32
    %154 = vector.broadcast %c8_i32_57 : i32 to vector<128x1xi32>
    %155 = arith.cmpi slt, %153, %154 : vector<128x1xi32>
    %156 = arith.andi %151, %155 : vector<128x1xi1>
    %cst_58 = arith.constant 0.000000e+00 : f32
    %157 = vector.shape_cast %156 : vector<128x1xi1> to vector<128x1xi1>
    %158 = vector.broadcast %157 : vector<128x1xi1> to vector<128x128xi1>
    %159 = vector.broadcast %cst_58 : f32 to vector<128x128xf32>
    %160 = arith.select %158, %30, %159 : vector<128x128xi1>, vector<128x128xf32>
    %161 = arith.truncf %160 : vector<128x128xf32> to vector<128x128xbf16>
    %c127_i32 = arith.constant 127 : i32
    %162 = tpu.dynamic_rotate %30 by %c127_i32 dim 0 : vector<128x128xf32>, i32 -> vector<128x128xf32>
    %c0_i32_59 = arith.constant 0 : i32
    %163 = vector.broadcast %c0_i32_59 : i32 to vector<128x1xi32>
    %164 = arith.addi %37, %163 : vector<128x1xi32>
    %c0_i32_60 = arith.constant 0 : i32
    %165 = vector.broadcast %c0_i32_60 : i32 to vector<128x1xi32>
    %166 = arith.cmpi sge, %164, %165 : vector<128x1xi32>
    %c0_i32_61 = arith.constant 0 : i32
    %167 = vector.broadcast %c0_i32_61 : i32 to vector<128x1xi32>
    %168 = arith.addi %37, %167 : vector<128x1xi32>
    %c8_i32_62 = arith.constant 8 : i32
    %169 = vector.broadcast %c8_i32_62 : i32 to vector<128x1xi32>
    %170 = arith.cmpi slt, %168, %169 : vector<128x1xi32>
    %171 = arith.andi %166, %170 : vector<128x1xi1>
    %c1_i32_63 = arith.constant 1 : i32
    %172 = vector.broadcast %c1_i32_63 : i32 to vector<128x1xi32>
    %173 = arith.addi %33, %172 : vector<128x1xi32>
    %c0_i32_64 = arith.constant 0 : i32
    %174 = vector.broadcast %c0_i32_64 : i32 to vector<128x1xi32>
    %175 = arith.cmpi sge, %173, %174 : vector<128x1xi32>
    %176 = arith.andi %171, %175 : vector<128x1xi1>
    %c1_i32_65 = arith.constant 1 : i32
    %177 = vector.broadcast %c1_i32_65 : i32 to vector<128x1xi32>
    %178 = arith.addi %33, %177 : vector<128x1xi32>
    %c8_i32_66 = arith.constant 8 : i32
    %179 = vector.broadcast %c8_i32_66 : i32 to vector<128x1xi32>
    %180 = arith.cmpi slt, %178, %179 : vector<128x1xi32>
    %181 = arith.andi %176, %180 : vector<128x1xi1>
    %cst_67 = arith.constant 0.000000e+00 : f32
    %182 = vector.shape_cast %181 : vector<128x1xi1> to vector<128x1xi1>
    %183 = vector.broadcast %182 : vector<128x1xi1> to vector<128x128xi1>
    %184 = vector.broadcast %cst_67 : f32 to vector<128x128xf32>
    %185 = arith.select %183, %162, %184 : vector<128x128xi1>, vector<128x128xf32>
    %186 = arith.truncf %185 : vector<128x128xf32> to vector<128x128xbf16>
    %c121_i32 = arith.constant 121 : i32
    %187 = tpu.dynamic_rotate %30 by %c121_i32 dim 0 : vector<128x128xf32>, i32 -> vector<128x128xf32>
    %c1_i32_68 = arith.constant 1 : i32
    %188 = vector.broadcast %c1_i32_68 : i32 to vector<128x1xi32>
    %189 = arith.addi %37, %188 : vector<128x1xi32>
    %c0_i32_69 = arith.constant 0 : i32
    %190 = vector.broadcast %c0_i32_69 : i32 to vector<128x1xi32>
    %191 = arith.cmpi sge, %189, %190 : vector<128x1xi32>
    %c1_i32_70 = arith.constant 1 : i32
    %192 = vector.broadcast %c1_i32_70 : i32 to vector<128x1xi32>
    %193 = arith.addi %37, %192 : vector<128x1xi32>
    %c8_i32_71 = arith.constant 8 : i32
    %194 = vector.broadcast %c8_i32_71 : i32 to vector<128x1xi32>
    %195 = arith.cmpi slt, %193, %194 : vector<128x1xi32>
    %196 = arith.andi %191, %195 : vector<128x1xi1>
    %c-1_i32_72 = arith.constant -1 : i32
    %197 = vector.broadcast %c-1_i32_72 : i32 to vector<128x1xi32>
    %198 = arith.addi %33, %197 : vector<128x1xi32>
    %c0_i32_73 = arith.constant 0 : i32
    %199 = vector.broadcast %c0_i32_73 : i32 to vector<128x1xi32>
    %200 = arith.cmpi sge, %198, %199 : vector<128x1xi32>
    %201 = arith.andi %196, %200 : vector<128x1xi1>
    %c-1_i32_74 = arith.constant -1 : i32
    %202 = vector.broadcast %c-1_i32_74 : i32 to vector<128x1xi32>
    %203 = arith.addi %33, %202 : vector<128x1xi32>
    %c8_i32_75 = arith.constant 8 : i32
    %204 = vector.broadcast %c8_i32_75 : i32 to vector<128x1xi32>
    %205 = arith.cmpi slt, %203, %204 : vector<128x1xi32>
    %206 = arith.andi %201, %205 : vector<128x1xi1>
    %cst_76 = arith.constant 0.000000e+00 : f32
    %207 = vector.shape_cast %206 : vector<128x1xi1> to vector<128x1xi1>
    %208 = vector.broadcast %207 : vector<128x1xi1> to vector<128x128xi1>
    %209 = vector.broadcast %cst_76 : f32 to vector<128x128xf32>
    %210 = arith.select %208, %187, %209 : vector<128x128xi1>, vector<128x128xf32>
    %211 = arith.truncf %210 : vector<128x128xf32> to vector<128x128xbf16>
    %c120_i32 = arith.constant 120 : i32
    %212 = tpu.dynamic_rotate %30 by %c120_i32 dim 0 : vector<128x128xf32>, i32 -> vector<128x128xf32>
    %c1_i32_77 = arith.constant 1 : i32
    %213 = vector.broadcast %c1_i32_77 : i32 to vector<128x1xi32>
    %214 = arith.addi %37, %213 : vector<128x1xi32>
    %c0_i32_78 = arith.constant 0 : i32
    %215 = vector.broadcast %c0_i32_78 : i32 to vector<128x1xi32>
    %216 = arith.cmpi sge, %214, %215 : vector<128x1xi32>
    %c1_i32_79 = arith.constant 1 : i32
    %217 = vector.broadcast %c1_i32_79 : i32 to vector<128x1xi32>
    %218 = arith.addi %37, %217 : vector<128x1xi32>
    %c8_i32_80 = arith.constant 8 : i32
    %219 = vector.broadcast %c8_i32_80 : i32 to vector<128x1xi32>
    %220 = arith.cmpi slt, %218, %219 : vector<128x1xi32>
    %221 = arith.andi %216, %220 : vector<128x1xi1>
    %c0_i32_81 = arith.constant 0 : i32
    %222 = vector.broadcast %c0_i32_81 : i32 to vector<128x1xi32>
    %223 = arith.addi %33, %222 : vector<128x1xi32>
    %c0_i32_82 = arith.constant 0 : i32
    %224 = vector.broadcast %c0_i32_82 : i32 to vector<128x1xi32>
    %225 = arith.cmpi sge, %223, %224 : vector<128x1xi32>
    %226 = arith.andi %221, %225 : vector<128x1xi1>
    %c0_i32_83 = arith.constant 0 : i32
    %227 = vector.broadcast %c0_i32_83 : i32 to vector<128x1xi32>
    %228 = arith.addi %33, %227 : vector<128x1xi32>
    %c8_i32_84 = arith.constant 8 : i32
    %229 = vector.broadcast %c8_i32_84 : i32 to vector<128x1xi32>
    %230 = arith.cmpi slt, %228, %229 : vector<128x1xi32>
    %231 = arith.andi %226, %230 : vector<128x1xi1>
    %cst_85 = arith.constant 0.000000e+00 : f32
    %232 = vector.shape_cast %231 : vector<128x1xi1> to vector<128x1xi1>
    %233 = vector.broadcast %232 : vector<128x1xi1> to vector<128x128xi1>
    %234 = vector.broadcast %cst_85 : f32 to vector<128x128xf32>
    %235 = arith.select %233, %212, %234 : vector<128x128xi1>, vector<128x128xf32>
    %236 = arith.truncf %235 : vector<128x128xf32> to vector<128x128xbf16>
    %c119_i32 = arith.constant 119 : i32
    %237 = tpu.dynamic_rotate %30 by %c119_i32 dim 0 : vector<128x128xf32>, i32 -> vector<128x128xf32>
    %c1_i32_86 = arith.constant 1 : i32
    %238 = vector.broadcast %c1_i32_86 : i32 to vector<128x1xi32>
    %239 = arith.addi %37, %238 : vector<128x1xi32>
    %c0_i32_87 = arith.constant 0 : i32
    %240 = vector.broadcast %c0_i32_87 : i32 to vector<128x1xi32>
    %241 = arith.cmpi sge, %239, %240 : vector<128x1xi32>
    %c1_i32_88 = arith.constant 1 : i32
    %242 = vector.broadcast %c1_i32_88 : i32 to vector<128x1xi32>
    %243 = arith.addi %37, %242 : vector<128x1xi32>
    %c8_i32_89 = arith.constant 8 : i32
    %244 = vector.broadcast %c8_i32_89 : i32 to vector<128x1xi32>
    %245 = arith.cmpi slt, %243, %244 : vector<128x1xi32>
    %246 = arith.andi %241, %245 : vector<128x1xi1>
    %c1_i32_90 = arith.constant 1 : i32
    %247 = vector.broadcast %c1_i32_90 : i32 to vector<128x1xi32>
    %248 = arith.addi %33, %247 : vector<128x1xi32>
    %c0_i32_91 = arith.constant 0 : i32
    %249 = vector.broadcast %c0_i32_91 : i32 to vector<128x1xi32>
    %250 = arith.cmpi sge, %248, %249 : vector<128x1xi32>
    %251 = arith.andi %246, %250 : vector<128x1xi1>
    %c1_i32_92 = arith.constant 1 : i32
    %252 = vector.broadcast %c1_i32_92 : i32 to vector<128x1xi32>
    %253 = arith.addi %33, %252 : vector<128x1xi32>
    %c8_i32_93 = arith.constant 8 : i32
    %254 = vector.broadcast %c8_i32_93 : i32 to vector<128x1xi32>
    %255 = arith.cmpi slt, %253, %254 : vector<128x1xi32>
    %256 = arith.andi %251, %255 : vector<128x1xi1>
    %cst_94 = arith.constant 0.000000e+00 : f32
    %257 = vector.shape_cast %256 : vector<128x1xi1> to vector<128x1xi1>
    %258 = vector.broadcast %257 : vector<128x1xi1> to vector<128x128xi1>
    %259 = vector.broadcast %cst_94 : f32 to vector<128x128xf32>
    %260 = arith.select %258, %237, %259 : vector<128x128xi1>, vector<128x128xf32>
    %261 = arith.truncf %260 : vector<128x128xf32> to vector<128x128xbf16>
    %262 = tpu.concatenate %62, %87, %112, %137, %161, %186, %211, %236, %261 in 1 : vector<128x128xbf16>, vector<128x128xbf16>, vector<128x128xbf16>, vector<128x128xbf16>, vector<128x128xbf16>, vector<128x128xbf16>, vector<128x128xbf16>, vector<128x128xbf16>, vector<128x128xbf16> -> vector<128x1152xbf16>
    %c0_95 = arith.constant 0 : index
    %c0_96 = arith.constant 0 : index
    %263 = vector.load %arg3[%c0_95, %c0_96] : memref<1152x128xbf16, #tpu.memory_space<vmem>>, vector<1152x128xbf16>
    %cst_97 = arith.constant dense<0.000000e+00> : vector<128x128xf32>
    %264 = tpu.matmul %262, %263, %cst_97 {dimension_numbers = #tpu.dot_dimension_numbers<[1], [0], [0], [1], [0, 0, 1, 1], [], []>} : vector<128x1152xbf16>, vector<1152x128xbf16>, vector<128x128xf32> -> vector<128x128xf32>
    %c0_98 = arith.constant 0 : index
    %c0_99 = arith.constant 0 : index
    %265 = vector.load %arg8[%c0_98, %c0_99] : memref<1x128xf32, #tpu.memory_space<vmem>>, vector<1x128xf32>
    %c0_100 = arith.constant 0 : index
    %c0_101 = arith.constant 0 : index
    %266 = vector.load %arg9[%c0_100, %c0_101] : memref<1x128xf32, #tpu.memory_space<vmem>>, vector<1x128xf32>
    %cst_102 = arith.constant dense<0.000000e+00> : vector<128xf32>
    %267 = vector.multi_reduction <add>, %264, %cst_102 [0] : vector<128x128xf32> to vector<128xf32>
    %268 = vector.shape_cast %267 : vector<128xf32> to vector<1x128xf32>
    %269 = arith.mulf %264, %264 : vector<128x128xf32>
    %cst_103 = arith.constant dense<0.000000e+00> : vector<128xf32>
    %270 = vector.multi_reduction <add>, %269, %cst_103 [0] : vector<128x128xf32> to vector<128xf32>
    %271 = vector.shape_cast %270 : vector<128xf32> to vector<1x128xf32>
    %cst_104 = arith.constant 7.812500e-03 : f32
    %272 = vector.broadcast %cst_104 : f32 to vector<1x128xf32>
    %273 = arith.mulf %268, %272 : vector<1x128xf32>
    %cst_105 = arith.constant 7.812500e-03 : f32
    %274 = vector.broadcast %cst_105 : f32 to vector<1x128xf32>
    %275 = arith.mulf %271, %274 : vector<1x128xf32>
    %276 = arith.mulf %273, %273 : vector<1x128xf32>
    %277 = arith.subf %275, %276 : vector<1x128xf32>
    %cst_106 = arith.constant 0.000000e+00 : f32
    %278 = vector.broadcast %cst_106 : f32 to vector<1x128xf32>
    %279 = arith.maximumf %277, %278 : vector<1x128xf32>
    %280 = vector.broadcast %273 : vector<1x128xf32> to vector<128x128xf32>
    %281 = arith.subf %264, %280 : vector<128x128xf32>
    %cst_107 = arith.constant 9.99999974E-6 : f32
    %282 = vector.broadcast %cst_107 : f32 to vector<1x128xf32>
    %283 = arith.addf %279, %282 : vector<1x128xf32>
    %284 = math.rsqrt %283 : vector<1x128xf32>
    %285 = vector.broadcast %284 : vector<1x128xf32> to vector<128x128xf32>
    %286 = arith.mulf %281, %285 : vector<128x128xf32>
    %287 = vector.broadcast %265 : vector<1x128xf32> to vector<128x128xf32>
    %288 = arith.mulf %286, %287 : vector<128x128xf32>
    %289 = vector.broadcast %266 : vector<1x128xf32> to vector<128x128xf32>
    %290 = arith.addf %288, %289 : vector<128x128xf32>
    %c0_108 = arith.constant 0 : index
    %c0_109 = arith.constant 0 : index
    %291 = vector.load %arg4[%c0_108, %c0_109] : memref<128x128xbf16, #tpu.memory_space<vmem>>, vector<128x128xbf16>
    %c0_110 = arith.constant 0 : index
    %c0_111 = arith.constant 0 : index
    %292 = vector.load %arg5[%c0_110, %c0_111] : memref<128x128xbf16, #tpu.memory_space<vmem>>, vector<128x128xbf16>
    %cst_112 = arith.constant dense<0.000000e+00> : vector<128x128xf32>
    %293 = tpu.matmul %291, %292, %cst_112 {dimension_numbers = #tpu.dot_dimension_numbers<[1], [0], [0], [1], [0, 0, 1, 1], [], []>} : vector<128x128xbf16>, vector<128x128xbf16>, vector<128x128xf32> -> vector<128x128xf32>
    %c0_113 = arith.constant 0 : index
    %c0_114 = arith.constant 0 : index
    %294 = vector.load %arg10[%c0_113, %c0_114] : memref<1x128xf32, #tpu.memory_space<vmem>>, vector<1x128xf32>
    %c0_115 = arith.constant 0 : index
    %c0_116 = arith.constant 0 : index
    %295 = vector.load %arg11[%c0_115, %c0_116] : memref<1x128xf32, #tpu.memory_space<vmem>>, vector<1x128xf32>
    %cst_117 = arith.constant dense<0.000000e+00> : vector<128xf32>
    %296 = vector.multi_reduction <add>, %293, %cst_117 [0] : vector<128x128xf32> to vector<128xf32>
    %297 = vector.shape_cast %296 : vector<128xf32> to vector<1x128xf32>
    %298 = arith.mulf %293, %293 : vector<128x128xf32>
    %cst_118 = arith.constant dense<0.000000e+00> : vector<128xf32>
    %299 = vector.multi_reduction <add>, %298, %cst_118 [0] : vector<128x128xf32> to vector<128xf32>
    %300 = vector.shape_cast %299 : vector<128xf32> to vector<1x128xf32>
    %cst_119 = arith.constant 7.812500e-03 : f32
    %301 = vector.broadcast %cst_119 : f32 to vector<1x128xf32>
    %302 = arith.mulf %297, %301 : vector<1x128xf32>
    %cst_120 = arith.constant 7.812500e-03 : f32
    %303 = vector.broadcast %cst_120 : f32 to vector<1x128xf32>
    %304 = arith.mulf %300, %303 : vector<1x128xf32>
    %305 = arith.mulf %302, %302 : vector<1x128xf32>
    %306 = arith.subf %304, %305 : vector<1x128xf32>
    %cst_121 = arith.constant 0.000000e+00 : f32
    %307 = vector.broadcast %cst_121 : f32 to vector<1x128xf32>
    %308 = arith.maximumf %306, %307 : vector<1x128xf32>
    %309 = vector.broadcast %302 : vector<1x128xf32> to vector<128x128xf32>
    %310 = arith.subf %293, %309 : vector<128x128xf32>
    %cst_122 = arith.constant 9.99999974E-6 : f32
    %311 = vector.broadcast %cst_122 : f32 to vector<1x128xf32>
    %312 = arith.addf %308, %311 : vector<1x128xf32>
    %313 = math.rsqrt %312 : vector<1x128xf32>
    %314 = vector.broadcast %313 : vector<1x128xf32> to vector<128x128xf32>
    %315 = arith.mulf %310, %314 : vector<128x128xf32>
    %316 = vector.broadcast %294 : vector<1x128xf32> to vector<128x128xf32>
    %317 = arith.mulf %315, %316 : vector<128x128xf32>
    %318 = vector.broadcast %295 : vector<1x128xf32> to vector<128x128xf32>
    %319 = arith.addf %317, %318 : vector<128x128xf32>
    %320 = arith.addf %319, %290 : vector<128x128xf32>
    %cst_123 = arith.constant 0.000000e+00 : f32
    %321 = vector.broadcast %cst_123 : f32 to vector<128x128xf32>
    %322 = arith.maximumf %320, %321 : vector<128x128xf32>
    %c0_124 = arith.constant 0 : index
    %c0_125 = arith.constant 0 : index
    %323 = vector.load %arg12[%c0_124, %c0_125] : memref<128x128xf32, #tpu.memory_space<vmem>>, vector<128x128xf32>
    tpu.vector_store %arg12[%c0_124, %c0_125], %322 {strides = array<i32>} : memref<128x128xf32, #tpu.memory_space<vmem>>, vector<128x128xf32>,
    return
  }
  func.func @transform_0(%arg0: i32) -> (i32, i32) {
    %c0_i32 = arith.constant 0 : i32
    %c0_i32_0 = arith.constant 0 : i32
    %c0_i32_1 = arith.constant 0 : i32
    return %c0_i32, %c0_i32_0 : i32, i32
  }
  func.func @transform_1(%arg0: i32) -> (i32, i32) {
    %c0_i32 = arith.constant 0 : i32
    %c0_i32_0 = arith.constant 0 : i32
    %c0_i32_1 = arith.constant 0 : i32
    return %c0_i32, %c0_i32_0 : i32, i32
  }
  func.func @transform_2(%arg0: i32) -> (i32, i32) {
    %c0_i32 = arith.constant 0 : i32
    %c0_i32_0 = arith.constant 0 : i32
    %c0_i32_1 = arith.constant 0 : i32
    return %c0_i32, %c0_i32_0 : i32, i32
  }
  func.func @transform_3(%arg0: i32) -> (i32, i32) {
    %c0_i32 = arith.constant 0 : i32
    %c0_i32_0 = arith.constant 0 : i32
    %c0_i32_1 = arith.constant 0 : i32
    return %c0_i32, %c0_i32_0 : i32, i32
  }
  func.func @transform_4(%arg0: i32) -> (i32, i32) {
    %c0_i32 = arith.constant 0 : i32
    %c0_i32_0 = arith.constant 0 : i32
    %c0_i32_1 = arith.constant 0 : i32
    return %c0_i32, %c0_i32_0 : i32, i32
  }
  func.func @transform_5(%arg0: i32) -> (i32, i32) {
    %c0_i32 = arith.constant 0 : i32
    %c0_i32_0 = arith.constant 0 : i32
    %c0_i32_1 = arith.constant 0 : i32
    return %c0_i32, %c0_i32_0 : i32, i32
  }
  func.func @transform_6(%arg0: i32) -> (i32, i32) {
    %c0_i32 = arith.constant 0 : i32
    %c0_i32_0 = arith.constant 0 : i32
    %c0_i32_1 = arith.constant 0 : i32
    return %c0_i32, %c0_i32_0 : i32, i32
  }
  func.func @transform_7(%arg0: i32) -> (i32, i32) {
    %c0_i32 = arith.constant 0 : i32
    %c0_i32_0 = arith.constant 0 : i32
    %c0_i32_1 = arith.constant 0 : i32
    return %c0_i32, %c0_i32_0 : i32, i32
  }
  func.func @transform_8(%arg0: i32) -> (i32, i32) {
    %c0_i32 = arith.constant 0 : i32
    %c0_i32_0 = arith.constant 0 : i32
    %c0_i32_1 = arith.constant 0 : i32
    return %c0_i32, %c0_i32_0 : i32, i32
  }
  func.func @transform_9(%arg0: i32) -> (i32, i32) {
    %c0_i32 = arith.constant 0 : i32
    %c0_i32_0 = arith.constant 0 : i32
    %c0_i32_1 = arith.constant 0 : i32
    return %c0_i32, %c0_i32_0 : i32, i32
  }
  func.func @transform_10(%arg0: i32) -> (i32, i32) {
    %c0_i32 = arith.constant 0 : i32
    %c0_i32_0 = arith.constant 0 : i32
    %c0_i32_1 = arith.constant 0 : i32
    return %c0_i32, %c0_i32_0 : i32, i32
  }
  func.func @transform_11(%arg0: i32) -> (i32, i32) {
    %c0_i32 = arith.constant 0 : i32
    %c0_i32_0 = arith.constant 0 : i32
    %c0_i32_1 = arith.constant 0 : i32
    return %c0_i32, %c0_i32_0 : i32, i32
  }
}

</mosaic_0001>

<bundles_post_ra>
// kernel: residual_block_forward.1
= control target key start
LH: loop header
LB: loop body
LE: loop exit
PB: predicated region body
PF: predicated region fallthrough
CT: control target
= control target key end

     0   :  { %s7666_s0 = inlined_call_operand.vmem [shape: bf16[128,128], index: 0, kind: input, shape index: {}]   ;;  %s7667_s1 = inlined_call_operand.vmem [shape: bf16[128,128], index: 1, kind: input, shape index: {}]   ;;  %s7668_s2 = inlined_call_operand.vmem [shape: bf16[1152,128], index: 2, kind: input, shape index: {}]   ;;  %s7669_s3 = inlined_call_operand.vmem [shape: bf16[128,128], index: 3, kind: input, shape index: {}]   ;;  %s7670_s4 = inlined_call_operand.vmem [shape: bf16[128,128], index: 4, kind: input, shape index: {}]   ;;  %s7671_s5 = inlined_call_operand.vmem [shape: f32[1,128], index: 5, kind: input, shape index: {}]   ;;  %s7672_s6 = inlined_call_operand.vmem [shape: f32[1,128], index: 6, kind: input, shape index: {}]   ;;  %s7673_s7 = inlined_call_operand.vmem [shape: f32[1,128], index: 7, kind: input, shape index: {}]   ;;  %s7674_s8 = inlined_call_operand.vmem [shape: f32[1,128], index: 8, kind: input, shape index: {}]   ;;  %s7675_s9 = inlined_call_operand.vmem [shape: f32[1,128], index: 9, kind: input, shape index: {}]   ;;  %s7676_s10 = inlined_call_operand.vmem [shape: f32[1,128], index: 10, kind: input, shape index: {}]   ;;  %s7677_s11 = inlined_call_operand.hbm [shape: f32[128,128], index: 11, kind: output, shape index: {}]  }
   0x1   :  { %v4032_v0 = vld [vmem:[%s7667_s1] sm:$0xff]   ;;  %v4033_v1 = vld [vmem:[%s7667_s1 + $0x8] sm:$0xff]   ;;  %v4034_v2 = vld [vmem:[%s7667_s1 + $0x10] sm:$0xff]  }
   0x2   :  { %3917 = vmatprep.subr.bf16.mxu0 %v4032_v0  ;;  %v4035_v3 = vld [vmem:[%s7667_s1 + $0x18] sm:$0xff]   ;;  %v4040_v4 = vld [vmem:[%s7666_s0] sm:$0xff]   ;;  %v4037_v6 = vld [vmem:[%s7667_s1 + $0x28] sm:$0xff]  }
   0x3   :  { %3918 = vmatpush3.bf16.msra.mxu0 %v4032_v0  ;;  %3933 = vmatprep.mubr.bf16.mxu0 %v4040_v4  ;;  %v4036_v5 = vld [vmem:[%s7667_s1 + $0x20] sm:$0xff]   ;;  %v4038_v7 = vld [vmem:[%s7667_s1 + $0x30] sm:$0xff]   ;;  %v4039_v8 = vld [vmem:[%s7667_s1 + $0x38] sm:$0xff]  }
   0x4   :  { %3919 = vmatprep.subr.bf16.mxu0 %v4033_v1  ;;  %v4041_v9 = vld [vmem:[%s7666_s0 + $0x8] sm:$0xff]   ;;  %v4042_v10 = vld [vmem:[%s7666_s0 + $0x10] sm:$0xff]   ;;  %v4043_v11 = vld [vmem:[%s7666_s0 + $0x18] sm:$0xff]  }
   0x5   :  { %v4044_v12 = vld [vmem:[%s7666_s0 + $0x20] sm:$0xff]   ;;  %v4045_v13 = vld [vmem:[%s7666_s0 + $0x28] sm:$0xff]   ;;  %v4046_v14 = vld [vmem:[%s7666_s0 + $0x30] sm:$0xff]  }
   0x6   :  { %v4047_v15 = vld [vmem:[%s7666_s0 + $0x38] sm:$0xff]  }
   0x7   :  { %3920 = vmatpush3.bf16.msra.mxu0 %v4033_v1 }
   0x8   :  { %3921 = vmatprep.subr.bf16.mxu0 %v4034_v2 }
   0xb   :  { %3922 = vmatpush3.bf16.msra.mxu0 %v4034_v2 }
   0xc   :  { %3923 = vmatprep.subr.bf16.mxu0 %v4035_v3 }
   0xf   :  { %3924 = vmatpush3.bf16.msra.mxu0 %v4035_v3 }
  0x10   :  { %3925 = vmatprep.subr.bf16.mxu0 %v4036_v5 }
  0x13   :  { %3926 = vmatpush3.bf16.msra.mxu0 %v4036_v5 }
  0x14   :  { %3927 = vmatprep.subr.bf16.mxu0 %v4037_v6 }
  0x17   :  { %3928 = vmatpush3.bf16.msra.mxu0 %v4037_v6 }
  0x18   :  { %3929 = vmatprep.subr.bf16.mxu0 %v4038_v7 }
  0x1b   :  { %3930 = vmatpush3.bf16.msra.mxu0 %v4038_v7 }
  0x1c   :  { %3931 = vmatprep.subr.bf16.mxu0 %v4039_v8 }
  0x1f   :  { %3932 = vmatpush3.bf16.msra.mxu0 %v4039_v8 }
  0x22   :  { %3934 = vmatmul.mubr.bf16.vlgmr.msra.gmra.mrb[0].mxu0 %v4041_v9 }
  0x23   :  { %3937 = vmatprep.mubr.bf16.mxu0 %v4042_v10 }
  0x2a   :  { %3938 = vmatmul.mubr.bf16.gmra.mrb[4].mxu0 %v4043_v11 }
  0x2b   :  { %3941 = vmatprep.mubr.bf16.mxu0 %v4044_v12 }
  0x32   :  { %3942 = vmatmul.mubr.bf16.gmra.mrb[8].mxu0 %v4045_v13 }
  0x33   :  { %3945 = vmatprep.mubr.bf16.mxu0 %v4046_v14 }
  0x3a   :  { %3946 = vmatmul.mubr.bf16.gmra.mrb[12].mxu0 %v4047_v15 }
  0x3b   :  { %16 = vsyncpa [#allocation3], 0  ;;  %v4048_v16 = vld [vmem:[%s7668_s2 + $0x40] sm:$0xff]   ;;  %v4052_v20 = vld [vmem:[%s7668_s2 + $0x48] sm:$0xff]   ;;  %v424_v6 = vlaneseq }
  0x3c   :  { %v4049_v17 = vld [vmem:[%s7668_s2] sm:$0xff]   ;;  %3629 = vmatprep.subr.bf16.mxu1 %v4048_v16  ;;  %v4053_v21 = vld [vmem:[%s7668_s2 + $0x8] sm:$0xff]   ;;  %v4056_v24 = vld [vmem:[%s7668_s2 + $0x50] sm:$0xff]  }
  0x3d   :  { %v4050_v18 = vld [vmem:[%s7668_s2 + $0xc0] sm:$0xff]   ;;  %3630 = vmatpush3.bf16.msra.mxu1 %v4049_v17  ;;  %v4054_v22 = vld [vmem:[%s7668_s2 + $0xc8] sm:$0xff]   ;;  %v4057_v25 = vld [vmem:[%s7668_s2 + $0x10] sm:$0xff]   ;;  %v4416_v13 = vshrl.u32 %v424_v6, 7 }
  0x3e   :  { %v4051_v19 = vld [vmem:[%s7668_s2 + $0x80] sm:$0xff]   ;;  %3693 = vmatprep.subr.bf16.mxu0 %v4050_v18  ;;  %3631 = vmatprep.subr.bf16.mxu1 %v4052_v20  ;;  %v4055_v23 = vld [vmem:[%s7668_s2 + $0x88] sm:$0xff]   ;;  %v4058_v26 = vld [vmem:[%s7668_s2 + $0xd0] sm:$0xff]  }
  0x3f   :  { %3694 = vmatpush3.bf16.msra.mxu0 %v4051_v19  ;;  %v4059_v27 = vld [vmem:[%s7668_s2 + $0x90] sm:$0xff]   ;;  %v4060_v28 = vld [vmem:[%s7668_s2 + $0x58] sm:$0xff]   ;;  %v4064_v32 = vld [vmem:[%s7668_s2 + $0x60] sm:$0xff]  }
  0x40   :  { %3695 = vmatprep.subr.bf16.mxu0 %v4054_v22  ;;  %v4061_v29 = vld [vmem:[%s7668_s2 + $0x18] sm:$0xff]   ;;  %v4065_v33 = vld [vmem:[%s7668_s2 + $0x20] sm:$0xff]   ;;  %v4068_v36 = vld [vmem:[%s7668_s2 + $0x68] sm:$0xff]  }
  0x41   :  { %3632 = vmatpush3.bf16.msra.mxu1 %v4053_v21  ;;  %v4062_v30 = vld [vmem:[%s7668_s2 + $0xd8] sm:$0xff]   ;;  %v4066_v34 = vld [vmem:[%s7668_s2 + $0xe0] sm:$0xff]   ;;  %v4069_v37 = vld [vmem:[%s7668_s2 + $0x28] sm:$0xff]  }
  0x42   :  { %3633 = vmatprep.subr.bf16.mxu1 %v4056_v24  ;;  %v4063_v31 = vld [vmem:[%s7668_s2 + $0x98] sm:$0xff]   ;;  %v4067_v35 = vld [vmem:[%s7668_s2 + $0xa0] sm:$0xff]   ;;  %v4070_v38 = vld [vmem:[%s7668_s2 + $0xe8] sm:$0xff]   ;;  %v426_v24 = vadd.s32 8, %v4416_v13 }
  0x43   :  { %3696 = vmatpush3.bf16.msra.mxu0 %v4055_v23  ;;  %v4071_v39 = vld [vmem:[%s7668_s2 + $0xa8] sm:$0xff]   ;;  %v4072_v40 = vld [vmem:[%s7668_s2 + $0x70] sm:$0xff]   ;;  %v4076_v44 = vld [vmem:[%s7668_s2 + $0x78] sm:$0xff]  }
  0x44   :  { %3697 = vmatprep.subr.bf16.mxu0 %v4058_v26  ;;  %v4073_v41 = vld [vmem:[%s7668_s2 + $0x30] sm:$0xff]   ;;  %v4077_v45 = vld [vmem:[%s7668_s2 + $0x38] sm:$0xff]   ;;  %v4080_v48 = vld [vmem:[%s7668_s2 + $0x140] sm:$0xff]  }
  0x45   :  { %3634 = vmatpush3.bf16.msra.mxu1 %v4057_v25  ;;  %v4074_v42 = vld [vmem:[%s7668_s2 + $0xf0] sm:$0xff]   ;;  %v4078_v46 = vld [vmem:[%s7668_s2 + $0xf8] sm:$0xff]   ;;  %v4085_v49 = vld [vmem:[%s7668_s2 + $0x1c0] sm:$0xff]  }
  0x46   :  { %3635 = vmatprep.subr.bf16.mxu1 %v4060_v28  ;;  %v4075_v43 = vld [vmem:[%s7668_s2 + $0xb0] sm:$0xff]   ;;  %v4079_v47 = vld [vmem:[%s7668_s2 + $0xb8] sm:$0xff]  }
  0x47   :  { %3698 = vmatpush3.bf16.msra.mxu0 %v4059_v27 }
  0x48   :  { %3699 = vmatprep.subr.bf16.mxu0 %v4062_v30 }
  0x49   :  { %3636 = vmatpush3.bf16.msra.mxu1 %v4061_v29 }
  0x4a   :  { %3637 = vmatprep.subr.bf16.mxu1 %v4064_v32  ;;  %v458_v32 = vshra.s32 %v426_v24, 3 }
  0x4b   :  { %3700 = vmatpush3.bf16.msra.mxu0 %v4063_v31  ;;  %v457_v31 = vshra.s32 %v4416_v13, 3 }
  0x4c   :  { %3701 = vmatprep.subr.bf16.mxu0 %v4066_v34  ;;  %v428_v34 = vadd.s32 24, %v4416_v13 }
  0x4d   :  { %3638 = vmatpush3.bf16.msra.mxu1 %v4065_v33  ;;  %v427_v33 = vadd.s32 16, %v4416_v13 }
  0x4e   :  { %3639 = vmatprep.subr.bf16.mxu1 %v4068_v36 }
  0x4f   :  { %3702 = vmatpush3.bf16.msra.mxu0 %v4067_v35 }
  0x50   :  { %3703 = vmatprep.subr.bf16.mxu0 %v4070_v38 }
  0x51   :  { %3640 = vmatpush3.bf16.msra.mxu1 %v4069_v37 }
  0x52   :  { %3641 = vmatprep.subr.bf16.mxu1 %v4072_v40 }
  0x53   :  { %3704 = vmatpush3.bf16.msra.mxu0 %v4071_v39 }
  0x54   :  { %3705 = vmatprep.subr.bf16.mxu0 %v4074_v42 }
  0x55   :  { %3642 = vmatpush3.bf16.msra.mxu1 %v4073_v41 }
  0x56   :  { %3643 = vmatprep.subr.bf16.mxu1 %v4076_v44  ;;  %v4454_v44 = vand.u32 7, %v457_v31 }
  0x57   :  { %3706 = vmatpush3.bf16.msra.mxu0 %v4075_v43 }
  0x58   :  { %3707 = vmatprep.subr.bf16.mxu0 %v4078_v46  ;;  %v4458_v46 = vand.u32 7, %v458_v32  ;;  %vm1011_vm2 = vcmp.ge.s32.totalorder %v4454_v44, 0  ;;  %vm1027_vm3 = vcmp.lt.s32.totalorder %v4454_v44, 8 }
  0x59   :  { %3644 = vmatpush3.bf16.msra.mxu1 %v4077_v45  ;;  %vm4666_vm10 = vmand %vm1011_vm2, %vm1027_vm3 }
  0x5a   :  { %3757 = vmatprep.subr.bf16.mxu1 %v4080_v48  ;;  %v460_v48 = vshra.s32 %v428_v34, 3  ;;  %vm1012_vm4 = vcmp.ge.s32.totalorder %v4458_v46, 0  ;;  %vm1028_vm5 = vcmp.lt.s32.totalorder %v4458_v46, 8 }
  0x5b   :  { %3708 = vmatpush3.bf16.msra.mxu0 %v4079_v47  ;;  %v459_v47 = vshra.s32 %v427_v33, 3  ;;  %vm4687_vm2 = vmand %vm1012_vm4, %vm1028_vm5 }
  0x5c   :  { %3821 = vmatprep.subr.bf16.mxu0 %v4085_v49  ;;  %v4477_v6 = vand.u32 7, %v460_v48 }
  0x5e   :  { %8075 = vst [vmem:[#allocation14_spill] sm:$0xff] %v4477_v6 }
  0xf5   :  { %v4379_v50 = vpop.f32.mrb[0].mxu0 }
  0xf6   :  { %v4381_v51 = vpop.f32.mrb[1].mxu0  ;;  %v290_v57 = vmul.f32 %v4379_v50, %v4379_v50 }
  0xf7   :  { %v4383_v52 = vpop.f32.mrb[2].mxu0  ;;  %v288_v54 = vmul.f32 %v4381_v51, %v4381_v51 }
  0xf8   :  { %v4385_v53 = vpop.f32.mrb[3].mxu0  ;;  %v291_v60 = vmul.f32 %v4383_v52, %v4383_v52 }
  0xf9   :  { %v267_v55 = vadd.f32 %v4385_v53, %v4381_v51  ;;  %v289_v56 = vmul.f32 %v4385_v53, %v4385_v53 }
  0xfb   :  { %v268_v58 = vadd.f32 %v4379_v50, %v267_v55  ;;  %v304_v59 = vadd.f32 %v289_v56, %v288_v54  ;;  %v441_v56 = vand.u32 7, %v4416_v13 }
  0xfd   :  { %v305_v61 = vadd.f32 %v304_v59, %v290_v57  ;;  %v4398_v62 = vpop.f32.mrb[4].mxu0  ;;  %v269_v63 = vadd.f32 %v4383_v52, %v268_v58  ;;  %v442_v57 = vand.u32 7, %v426_v24  ;;  %v429_v58 = vadd.s32 32, %v4416_v13 }
  0xfe   :  { %8066 = vst [vmem:[#allocation5_spill] sm:$0xff] %v4398_v62  ;;  %v4401_v0 = vpop.f32.mrb[5].mxu0  ;;  %v294_v10 = vmul.f32 %v4398_v62, %v4398_v62  ;;  %v430_v59 = vadd.s32 40, %v4416_v13  ;;  %v4489_v24 = vadd.s32 4294967295, %v441_v56 }
  0xff   :  { %v270_v1 = vadd.f32 %v269_v63, %v4401_v0  ;;  %v292_v2 = vmul.f32 %v4401_v0, %v4401_v0  ;;  %v306_v3 = vadd.f32 %v305_v61, %v291_v60  ;;  %v4406_v4 = vpop.f32.mrb[6].mxu0 }
 0x100   :  { %8067 = vst [vmem:[#allocation6_spill] sm:$0xff] %v4406_v4  ;;  %v4408_v5 = vpop.f32.mrb[7].mxu0  ;;  %v295_v14 = vmul.f32 %v4406_v4, %v4406_v4 }
 0x101   :  { %8068 = vst [vmem:[#allocation7_spill] sm:$0xff] %v4408_v5  ;;  %v307_v7 = vadd.f32 %v306_v3, %v292_v2  ;;  %v271_v8 = vadd.f32 %v270_v1, %v4408_v5  ;;  %v293_v9 = vmul.f32 %v4408_v5, %v4408_v5  ;;  %v4470_v1 = vadd.s32 4294967295, %v4454_v44 }
 0x102   :  { %v4473_v2 = vadd.s32 4294967295, %v4458_v46  ;;  %v4475_v3 = vand.u32 7, %v459_v47  ;;  %v8097_v5 = vmov 0 }
 0x103   :  { %v272_v11 = vadd.f32 %v4398_v62, %v271_v8  ;;  %v308_v12 = vadd.f32 %v307_v7, %v293_v9  ;;  %v443_v7 = vand.u32 7, %v427_v33  ;;  %vm538_vm0 = vcmp.ge.s32.totalorder %v4470_v1, 0 }
 0x104   :  { %8074 = vst [vmem:[#allocation13_spill] sm:$0xff] %v4475_v3  ;;  %vm554_vm1 = vcmp.lt.s32.totalorder %v4470_v1, 8  ;;  %vm539_vm6 = vcmp.ge.s32.totalorder %v4473_v2, 0  ;;  %vm555_vm7 = vcmp.lt.s32.totalorder %v4473_v2, 8  ;;  %v8101_v1 = vmov 0 }
 0x105   :  { %v309_v15 = vadd.f32 %v308_v12, %v294_v10  ;;  %v4420_v16 = vpop.f32.mrb[8].mxu0  ;;  %v273_v17 = vadd.f32 %v4406_v4, %v272_v11  ;;  %v444_v11 = vand.u32 7, %v428_v34  ;;  %v4482_v12 = vadd.s32 1, %v441_v56  ;;  %vm4651_vm14 = vmand %vm538_vm0, %vm554_vm1 }
 0x106   :  { %8069 = vst [vmem:[#allocation8_spill] sm:$0xff] %v4420_v16  ;;  %v4423_v18 = vpop.f32.mrb[9].mxu0  ;;  %v298_v28 = vmul.f32 %v4420_v16, %v4420_v16  ;;  %v4502_v31 = vadd.s32 4294967295, %v443_v7  ;;  %v4517_v47 = vadd.s32 1, %v443_v7  ;;  %v8098_v5 = vsel %vm4651_vm14, 4294967295, %v8097_v5  ;;  %vm4700_vm3 = vmand %vm539_vm6, %vm555_vm7 }
 0x107   :  { %8070 = vst [vmem:[#allocation9_spill] sm:$0xff] %v4423_v18  ;;  %v274_v19 = vadd.f32 %v273_v17, %v4423_v18  ;;  %v296_v20 = vmul.f32 %v4423_v18, %v4423_v18  ;;  %v310_v21 = vadd.f32 %v309_v15, %v295_v14  ;;  %v4428_v22 = vpop.f32.mrb[10].mxu0  ;;  %8076 = vst [vmem:[#allocation15_spill] sm:$0xff] %v4482_v12  ;;  %v461_v14 = vshra.s32 %v429_v58, 3 }
 0x108   :  { %8071 = vst [vmem:[#allocation10_spill] sm:$0xff] %v4428_v22  ;;  %v4430_v23 = vpop.f32.mrb[11].mxu0  ;;  %v299_v35 = vmul.f32 %v4428_v22, %v4428_v22  ;;  %v462_v15 = vshra.s32 %v430_v59, 3  ;;  %v4485_v17 = vadd.s32 48, %v4416_v13  ;;  %8078 = vst [vmem:[#allocation17_spill] sm:$0xff] %v4502_v31  ;;  %v4504_v32 = vadd.s32 4294967295, %v444_v11 }
 0x109   :  { %8072 = vst [vmem:[#allocation11_spill] sm:$0xff] %v4430_v23  ;;  %v311_v25 = vadd.f32 %v310_v21, %v296_v20  ;;  %v275_v26 = vadd.f32 %v274_v19, %v4430_v23  ;;  %v297_v27 = vmul.f32 %v4430_v23, %v4430_v23  ;;  %v4487_v21 = vadd.s32 1, %v442_v57  ;;  %8082 = vst [vmem:[#allocation21_spill] sm:$0xff] %v4517_v47 }
 0x10a   :  { %8079 = vst [vmem:[#allocation18_spill] sm:$0xff] %v4504_v32  ;;  %v4506_v33 = vand.u32 7, %v461_v14  ;;  %v4508_v34 = vand.u32 7, %v462_v15  ;;  %v4519_v48 = vadd.s32 1, %v444_v11  ;;  %v8102_v1 = vsel %vm4666_vm10, 4294967295, %v8101_v1 }
 0x10b   :  { %v276_v29 = vadd.f32 %v4420_v16, %v275_v26  ;;  %v312_v30 = vadd.f32 %v311_v25, %v297_v27  ;;  %8077 = vst [vmem:[#allocation16_spill] sm:$0xff] %v4487_v21  ;;  %v4491_v25 = vadd.s32 4294967295, %v442_v57  ;;  %v4494_v26 = vadd.s32 4294967295, %v4475_v3  ;;  %8103 = vst [vmem:[#allocation35_spill] sm:$0xff] %v8102_v1 }
 0x10c   :  { %v4497_v27 = vadd.s32 4294967295, %v4477_v6  ;;  %8080 = vst [vmem:[#allocation19_spill] sm:$0xff] %v4506_v33  ;;  %8081 = vst [vmem:[#allocation20_spill] sm:$0xff] %v4508_v34  ;;  %v7679_v57 = vand.u32 7, %v4485_v17  ;;  %v8106_v16 = vmov 0  ;;  %vm8120_vm7 = vcmp.ge.s32.totalorder %v4489_v24, 0 }
 0x10d   :  { %v313_v36 = vadd.f32 %v312_v30, %v298_v28  ;;  %v4444_v37 = vpop.f32.mrb[12].mxu0  ;;  %v277_v38 = vadd.f32 %v4428_v22, %v276_v29  ;;  %v4500_v28 = vadd.s32 56, %v4416_v13  ;;  %8083 = vst [vmem:[#allocation22_spill] sm:$0xff] %v4519_v48  ;;  %vm540_vm8 = vcmp.ge.s32.totalorder %v4494_v26, 0  ;;  %vm8126_vm5 = vmmov %vm8120_vm7 }
 0x10e   :  { %v4447_v39 = vpop.f32.mrb[13].mxu0  ;;  %v302_v60 = vmul.f32 %v4444_v37, %v4444_v37  ;;  %vm556_vm9 = vcmp.lt.s32.totalorder %v4494_v26, 8  ;;  %vm557_vm15 = vcmp.lt.s32.totalorder %v4497_v27, 8  ;;  %v8107_v16 = vsel %vm4687_vm2, 4294967295, %v8106_v16  ;;  %vm4750_vm1 = vmand %vm4666_vm10, %vm8126_vm5 }
 0x10f   :  { %8073 = vst [vmem:[#allocation12_spill] sm:$0xff] %v4447_v39  ;;  %v278_v40 = vadd.f32 %v277_v38, %v4447_v39  ;;  %v300_v41 = vmul.f32 %v4447_v39, %v4447_v39  ;;  %v314_v42 = vadd.f32 %v313_v36, %v299_v35  ;;  %v4452_v43 = vpop.f32.mrb[14].mxu0  ;;  %v463_v35 = vshra.s32 %v4485_v17, 3  ;;  %8108 = vst [vmem:[#allocation37_spill] sm:$0xff] %v8107_v16 }
 0x110   :  { %v4456_v45 = vpop.f32.mrb[15].mxu0  ;;  %v303_v8 = vmul.f32 %v4452_v43, %v4452_v43  ;;  %v4512_v36 = vadd.s32 64, %v4416_v13  ;;  %vm4718_vm4 = vmand %vm540_vm8, %vm556_vm9  ;;  %v8121_v26 = vmov 0  ;;  %vm8123_vm9 = vcmp.ge.s32.totalorder %v4491_v25, 0 }
 0x111   :  { %v315_v49 = vadd.f32 %v314_v42, %v300_v41  ;;  %v279_v54 = vadd.f32 %v278_v40, %v4456_v45  ;;  %v301_v55 = vmul.f32 %v4456_v45, %v4456_v45  ;;  %v445_v41 = vand.u32 7, %v429_v58  ;;  %vm4734_vm8 = vmand %vm4651_vm14, %vm8120_vm7 }
 0x112   :  { %v4515_v42 = vadd.s32 72, %v4416_v13  ;;  %v4528_v58 = vadd.s32 4294967295, %v4508_v34  ;;  %v465_v7 = vshra.s32 %v4512_v36, 3  ;;  %v8112_v62 = vand.u32 7, %v4512_v36  ;;  %vm4742_vm6 = vmand %vm4700_vm3, %vm8123_vm9 }
 0x113   :  { %v280_v61 = vadd.f32 %v4444_v37, %v279_v54  ;;  %v316_v63 = vadd.f32 %v315_v49, %v301_v55  ;;  %v446_v49 = vand.u32 7, %v430_v59  ;;  %v464_v54 = vshra.s32 %v4500_v28, 3  ;;  %vm8129_vm7 = vmmov %vm8123_vm9 }
 0x114   :  { %v4542_v15 = vadd.s32 1, %v445_v41  ;;  %v8122_v26 = vsel %vm4734_vm8, 4294967295, %v8121_v26  ;;  %vm4758_vm13 = vmand %vm4687_vm2, %vm8129_vm7  ;;  %vm8132_vm9 = vcmp.lt.s32.totalorder %v4475_v3, 8  ;;  %vm8133_vm0 = vcmp.ge.s32.totalorder %v4475_v3, 0 }
 0x115   :  { %v281_v9 = vadd.f32 %v4452_v43, %v280_v61  ;;  %v317_v10 = vadd.f32 %v316_v63, %v302_v60  ;;  %v7678_v60 = vand.u32 7, %v4500_v28  ;;  %v4525_v61 = vadd.s32 4294967295, %v4506_v33  ;;  %vm4766_vm11 = vmand %vm8133_vm0, %vm8132_vm9 }
 0x116   :  { %v4530_v63 = vand.u32 7, %v463_v35  ;;  %v4538_v11 = vadd.s32 4294967295, %v446_v49  ;;  %v4540_v14 = vand.u32 7, %v464_v54  ;;  %8086 = vst [vmem:[#allocation25_spill] sm:$0xff] %v4542_v15  ;;  %vm8139_vm7 = vcmp.ge.s32.totalorder %v4497_v27, 0 }
 0x117   :  { %v282_v19 = vrot.slane %v281_v9, 4  ;;  %v318_v20 = vadd.f32 %v317_v10, %v303_v8  ;;  %v466_v10 = vshra.s32 %v4515_v42, 3  ;;  %v4554_v35 = vadd.s32 4294967295, %v7678_v60  ;;  %vm4782_vm0 = vmand %vm8139_vm7, %vm557_vm15 }
 0x118   :  { %8085 = vst [vmem:[#allocation24_spill] sm:$0xff] %v4538_v11  ;;  %vm8143_vm10 = vcmp.lt.s32.totalorder %v4482_v12, 8  ;;  %v8144_v27 = vmov 0  ;;  %vm8146_vm15 = vcmp.lt.s32.totalorder %v4487_v21, 8  ;;  %vm8149_vm9 = vcmp.lt.s32.totalorder %v4477_v6, 8 }
 0x119   :  { %v283_v29 = vadd.f32 %v282_v19, %v281_v9  ;;  %v319_v30 = vrot.slane %v318_v20, 4  ;;  %v4533_v9 = vadd.s32 4294967295, %v445_v41  ;;  %v4544_v19 = vadd.s32 1, %v446_v49  ;;  %8089 = vst [vmem:[#allocation28_spill] sm:$0xff] %v4554_v35  ;;  %vm4803_vm7 = vmand %vm4700_vm3, %vm8146_vm15 }
 0x11a   :  { %vm8150_vm5 = vcmp.ge.s32.totalorder %v4477_v6, 0  ;;  %v8156_v21 = vmov 0  ;;  %vm8189_vm2 = vcmp.ge.s32.totalorder %v4525_v61, 0 }
 0x11b   :  { %v284_v38 = vrot.slane %v283_v29, 2  ;;  %v320_v40 = vadd.f32 %v319_v30, %v318_v20  ;;  %8084 = vst [vmem:[#allocation23_spill] sm:$0xff] %v4533_v9  ;;  %8087 = vst [vmem:[#allocation26_spill] sm:$0xff] %v4544_v19  ;;  %v4550_v30 = vadd.s32 4294967295, %v7679_v57 }
 0x11c   :  { %vm4811_vm12 = vmand %vm8150_vm5, %vm8149_vm9 }
 0x11d   :  { %v285_v55 = vadd.f32 %v284_v38, %v283_v29  ;;  %v321_v56 = vrot.slane %v320_v40, 2  ;;  %8088 = vst [vmem:[#allocation27_spill] sm:$0xff] %v4550_v30  ;;  %v4559_v38 = vadd.s32 4294967295, %v4530_v63 }
 0x11f   :  { %v286_v8 = vrot.slane %v285_v55, 1  ;;  %v322_v59 = vadd.f32 %v321_v56, %v320_v40  ;;  %v4561_v40 = vand.u32 7, %v465_v7  ;;  %v4569_v56 = vand.u32 7, %v466_v10 }
 0x120   :  { %v4577_v7 = vadd.s32 88, %v4416_v13 }
 0x121   :  { %v287_v20 = vadd.f32 %v286_v8, %v285_v55  ;;  %v323_v29 = vrot.slane %v322_v59, 1  ;;  %8090 = vst [vmem:[#allocation29_spill] sm:$0xff] %v4569_v56  ;;  %v4572_v8 = vadd.s32 80, %v4416_v13  ;;  %v4692_v23 = vadd.s32 4294967295, %v4569_v56 }
 0x123   :  { %v324_v54 = vadd.f32 %v323_v29, %v322_v59  ;;  %v4565_v55 = vmul.f32 0.0078125, %v287_v20  ;;  %v4580_v59 = vadd.s32 96, %v4416_v13  ;;  %v4583_v20 = vadd.s32 104, %v4416_v13  ;;  %8109 = vst [vmem:[#allocation38_spill] sm:$0xff] %v4692_v23 }
 0x124   :  { %v4586_v29 = vadd.s32 112, %v4416_v13 }
 0x125   :  { %v326_v10 = vmul.f32 0.0078125, %v324_v54  ;;  %v327_v49 = vmul.f32 %v4565_v55, %v4565_v55  ;;  %v8094_v54 = vand.u32 7, %v4500_v28  ;;  %v467_v28 = vshra.s32 %v4572_v8, 3 }
 0x126   :  { %8091 = vst [vmem:[#allocation30_spill] sm:$0xff] %v4586_v29  ;;  %v469_v39 = vshra.s32 %v4580_v59, 3  ;;  %v470_v22 = vshra.s32 %v4583_v20, 3  ;;  %v471_v18 = vshra.s32 %v4586_v29, 3  ;;  %v453_v16 = vand.u32 7, %v4580_v59 }
 0x127   :  { %v328_v35 = vsub.f32 %v326_v10, %v327_v49  ;;  %v4634_v49 = vadd.s32 4294967295, %v4540_v14  ;;  %v8092_v10 = vand.u32 7, %v4485_v17  ;;  %v4642_v57 = vadd.s32 1, %v8094_v54 }
 0x128   :  { %v8099_v17 = vand.u32 7, %v4512_v36  ;;  %v468_v54 = vshra.s32 %v4577_v7, 3  ;;  %v4774_v1 = vand.u32 7, %v470_v22  ;;  %v8147_v59 = vmov 0 }
 0x129   :  { %v329_v30 = vmax.f32 %v328_v35, 0.0  ;;  %v4638_v4 = vadd.s32 1, %v8092_v10  ;;  %8095 = vst [vmem:[#allocation32_spill] sm:$0xff] %v4642_v57  ;;  %v4645_v35 = vadd.s32 120, %v4416_v13  ;;  %v8148_v59 = vsel %vm4803_vm7, 4294967295, %v8147_v59 }
 0x12a   :  { %v4658_v10 = vadd.s32 4294967295, %v8099_v17  ;;  %v8104_v17 = vand.u32 7, %v4515_v42  ;;  %v4726_v36 = vand.u32 7, %v468_v54  ;;  %v4772_v54 = vand.u32 7, %v469_v39  ;;  %8138 = vst [vmem:[#allocation45_spill] sm:$0xff] %v4774_v1 }
 0x12b   :  { %8093 = vst [vmem:[#allocation31_spill] sm:$0xff] %v4638_v4  ;;  %8096 = vst [vmem:[#allocation33_spill] sm:$0xff] %v4645_v35  ;;  %v346_v41 = vadd.f32 1e-05, %v329_v30  ;;  %v4675_v30 = vadd.s32 4294967295, %v4561_v40  ;;  %v472_v4 = vshra.s32 %v4645_v35, 3  ;;  %vm8244_vm8 = vnez %v8148_v59 }
 0x12c   :  { %8100 = vst [vmem:[#allocation34_spill] sm:$0xff] %v4658_v10  ;;  %v4679_v60 = vadd.s32 4294967295, %v8104_v17  ;;  %v1323_v17 = vadd.s32 1, %v4454_v44  ;;  %v8114_v10 = vand.u32 7, %v4515_v42  ;;  %v1324_v44 = vadd.s32 1, %v4458_v46  ;;  %8119 = vst [vmem:[#allocation42_spill] sm:$0xff] %v4726_v36 }
 0x12d   :  { %4136 = vrsqrt.f32 %v346_v41  ;;  %v451_v42 = vand.u32 7, %v4572_v8  ;;  %v452_v46 = vand.u32 7, %v4577_v7  ;;  %v8127_v8 = vmov 0  ;;  %8137 = vst [vmem:[#allocation44_spill] sm:$0xff] %v4772_v54 }
 0x12e   :  { %8105 = vst [vmem:[#allocation36_spill] sm:$0xff] %v4679_v60  ;;  %v4706_v60 = vadd.s32 1, %v8112_v62  ;;  %v4710_v57 = vadd.s32 1, %v8114_v10  ;;  %v4724_v62 = vand.u32 7, %v467_v28  ;;  %v8124_v10 = vmov 0 }
 0x12f   :  { %v8125_v10 = vsel %vm4742_vm6, 4294967295, %v8124_v10  ;;  %v8128_v8 = vsel %vm4750_vm1, 4294967295, %v8127_v8  ;;  %v8130_v7 = vmov 0  ;;  %v8134_v28 = vmov 0 }
 0x130   :  { %8113 = vst [vmem:[#allocation39_spill] sm:$0xff] %v4706_v60  ;;  %8115 = vst [vmem:[#allocation40_spill] sm:$0xff] %v4710_v57  ;;  %v8131_v7 = vsel %vm4758_vm13, 4294967295, %v8130_v7  ;;  %v8135_v28 = vsel %vm4766_vm11, 4294967295, %v8134_v28  ;;  %v454_v57 = vand.u32 7, %v4583_v20  ;;  %v4788_v39 = vand.u32 7, %v471_v18 }
 0x131   :  { %8118 = vst [vmem:[#allocation41_spill] sm:$0xff] %v4724_v62  ;;  %8136 = vst [vmem:[#allocation43_spill] sm:$0xff] %v8135_v28  ;;  %v8151_v18 = vmov 0  ;;  %v4815_v20 = vand.u32 7, %v472_v4  ;;  %v4828_v6 = vadd.s32 4294967295, %v4724_v62  ;;  %v4831_v4 = vadd.s32 4294967295, %v4726_v36 }
 0x132   :  { %8142 = vst [vmem:[#allocation46_spill] sm:$0xff] %v4788_v39  ;;  %vm4795_vm13 = vmand %vm4651_vm14, %vm8143_vm10  ;;  %v8152_v18 = vsel %vm4811_vm12, 4294967295, %v8151_v18  ;;  %v4833_v12 = vadd.s32 4294967295, %v451_v42  ;;  %v4835_v22 = vadd.s32 4294967295, %v452_v46  ;;  %v4838_v60 = vadd.s32 1, %v451_v42 }
 0x133   :  { %v8145_v27 = vsel %vm4795_vm13, 4294967295, %v8144_v27  ;;  %8153 = vst [vmem:[#allocation47_spill] sm:$0xff] %v8152_v18  ;;  %8154 = vst [vmem:[#allocation48_spill] sm:$0xff] %v4815_v20  ;;  %vm8155_vm13 = vcmp.ge.s32.totalorder %v4502_v31, 0  ;;  %v4840_v28 = vadd.s32 1, %v452_v46  ;;  %v4842_v23 = vadd.s32 4294967295, %v453_v16 }
 0x134   :  { %vm4822_vm15 = vmand %vm4766_vm11, %vm8155_vm13  ;;  %8159 = vst [vmem:[#allocation50_spill] sm:$0xff] %v4833_v12  ;;  %vm8165_vm13 = vcmp.lt.s32.totalorder %v1323_v17, 8  ;;  %vm8166_vm9 = vcmp.ge.s32.totalorder %v1323_v17, 0  ;;  %v8167_v62 = vmov 0  ;;  %v4858_v42 = vadd.s32 4294967295, %v4774_v1  ;;  %v8279_v1 = vld [vmem:[#allocation32_spill] sm:$0xff] }
 0x135   :  { %v8157_v21 = vsel %vm4822_vm15, 4294967295, %v8156_v21  ;;  %8160 = vst [vmem:[#allocation51_spill] sm:$0xff] %v4835_v22  ;;  %8161 = vst [vmem:[#allocation52_spill] sm:$0xff] %v4838_v60  ;;  %v4855_v22 = vadd.s32 4294967295, %v4772_v54  ;;  %v4860_v46 = vadd.s32 1, %v453_v16  ;;  %vm8174_vm5 = vcmp.lt.s32.totalorder %v1324_v44, 8 }
 0x136   :  { %8158 = vst [vmem:[#allocation49_spill] sm:$0xff] %v8157_v21  ;;  %8162 = vst [vmem:[#allocation53_spill] sm:$0xff] %v4840_v28  ;;  %v4844_v21 = vadd.s32 4294967295, %v454_v57  ;;  %vm8175_vm11 = vcmp.ge.s32.totalorder %v1324_v44, 0  ;;  %v8176_v17 = vmov 0  ;;  %v4881_v16 = vadd.s32 4294967295, %v4788_v39 }
 0x137   :  { %8163 = vst [vmem:[#allocation54_spill] sm:$0xff] %v4842_v23  ;;  %vm4848_vm7 = vmand %vm8166_vm9, %vm8165_vm13  ;;  %v4862_v23 = vadd.s32 1, %v454_v57  ;;  %vm8179_vm9 = vcmp.ge.s32.totalorder %v4504_v32, 0  ;;  %v4884_v57 = vadd.s32 4294967295, %v4815_v20  ;;  %v8184_v44 = vand.u32 7, %v4586_v29  ;;  %v4894_v28 = vpop.eup %4136  ;;  %v8288_v41 = vld [vmem:[#allocation34_spill] sm:$0xff] }
 0x138   :  { %8164 = vst [vmem:[#allocation55_spill] sm:$0xff] %v4844_v21  ;;  %v8168_v62 = vsel %vm4848_vm7, 4294967295, %v8167_v62  ;;  %8170 = vst [vmem:[#allocation57_spill] sm:$0xff] %v4855_v22  ;;  %v8180_v21 = vmov 0  ;;  %v8186_v18 = vand.u32 7, %v4645_v35  ;;  %v4924_v35 = vadd.s32 1, %v4530_v63 }
 0x139   :  { %8169 = vst [vmem:[#allocation56_spill] sm:$0xff] %v8168_v62  ;;  %8171 = vst [vmem:[#allocation58_spill] sm:$0xff] %v4858_v42  ;;  %v4899_v60 = vld [vmem:[%s7671_s5] ss:$0 sm:$0xff]  ;;  %v4927_v29 = vadd.s32 1, %v4540_v14  ;;  %v8200_v20 = vsub.f32 %v4381_v51, %v4565_v55  ;;  %v8204_v51 = vmov 0 }
 0x13a   :  { %8172 = vst [vmem:[#allocation59_spill] sm:$0xff] %v4860_v46  ;;  %8173 = vst [vmem:[#allocation60_spill] sm:$0xff] %v4862_v23  ;;  %v4888_v23 = vadd.s32 4294967295, %v8184_v44  ;;  %v4892_v46 = vadd.s32 4294967295, %v8186_v18  ;;  %v8190_v18 = vmov 0  ;;  %v8353_v59 = vmov 0 }
 0x13b   :  { %vm4866_vm13 = vmand %vm8175_vm11, %vm8174_vm5  ;;  %8182 = vst [vmem:[#allocation62_spill] sm:$0xff] %v4881_v16  ;;  %v8201_v16 = vsub.f32 %v4452_v43, %v4565_v55  ;;  %v8208_v43 = vmov 0  ;;  %vm8215_vm5 = vcmp.ge.s32.totalorder %v4489_v24, 0  ;;  %v8220_v24 = vmov 0 }
 0x13c   :  { %v8177_v17 = vsel %vm4866_vm13, 4294967295, %v8176_v17  ;;  %vm4874_vm10 = vmand %vm4811_vm12, %vm8179_vm9  ;;  %8183 = vst [vmem:[#allocation63_spill] sm:$0xff] %v4884_v57  ;;  %vm8188_vm9 = vcmp.lt.s32.totalorder %v4525_v61, 8  ;;  %vm8193_vm12 = vcmp.lt.s32.totalorder %v4528_v58, 8  ;;  %v4930_v61 = vadd.s32 1, %v4561_v40 }
 0x13d   :  { %8178 = vst [vmem:[#allocation61_spill] sm:$0xff] %v8177_v17  ;;  %v8181_v21 = vsel %vm4874_vm10, 4294967295, %v8180_v21  ;;  %8185 = vst [vmem:[#allocation64_spill] sm:$0xff] %v4888_v23  ;;  %vm8194_vm10 = vcmp.ge.s32.totalorder %v4528_v58, 0  ;;  %v8199_v58 = vsub.f32 %v4456_v45, %v4565_v55  ;;  %v348_v57 = vmul.f32 %v4894_v28, %v8200_v20 }
 0x13e   :  { %8187 = vst [vmem:[#allocation65_spill] sm:$0xff] %v4892_v46  ;;  %vm4910_vm15 = vmand %vm8189_vm2, %vm8188_vm9  ;;  %v4933_v46 = vadd.s32 1, %v4569_v56  ;;  %v363_v39 = vmul.f32 %v4894_v28, %v8201_v16  ;;  %vm8203_vm2 = vcmp.ge.s32.totalorder %v4502_v31, 0  ;;  %vm8207_vm9 = vcmp.ge.s32.totalorder %v4504_v32, 0 }
 0x13f   :  { %v8191_v18 = vsel %vm4910_vm15, 4294967295, %v8190_v18  ;;  %vm4918_vm1 = vmand %vm8194_vm10, %vm8193_vm12  ;;  %8197 = vst [vmem:[#allocation67_spill] sm:$0xff] %v4930_v61  ;;  %v361_v23 = vmul.f32 %v4894_v28, %v8199_v58  ;;  %v8202_v61 = vsub.f32 %v4444_v37, %v4565_v55  ;;  %v4977_v37 = vld [vmem:[%s7672_s6] ss:$0 sm:$0xff]  ;;  %v8211_v45 = vsub.f32 %v4385_v53, %v4565_v55 }
 0x140   :  { %8192 = vst [vmem:[#allocation66_spill] sm:$0xff] %v8191_v18  ;;  %8198 = vst [vmem:[#allocation68_spill] sm:$0xff] %v4933_v46  ;;  %v8212_v16 = vsub.f32 %v4379_v50, %v4565_v55  ;;  %v8213_v58 = vsub.f32 %v4383_v52, %v4565_v55  ;;  %v8214_v31 = vsub.f32 %v4401_v0, %v4565_v55  ;;  %v8216_v50 = vmov 0 }
 0x141   :  { %v362_v46 = vmul.f32 %v4894_v28, %v8202_v61  ;;  %vm4956_vm10 = vmand %vm4718_vm4, %vm8203_vm2  ;;  %v349_v20 = vmul.f32 %v4894_v28, %v8211_v45  ;;  %v383_v52 = vmul.f32 %v4899_v60, %v361_v23  ;;  %v370_v53 = vmul.f32 %v4899_v60, %v348_v57 }
 0x142   :  { %v8205_v51 = vsel %vm4956_vm10, 4294967295, %v8204_v51  ;;  %vm4964_vm11 = vmand %vm4782_vm0, %vm8207_vm9  ;;  %v350_v61 = vmul.f32 %v4894_v28, %v8212_v16  ;;  %v351_v32 = vmul.f32 %v4894_v28, %v8213_v58  ;;  %v352_v42 = vmul.f32 %v4894_v28, %v8214_v31 }
 0x143   :  { %8206 = vst [vmem:[#allocation69_spill] sm:$0xff] %v8205_v51  ;;  %v8209_v43 = vsel %vm4964_vm11, 4294967295, %v8208_v43  ;;  %vm5001_vm12 = vmand %vm4848_vm7, %vm8215_vm5  ;;  %v385_v0 = vmul.f32 %v4899_v60, %v363_v39  ;;  %v384_v31 = vmul.f32 %v4899_v60, %v362_v46  ;;  %vm8219_vm9 = vcmp.lt.s32.totalorder %v4517_v47, 8 }
 0x144   :  { %8210 = vst [vmem:[#allocation70_spill] sm:$0xff] %v8209_v43  ;;  %v8217_v50 = vsel %vm5001_vm12, 4294967295, %v8216_v50  ;;  %vm5013_vm2 = vmand %vm4718_vm4, %vm8219_vm9  ;;  %vm8222_vm5 = vcmp.lt.s32.totalorder %v4519_v48, 8  ;;  %v8223_v23 = vmov 0  ;;  %vm8225_vm10 = vcmp.ge.s32.totalorder %v4491_v25, 0 }
 0x145   :  { %8218 = vst [vmem:[#allocation71_spill] sm:$0xff] %v8217_v50  ;;  %v8221_v24 = vsel %vm5013_vm2, 4294967295, %v8220_v24  ;;  %vm5021_vm7 = vmand %vm4782_vm0, %vm8222_vm5  ;;  %v8226_v39 = vmov 0  ;;  %v371_v46 = vmul.f32 %v4899_v60, %v349_v20  ;;  %v372_v25 = vmul.f32 %v4899_v60, %v350_v61  ;;  %v8236_v20 = vld [vmem:[#allocation27_spill] sm:$0xff] }
 0x146   :  { %v8224_v23 = vsel %vm5021_vm7, 4294967295, %v8223_v23  ;;  %vm5030_vm14 = vmand %vm4866_vm13, %vm8225_vm10  ;;  %v373_v57 = vmul.f32 %v4899_v60, %v351_v32  ;;  %v374_v45 = vmul.f32 %v4899_v60, %v352_v42  ;;  %vm8231_vm10 = vcmp.lt.s32.totalorder %v4506_v33, 8 }
 0x147   :  { %v8227_v39 = vsel %vm5030_vm14, 4294967295, %v8226_v39  ;;  %vm8232_vm13 = vcmp.ge.s32.totalorder %v4506_v33, 0  ;;  %v8233_v16 = vmov 0  ;;  %v405_v58 = vadd.f32 %v4977_v37, %v383_v52  ;;  %v8242_v52 = vld [vmem:[#allocation28_spill] sm:$0xff] }
 0x148   :  { %8228 = vst [vmem:[#allocation72_spill] sm:$0xff] %v8227_v39  ;;  %vm5050_vm2 = vmand %vm8232_vm13, %vm8231_vm10  ;;  %v392_v62 = vadd.f32 %v4977_v37, %v370_v53  ;;  %v407_v61 = vadd.f32 %v4977_v37, %v385_v0  ;;  %v406_v32 = vadd.f32 %v4977_v37, %v384_v31  ;;  %vm8237_vm13 = vcmp.lt.s32.totalorder %v4508_v34, 8 }
 0x149   :  { %v8234_v16 = vsel %vm5050_vm2, 4294967295, %v8233_v16  ;;  %vm8238_vm10 = vcmp.ge.s32.totalorder %v4508_v34, 0  ;;  %v8239_v42 = vmov 0  ;;  %v393_v53 = vadd.f32 %v4977_v37, %v371_v46 }
 0x14a   :  { %8235 = vst [vmem:[#allocation73_spill] sm:$0xff] %v8234_v16  ;;  %vm5067_vm5 = vmand %vm8238_vm10, %vm8237_vm13  ;;  %v394_v0 = vadd.f32 %v4977_v37, %v372_v25  ;;  %v395_v31 = vadd.f32 %v4977_v37, %v373_v57  ;;  %v396_v17 = vadd.f32 %v4977_v37, %v374_v45  ;;  %v5086_v34 = vmax.f32 %v405_v58, 0.0  ;;  %v8248_v57 = vld [vmem:[#allocation49_spill] sm:$0xff]  ;;  %v8254_v58 = vld [vmem:[#allocation38_spill] sm:$0xff] }
 0x14b   :  { %v8240_v42 = vsel %vm5067_vm5, 4294967295, %v8239_v42  ;;  %v5088_v33 = vmax.f32 %v392_v62, 0.0  ;;  %v5090_v46 = vmax.f32 %v407_v61, 0.0  ;;  %v5092_v25 = vmax.f32 %v406_v32, 0.0  ;;  %v8262_v16 = vld [vmem:[#allocation31_spill] sm:$0xff] }
 0x14c   :  { %8241 = vst [vmem:[#allocation74_spill] sm:$0xff] %v8240_v42  ;;  %vm8251_vm10 = vcmp.ge.s32.totalorder %v4533_v9, 0  ;;  %v8252_v45 = vmov 0  ;;  %v5108_v62 = vmax.f32 %v393_v53, 0.0  ;;  %v5110_v61 = vmax.f32 %v394_v0, 0.0 }
 0x14d   :  { %8245 = vst [vmem:[#allocation75_spill] sm:$0xff] %v5088_v33  ;;  %8246 = vst [vmem:[#allocation76_spill] sm:$0xff] %v5090_v46  ;;  %v5112_v32 = vmax.f32 %v395_v31, 0.0  ;;  %v5114_v50 = vmax.f32 %v396_v17, 0.0  ;;  %vm8259_vm13 = vcmp.ge.s32.totalorder %v4538_v11, 0  ;;  %v8260_v39 = vmov 0 }
 0x14e   :  { %8247 = vst [vmem:[#allocation77_spill] sm:$0xff] %v5092_v25  ;;  %vm5102_vm7 = vmand %vm5050_vm2, %vm8251_vm10  ;;  %v842_v53 = vrot.slane %v5088_v33, 1  ;;  %v5131_v17 = vpack.c.bf16 %v5088_v33, %v5090_v46  ;;  %v489_v31 = vrot.slane %v5088_v33, 7  ;;  %v8265_v42 = vmov 0 }
 0x14f   :  { %v8253_v45 = vsel %vm5102_vm7, 4294967295, %v8252_v45  ;;  %8255 = vst [vmem:[#allocation49_spill] sm:$0xff] %v5108_v62  ;;  %8256 = vst [vmem:[#allocation38_spill] sm:$0xff] %v5110_v61  ;;  %vm8267_vm12 = vcmp.ge.s32.totalorder %v4538_v11, 0  ;;  %v8268_v0 = vmov 0  ;;  %vm8270_vm9 = vcmp.lt.s32.totalorder %v4559_v38, 8 }
 0x150   :  { %8257 = vst [vmem:[#allocation78_spill] sm:$0xff] %v5112_v32  ;;  %8258 = vst [vmem:[#allocation79_spill] sm:$0xff] %v5114_v50  ;;  %vm8271_vm2 = vcmp.ge.s32.totalorder %v4559_v38, 0  ;;  %v504_v48 = vrot.slane %v5090_v46, 7  ;;  %v490_v47 = vrot.slane %v5108_v62, 7  ;;  %v5165_v33 = vpack.c.bf16 %v5110_v61, %v5108_v62 }
 0x151   :  { %vm5120_vm10 = vmand %vm5067_vm5, %vm8259_vm13  ;;  %8263 = vst [vmem:[#allocation80_spill] sm:$0xff] %v5131_v17  ;;  %vm8264_vm13 = vcmp.ge.s32.totalorder %v4533_v9, 0  ;;  %v8272_v9 = vmov 0  ;;  %v8277_v38 = vmov 0  ;;  %v843_v11 = vrot.slane %v5108_v62, 1  ;;  %v4081_v62 = vld [vmem:[%s7668_s2 + $0x100] sm:$0xff]  }
 0x152   :  { %v8261_v39 = vsel %vm5120_vm10, 4294967295, %v8260_v39  ;;  %vm5138_vm5 = vmand %vm4910_vm15, %vm8264_vm13  ;;  %8274 = vst [vmem:[#allocation81_spill] sm:$0xff] %v5165_v33  ;;  %v8282_v54 = vrot.slane %v5090_v46, 1  ;;  %vm8283_vm11 = vcmp.lt.s32.totalorder %v4416_v13, 7  ;;  %v491_v22 = vrot.slane %v5110_v61, 7 }
 0x153   :  { %v8266_v42 = vsel %vm5138_vm5, 4294967295, %v8265_v42  ;;  %vm5146_vm14 = vmand %vm4918_vm1, %vm8267_vm12  ;;  %vm8275_vm12 = vcmp.lt.s32.totalorder %v4634_v49, 8  ;;  %vm8280_vm5 = vnez %v8098_v5  ;;  %v492_v56 = vrot.slane %v5112_v32, 7 }
 0x154   :  { %v8269_v0 = vsel %vm5146_vm14, 4294967295, %v8268_v0  ;;  %vm5154_vm6 = vmand %vm8271_vm2, %vm8270_vm9  ;;  %vm8276_vm2 = vcmp.ge.s32.totalorder %v4634_v49, 0  ;;  %v5187_v49 = vsel %vm8283_vm11, %v8282_v54, %v842_v53  ;;  %v8286_v5 = vmov 0 }
 0x155   :  { %v8273_v9 = vsel %vm5154_vm6, 4294967295, %v8272_v9  ;;  %vm5171_vm9 = vmand %vm8276_vm2, %vm8275_vm12  ;;  %8284 = vst [vmem:[#allocation82_spill] sm:$0xff] %v5187_v49  ;;  %vm8285_vm12 = vcmp.lt.s32.totalorder %v4542_v15, 8  ;;  %vm8304_vm13 = vcmp.lt.s32.totalorder %v4416_v13, 7  ;;  %vm8324_vm10 = vnez %v8128_v8 }
 0x156   :  { %v8278_v38 = vsel %vm5171_vm9, 4294967295, %v8277_v38  ;;  %vm8281_vm14 = vmpackc.low %vm4700_vm3, %vm8280_vm5  ;;  %vm8290_vm3 = vcmp.lt.s32.totalorder %v4416_v13, 1  ;;  %v5235_v43 = vsel %vm8304_vm13, %v842_v53, %v843_v11  ;;  %v4087_v53 = vld [vmem:[%s7668_s2 + $0x180] sm:$0xff]   ;;  %vm8317_vm9 = vcmp.lt.s32.totalorder %v4544_v19, 8  ;;  %v8327_v19 = vld [vmem:[#allocation7_spill] sm:$0xff] }
 0x157   :  { %3379 = vmatprep.mubr.msk.bf16.mxu1 %vm8281_vm14, %v5131_v17  ;;  %vm5195_vm2 = vmand %vm4910_vm15, %vm8285_vm12  ;;  %v8289_v17 = vrot.slane %v5092_v25, 7  ;;  %v5219_v25 = vpack.c.bf16 %v5114_v50, %v5112_v32  ;;  %8305 = vst [vmem:[#allocation87_spill] sm:$0xff] %v5235_v43  ;;  %vm8320_vm15 = vnez %v8125_v10  ;;  %vm8321_vm13 = vnez %v8122_v26  ;;  %v8343_v10 = vld [vmem:[#allocation40_spill] sm:$0xff] }
 0x158   :  { %v8287_v5 = vsel %vm5195_vm2, 4294967295, %v8286_v5  ;;  %vm8292_vm11 = vmmov %vm8290_vm3  ;;  %v8330_v26 = vmov 0  ;;  %v8433_v44 = vmov 0 }
 0x159   :  { %v5204_v54 = vsel %vm8290_vm3, %v8289_v17, %v504_v48  ;;  %v521_v46 = vsel %vm8292_vm11, %v504_v48, %v489_v31  ;;  %vm8293_vm5 = vmmov %vm8290_vm3  ;;  %8296 = vst [vmem:[#allocation84_spill] sm:$0xff] %v5219_v25  ;;  %vm8297_vm3 = vcmp.lt.s32.totalorder %v4530_v63, 8  ;;  %vm8298_vm11 = vcmp.ge.s32.totalorder %v4530_v63, 0  ;;  %v4082_v63 = vld [vmem:[%s7668_s2 + $0x148] sm:$0xff]  }
 0x15a   :  { %8291 = vst [vmem:[#allocation83_spill] sm:$0xff] %v5204_v54  ;;  %v520_v15 = vsel %vm8293_vm5, %v489_v31, %v490_v47  ;;  %vm5225_vm2 = vmand %vm8298_vm11, %vm8297_vm3  ;;  %v8299_v48 = vmov 0  ;;  %v5231_v31 = vpack.c.bf16 %v521_v46, %v5204_v54  ;;  %vm8307_vm11 = vcmp.lt.s32.totalorder %v4540_v14, 8 }
 0x15b   :  { %v8300_v48 = vsel %vm5225_vm2, 4294967295, %v8299_v48  ;;  %v3426_v51 = vpack.c.bf16 %v520_v15, %v521_v46  ;;  %vm8306_vm12 = vmmov %vm8293_vm5  ;;  %vm8308_vm5 = vcmp.ge.s32.totalorder %v4540_v14, 0  ;;  %v8309_v46 = vmov 0 }
 0x15c   :  { %8301 = vst [vmem:[#allocation85_spill] sm:$0xff] %v8300_v48  ;;  %8303 = vst [vmem:[#allocation86_spill] sm:$0xff] %v5231_v31  ;;  %v518_v25 = vsel %vm8306_vm12, %v491_v22, %v492_v56  ;;  %v5260_v54 = vpack.c.bf16 %v5235_v43, %v5187_v49  ;;  %v844_v14 = vrot.slane %v5110_v61, 1  ;;  %v845_v17 = vrot.slane %v5112_v32, 1 }
 0x15d   :  { %vm5250_vm14 = vmand %vm8308_vm5, %vm8307_vm11  ;;  %vm8323_vm11 = vnez %v8131_v7  ;;  %v8328_v32 = vsub.f32 %v8327_v19, %v4565_v55  ;;  %v4083_v19 = vld [vmem:[%s7668_s2 + $0x108] sm:$0xff]   ;;  %v8549_v49 = vmov 0 }
 0x15e   :  { %v8310_v46 = vsel %vm5250_vm14, 4294967295, %v8309_v46  ;;  %8313 = vst [vmem:[#allocation89_spill] sm:$0xff] %v5260_v54  ;;  %vm8314_vm3 = vmmov %vm8306_vm12  ;;  %vm8360_vm12 = vcmp.ge.s32.totalorder %v4675_v30, 0 }
 0x15f   :  { %8311 = vst [vmem:[#allocation88_spill] sm:$0xff] %v8310_v46  ;;  %v519_v18 = vsel %vm8314_vm3, %v490_v47, %v491_v22  ;;  %vm5277_vm6 = vmand %vm4918_vm1, %vm8317_vm9  ;;  %v353_v61 = vmul.f32 %v4894_v28, %v8328_v32  ;;  %vm8329_vm9 = vcmp.ge.s32.totalorder %v8236_v20, 0  ;;  %v8342_v32 = vld [vmem:[#allocation39_spill] sm:$0xff] }
 0x160   :  { %vm8322_vm5 = vmpackc.low %vm8320_vm15, %vm8321_vm13  ;;  %v3432_v47 = vpack.c.bf16 %v518_v25, %v519_v18  ;;  %v5294_v22 = vpack.c.bf16 %v519_v18, %v520_v15  ;;  %v4089_v15 = vld [vmem:[%s7668_s2 + $0x1c8] sm:$0xff]   ;;  %v8337_v18 = vld [vmem:[#allocation5_spill] sm:$0xff] }
 0x161   :  { %3382 = vmatmul.mubr.msk.bf16.vlgmr.msra.gmra.mrb[0].mxu1 %vm8322_vm5, %v5231_v31  ;;  %vm8325_vm7 = vmpackc.low %vm8323_vm11, %vm8324_vm10  ;;  %vm8333_vm5 = vcmp.lt.s32.totalorder %v4416_v13, 7  ;;  %vm8356_vm10 = vnez %v8278_v38 }
 0x162   :  { %3427 = vmatprep.mubr.msk.bf16.mxu0 %vm8325_vm7, %v3426_v51  ;;  %8326 = vst [vmem:[#allocation90_spill] sm:$0xff] %v5294_v22  ;;  %vm5305_vm15 = vmand %vm5225_vm2, %vm8329_vm9  ;;  %3758 = vmatpush3.bf16.msra.mxu1 %v4081_v62  ;;  %v5325_v8 = vsel %vm8333_vm5, %v844_v14, %v845_v17  ;;  %v8338_v51 = vsub.f32 %v8337_v18, %v4565_v55  ;;  %v8340_v62 = vmov 0  ;;  %v8347_v18 = vrot.slane %v5114_v50, 7 }
 0x163   :  { %v8331_v26 = vsel %vm5305_vm15, 4294967295, %v8330_v26  ;;  %vm8332_vm13 = vmpackc.low %vm4782_vm0, %vm4718_vm4  ;;  %8334 = vst [vmem:[#allocation7_spill] sm:$0xff] %v5325_v8  ;;  %vm8339_vm4 = vcmp.ge.s32.totalorder %v8242_v52, 0  ;;  %3759 = vmatprep.subr.bf16.mxu1 %v4082_v63  ;;  %vm8359_vm7 = vcmp.lt.s32.totalorder %v4675_v30, 8  ;;  %v8363_v63 = vld [vmem:[#allocation51_spill] sm:$0xff]  ;;  %vm8463_vm15 = vcmp.lt.s32.totalorder %v4726_v36, 8 }
 0x164   :  { %3385 = vmatprep.mubr.msk.bf16.mxu1 %vm8332_vm13, %v5165_v33  ;;  %vm8335_vm11 = vmmov %vm8333_vm5  ;;  %v354_v3 = vmul.f32 %v4894_v28, %v8338_v51  ;;  %vm8344_vm5 = vnez %v8145_v27  ;;  %v4084_v27 = vld [vmem:[%s7668_s2 + $0x150] sm:$0xff]  }
 0x165   :  { %v5329_v7 = vsel %vm8335_vm11, %v843_v11, %v844_v14  ;;  %vm5340_vm0 = vmand %vm5250_vm14, %vm8339_vm4  ;;  %v375_v14 = vmul.f32 %v4899_v60, %v353_v61  ;;  %v8361_v61 = vmov 0 }
 0x166   :  { %8336 = vst [vmem:[#allocation91_spill] sm:$0xff] %v5329_v7  ;;  %v8341_v62 = vsel %vm5340_vm0, 4294967295, %v8340_v62  ;;  %vm8345_vm11 = vmpackc.low %vm8244_vm8, %vm8344_vm5  ;;  %v5354_v11 = vpack.c.bf16 %v5325_v8, %v5329_v7  ;;  %vm8351_vm8 = vcmp.ge.s32.totalorder %v8236_v20, 0  ;;  %vm8352_vm5 = vnez %v8273_v9  ;;  %3760 = vmatpush3.bf16.msra.mxu1 %v4083_v19  ;;  %v8398_v19 = vld [vmem:[#allocation8_spill] sm:$0xff] }
 0x167   :  { %3430 = vmatmul.mubr.msk.bf16.vlgmr.msra.gmra.mrb[16].mxu0 %vm8345_vm11, %v5260_v54  ;;  %vm8348_vm4 = vmmov %vm8314_vm3  ;;  %v376_v30 = vmul.f32 %v4899_v60, %v354_v3  ;;  %v8368_v54 = vrot.slane %v5114_v50, 1  ;;  %v8377_v3 = vld [vmem:[#allocation9_spill] sm:$0xff]  ;;  %v8402_v7 = vld [vmem:[#allocation12_spill] sm:$0xff]  ;;  %3761 = vmatprep.subr.bf16.mxu1 %v4084_v27  ;;  %vm8464_vm0 = vcmp.ge.s32.totalorder %v4726_v36, 0 }
 0x168   :  { %8346 = vst [vmem:[#allocation5_spill] sm:$0xff] %v5354_v11  ;;  %v5361_v51 = vsel %vm8348_vm4, %v492_v56, %v8347_v18  ;;  %vm5374_vm11 = vmand %vm8352_vm5, %vm8351_vm8  ;;  %vm8355_vm4 = vcmp.ge.s32.totalorder %v8242_v52, 0  ;;  %v8357_v56 = vmov 0  ;;  %3822 = vmatpush3.bf16.msra.mxu0 %v4087_v53  ;;  %v8409_v27 = vld [vmem:[#allocation44_spill] sm:$0xff] }
 0x169   :  { %v8354_v59 = vsel %vm5374_vm11, 4294967295, %v8353_v59  ;;  %vm5382_vm3 = vmand %vm8356_vm10, %vm8355_vm4  ;;  %vm8364_vm11 = vnez %v8181_v21  ;;  %vm8365_vm4 = vnez %v8248_v57  ;;  %v5403_v2 = vpack.c.bf16 %v5361_v51, %v518_v25  ;;  %v4091_v21 = vld [vmem:[%s7668_s2 + $0x188] sm:$0xff]   ;;  %3823 = vmatprep.subr.bf16.mxu0 %v4089_v15  ;;  %v4090_v52 = vld [vmem:[%s7668_s2 + $0x118] sm:$0xff]  }
 0x16a   :  { %v8358_v56 = vsel %vm5382_vm3, 4294967295, %v8357_v56  ;;  %vm5390_vm14 = vmand %vm8360_vm12, %vm8359_vm7  ;;  %vm8369_vm12 = vcmp.lt.s32.totalorder %v4416_v13, 7  ;;  %vm8371_vm7 = vcmp.lt.s32.totalorder %v8254_v58, 8  ;;  %v8373_v25 = vmov 0 }
 0x16b   :  { %v8362_v61 = vsel %vm5390_vm14, 4294967295, %v8361_v61  ;;  %vm8366_vm13 = vmpackc.low %vm8364_vm11, %vm8365_vm4  ;;  %8367 = vst [vmem:[#allocation92_spill] sm:$0xff] %v5403_v2  ;;  %v5410_v31 = vsel %vm8369_vm12, %v845_v17, %v8368_v54  ;;  %v397_v54 = vadd.f32 %v4977_v37, %v375_v14  ;;  %v8375_v17 = vld [vmem:[#allocation6_spill] sm:$0xff]  ;;  %vm8379_vm12 = vcmp.lt.s32.totalorder %v8262_v16, 8  ;;  %v8383_v14 = vld [vmem:[#allocation11_spill] sm:$0xff] }
 0x16c   :  { %3433 = vmatprep.mubr.msk.bf16.mxu0 %vm8366_vm13, %v3432_v47  ;;  %8370 = vst [vmem:[#allocation93_spill] sm:$0xff] %v5410_v31  ;;  %vm8372_vm13 = vcmp.ge.s32.totalorder %v8254_v58, 0  ;;  %v8376_v53 = vsub.f32 %v8375_v17, %v4565_v55  ;;  %v8378_v58 = vsub.f32 %v8377_v3, %v4565_v55  ;;  %v8380_v57 = vmov 0  ;;  %v8392_v3 = vld [vmem:[#allocation29_spill] sm:$0xff]  ;;  %v8400_v16 = vld [vmem:[#allocation10_spill] sm:$0xff]  ;;  %3824 = vmatpush3.bf16.msra.mxu0 %v4091_v21 }
 0x16d   :  { %vm5419_vm11 = vmand %vm8372_vm13, %vm8371_vm7  ;;  %v8384_v46 = vsub.f32 %v8383_v14, %v4565_v55  ;;  %vm8385_vm13 = vcmp.lt.s32.totalorder %v4561_v40, 8  ;;  %vm8386_vm4 = vcmp.ge.s32.totalorder %v4561_v40, 0  ;;  %v8387_v15 = vmov 0  ;;  %v4086_v40 = vld [vmem:[%s7668_s2 + $0x110] sm:$0xff]   ;;  %v8415_v21 = vld [vmem:[#allocation45_spill] sm:$0xff] }
 0x16e   :  { %v8374_v25 = vsel %vm5419_vm11, 4294967295, %v8373_v25  ;;  %v355_v47 = vmul.f32 %v4894_v28, %v8376_v53  ;;  %v356_v18 = vmul.f32 %v4894_v28, %v8378_v58  ;;  %vm5439_vm7 = vmand %vm8352_vm5, %vm8379_vm12  ;;  %v4093_v53 = vld [vmem:[%s7668_s2 + $0x1d0] sm:$0xff]   ;;  %v8395_v58 = vmov 0  ;;  %3762 = vmatpush3.bf16.msra.mxu1 %v4086_v40  ;;  %v8436_v40 = vld [vmem:[#allocation41_spill] sm:$0xff] }
 0x16f   :  { %v8381_v57 = vsel %vm5439_vm7, 4294967295, %v8380_v57  ;;  %v357_v17 = vmul.f32 %v4894_v28, %v8384_v46  ;;  %vm5451_vm2 = vmand %vm8386_vm4, %vm8385_vm13  ;;  %v398_v46 = vadd.f32 %v4977_v37, %v376_v30  ;;  %vm8393_vm4 = vcmp.lt.s32.totalorder %v8392_v3, 8  ;;  %3825 = vmatprep.subr.bf16.mxu0 %v4093_v53 }
 0x170   :  { %8382 = vst [vmem:[#allocation6_spill] sm:$0xff] %v8381_v57  ;;  %v8388_v15 = vsel %vm5451_vm2, 4294967295, %v8387_v15  ;;  %vm8394_vm13 = vcmp.ge.s32.totalorder %v8392_v3, 0  ;;  %v8399_v14 = vsub.f32 %v8398_v19, %v4565_v55  ;;  %v8401_v33 = vsub.f32 %v8400_v16, %v4565_v55  ;;  %v4088_v16 = vld [vmem:[%s7668_s2 + $0x158] sm:$0xff]  }
 0x171   :  { %8389 = vst [vmem:[#allocation9_spill] sm:$0xff] %v8388_v15  ;;  %vm5472_vm11 = vmand %vm8394_vm13, %vm8393_vm4  ;;  %v8403_v30 = vsub.f32 %v8402_v7, %v4565_v55  ;;  %v5488_v3 = vmax.f32 %v397_v54, 0.0  ;;  %v377_v19 = vmul.f32 %v4899_v60, %v355_v47  ;;  %vm8405_vm13 = vcmp.lt.s32.totalorder %v8279_v1, 8  ;;  %v8408_v7 = vld [vmem:[#allocation57_spill] sm:$0xff]  ;;  %v4095_v47 = vld [vmem:[%s7668_s2 + $0x190] sm:$0xff]   ;;  %3763 = vmatprep.subr.bf16.mxu1 %v4088_v16 }
 0x172   :  { %v8396_v58 = vsel %vm5472_vm11, 4294967295, %v8395_v58  ;;  %v358_v48 = vmul.f32 %v4894_v28, %v8399_v14  ;;  %v359_v8 = vmul.f32 %v4894_v28, %v8401_v33  ;;  %v378_v33 = vmul.f32 %v4899_v60, %v356_v18  ;;  %vm5503_vm9 = vmand %vm8356_vm10, %vm8405_vm13  ;;  %v8418_v15 = vld [vmem:[#allocation69_spill] sm:$0xff]  ;;  %3826 = vmatpush3.bf16.msra.mxu0 %v4095_v47  ;;  %3764 = vmatpush3.bf16.msra.mxu1 %v4090_v52 }
 0x173   :  { %8397 = vst [vmem:[#allocation11_spill] sm:$0xff] %v8396_v58  ;;  %v360_v43 = vmul.f32 %v4894_v28, %v8403_v30  ;;  %8404 = vst [vmem:[#allocation29_spill] sm:$0xff] %v5488_v3  ;;  %v8406_v55 = vmov 0  ;;  %v379_v28 = vmul.f32 %v4899_v60, %v357_v17  ;;  %v5512_v54 = vmax.f32 %v398_v46, 0.0  ;;  %v8416_v30 = vld [vmem:[#allocation70_spill] sm:$0xff] }
 0x174   :  { %v8407_v55 = vsel %vm5503_vm9, 4294967295, %v8406_v55  ;;  %vm8412_vm10 = vcmp.ge.s32.totalorder %v8288_v41, 0  ;;  %v8413_v18 = vmov 0  ;;  %v380_v17 = vmul.f32 %v4899_v60, %v358_v48 }
 0x175   :  { %8410 = vst [vmem:[#allocation8_spill] sm:$0xff] %v5512_v54  ;;  %vm5522_vm3 = vmand %vm5451_vm2, %vm8412_vm10  ;;  %v5531_v46 = vmul.f32 %v4899_v60, %v359_v8  ;;  %v5534_v14 = vmul.f32 %v4899_v60, %v360_v43  ;;  %vm8417_vm10 = vnez %v8416_v30  ;;  %vm8419_vm5 = vnez %v8418_v15  ;;  %v8421_v43 = vld [vmem:[#allocation36_spill] sm:$0xff] }
 0x176   :  { %v8414_v18 = vsel %vm5522_vm3, 4294967295, %v8413_v18  ;;  %vm8420_vm4 = vmpackc.low %vm8417_vm10, %vm8419_vm5  ;;  %v494_v1 = vrot.slane %v5488_v3, 7  ;;  %v847_v48 = vrot.slane %v5488_v3, 1  ;;  %v399_v8 = vadd.f32 %v4977_v37, %v377_v19  ;;  %v4097_v19 = vld [vmem:[%s7668_s2 + $0x1d8] sm:$0xff]  }
 0x177   :  { %3388 = vmatmul.mubr.msk.bf16.gmra.mrb[4].mxu1 %vm8420_vm4, %v5294_v22  ;;  %v400_v60 = vadd.f32 %v4977_v37, %v378_v33  ;;  %vm8422_vm8 = vcmp.ge.s32.totalorder %v8421_v43, 0  ;;  %v8423_v15 = vmov 0  ;;  %v8426_v22 = vld [vmem:[#allocation84_spill] sm:$0xff]  ;;  %v8427_v33 = vld [vmem:[#allocation66_spill] sm:$0xff]  ;;  %v5573_v58 = vpack.c.bf16 %v5512_v54, %v5488_v3  ;;  %vm5644_vm2 = vmand %vm8464_vm0, %vm8463_vm15  ;;  %3827 = vmatprep.subr.bf16.mxu0 %v4097_v19 }
 0x178   :  { %vm5556_vm12 = vmand %vm5472_vm11, %vm8422_vm8  ;;  %vm8428_vm10 = vnez %v8427_v33  ;;  %v495_v53 = vrot.slane %v5512_v54, 7  ;;  %v848_v20 = vrot.slane %v5512_v54, 1  ;;  %v401_v30 = vadd.f32 %v4977_v37, %v379_v28 }
 0x179   :  { %v8424_v15 = vsel %vm5556_vm12, 4294967295, %v8423_v15  ;;  %vm8429_vm13 = vmpackc.low %vm4918_vm1, %vm8428_vm10  ;;  %8430 = vst [vmem:[#allocation10_spill] sm:$0xff] %v5573_v58  ;;  %vm8431_vm8 = vcmp.lt.s32.totalorder %v4828_v6, 8  ;;  %vm8432_vm1 = vcmp.ge.s32.totalorder %v4828_v6, 0  ;;  %vm8437_vm10 = vcmp.lt.s32.totalorder %v8436_v40, 8 }
 0x17a   :  { %3391 = vmatprep.mubr.msk.bf16.mxu1 %vm8429_vm13, %v8426_v22  ;;  %vm5585_vm13 = vmand %vm8432_vm1, %vm8431_vm8  ;;  %vm8438_vm5 = vcmp.ge.s32.totalorder %v8436_v40, 0  ;;  %v8439_v33 = vmov 0  ;;  %vm8445_vm8 = vnez %v8224_v23  ;;  %vm8446_vm1 = vnez %v8221_v24  ;;  %v4092_v24 = vld [vmem:[%s7668_s2 + $0x160] sm:$0xff]  }
 0x17b   :  { %v8434_v44 = vsel %vm5585_vm13, 4294967295, %v8433_v44  ;;  %vm5593_vm4 = vmand %vm8438_vm5, %vm8437_vm10  ;;  %v8448_v6 = vrot.slane %v5114_v50, 7  ;;  %vm8449_vm5 = vcmp.lt.s32.totalorder %v4416_v13, 1  ;;  %v8450_v40 = vrot.slane %v5114_v50, 1  ;;  %3765 = vmatprep.subr.bf16.mxu1 %v4092_v24 }
 0x17c   :  { %8435 = vst [vmem:[#allocation12_spill] sm:$0xff] %v8434_v44  ;;  %v8440_v33 = vsel %vm5593_vm4, 4294967295, %v8439_v33  ;;  %vm8447_vm13 = vmpackc.low %vm8445_vm8, %vm8446_vm1  ;;  %vm8451_vm10 = vcmp.lt.s32.totalorder %v4416_v13, 7  ;;  %v5617_v22 = vmax.f32 %v399_v8, 0.0  ;;  %v5619_v28 = vmax.f32 %v400_v60, 0.0  ;;  %v8468_v60 = vld [vmem:[#allocation54_spill] sm:$0xff] }
 0x17d   :  { %8441 = vst [vmem:[#allocation57_spill] sm:$0xff] %v8440_v33  ;;  %3436 = vmatmul.mubr.msk.bf16.gmra.mrb[20].mxu0 %vm8447_vm13, %v5354_v11  ;;  %v516_v3 = vsel %vm8449_vm5, %v8448_v6, %v494_v1  ;;  %v5615_v54 = vsel %vm8451_vm10, %v8450_v40, %v847_v48  ;;  %vm8455_vm13 = vcmp.ge.s32.totalorder %v8288_v41, 0  ;;  %v8456_v23 = vmov 0  ;;  %v8469_v40 = vld [vmem:[#allocation55_spill] sm:$0xff] }
 0x17e   :  { %8452 = vst [vmem:[#allocation70_spill] sm:$0xff] %v5615_v54  ;;  %8453 = vst [vmem:[#allocation69_spill] sm:$0xff] %v5617_v22  ;;  %vm8459_vm1 = vcmp.ge.s32.totalorder %v8421_v43, 0  ;;  %vm8460_vm5 = vnez %v8374_v25  ;;  %v8461_v16 = vmov 0  ;;  %v8465_v8 = vmov 0 }
 0x17f   :  { %8454 = vst [vmem:[#allocation66_spill] sm:$0xff] %v5619_v28  ;;  %vm5628_vm8 = vmand %vm5390_vm14, %vm8455_vm13  ;;  %v8466_v8 = vsel %vm5644_vm2, 4294967295, %v8465_v8  ;;  %v3438_v6 = vpack.c.bf16 %v516_v3, %v5361_v51  ;;  %v5653_v11 = vpack.c.bf16 %v5615_v54, %v5410_v31  ;;  %vm8474_vm15 = vcmp.lt.s32.totalorder %v4831_v4, 8  ;;  %v4099_v51 = vld [vmem:[%s7668_s2 + $0x198] sm:$0xff]   ;;  %v8501_v54 = vld [vmem:[#allocation62_spill] sm:$0xff] }
 0x180   :  { %v8457_v23 = vsel %vm5628_vm8, 4294967295, %v8456_v23  ;;  %vm5636_vm10 = vmand %vm8460_vm5, %vm8459_vm1  ;;  %8467 = vst [vmem:[#allocation95_spill] sm:$0xff] %v8466_v8  ;;  %vm8471_vm1 = vcmp.lt.s32.totalorder %v4416_v13, 1  ;;  %vm8475_vm0 = vcmp.ge.s32.totalorder %v4831_v4, 0  ;;  %v8476_v50 = vmov 0  ;;  %v8502_v31 = vld [vmem:[#allocation63_spill] sm:$0xff]  ;;  %3828 = vmatpush3.bf16.msra.mxu0 %v4099_v51 }
 0x181   :  { %8458 = vst [vmem:[#allocation94_spill] sm:$0xff] %v8457_v23  ;;  %v8462_v16 = vsel %vm5636_vm10, 4294967295, %v8461_v16  ;;  %8470 = vst [vmem:[#allocation54_spill] sm:$0xff] %v5653_v11  ;;  %v5657_v43 = vsel %vm8471_vm1, %v494_v1, %v495_v53  ;;  %vm8472_vm10 = vcmp.lt.s32.totalorder %v4416_v13, 7  ;;  %v496_v1 = vrot.slane %v5617_v22, 7 }
 0x182   :  { %v5661_v41 = vsel %vm8472_vm10, %v847_v48, %v848_v20  ;;  %vm5667_vm11 = vmand %vm8475_vm0, %vm8474_vm15  ;;  %v5676_v36 = vpack.c.bf16 %v5657_v43, %v516_v3  ;;  %v5680_v47 = vpack.c.bf16 %v5619_v28, %v5617_v22  ;;  %v849_v48 = vrot.slane %v5617_v22, 1  ;;  %v4101_v22 = vld [vmem:[%s7668_s2 + $0x1e0] sm:$0xff]  }
 0x183   :  { %8473 = vst [vmem:[#allocation96_spill] sm:$0xff] %v5661_v41  ;;  %v8477_v50 = vsel %vm5667_vm11, 4294967295, %v8476_v50  ;;  %vm8480_vm10 = vcmp.lt.s32.totalorder %v8342_v32, 8  ;;  %v8481_v4 = vmov 0  ;;  %vm8483_vm15 = vcmp.lt.s32.totalorder %v8343_v10, 8  ;;  %v4094_v32 = vld [vmem:[%s7668_s2 + $0x120] sm:$0xff]   ;;  %3829 = vmatprep.subr.bf16.mxu0 %v4101_v22 }
 0x184   :  { %8478 = vst [vmem:[#allocation97_spill] sm:$0xff] %v5676_v36  ;;  %8479 = vst [vmem:[#allocation98_spill] sm:$0xff] %v5680_v47  ;;  %v8484_v3 = vmov 0  ;;  %vm8486_vm13 = vnez %v8261_v39  ;;  %v5711_v10 = vmax.f32 %v401_v30, 0.0  ;;  %v497_v19 = vrot.slane %v5619_v28, 7  ;;  %v8497_v30 = vld [vmem:[#allocation67_spill] sm:$0xff]  ;;  %3766 = vmatpush3.bf16.msra.mxu1 %v4094_v32 }
 0x185   :  { %vm5687_vm1 = vmand %vm5390_vm14, %vm8480_vm10  ;;  %vm8487_vm10 = vnez %v8253_v45  ;;  %v402_v39 = vadd.f32 %v4977_v37, %v380_v17  ;;  %v850_v45 = vrot.slane %v5619_v28, 1  ;;  %v8495_v52 = vmov 0  ;;  %v4096_v28 = vld [vmem:[%s7668_s2 + $0x168] sm:$0xff]   ;;  %v8538_v32 = vld [vmem:[#allocation77_spill] sm:$0xff] }
 0x186   :  { %v8482_v4 = vsel %vm5687_vm1, 4294967295, %v8481_v4  ;;  %vm5695_vm0 = vmand %vm8460_vm5, %vm8483_vm15  ;;  %vm8494_vm15 = vcmp.ge.s32.totalorder %v8363_v63, 0  ;;  %vm8498_vm11 = vcmp.lt.s32.totalorder %v4416_v13, 1  ;;  %v403_v8 = vadd.f32 %v4977_v37, %v5531_v46  ;;  %v8508_v46 = vld [vmem:[#allocation68_spill] sm:$0xff]  ;;  %3767 = vmatprep.subr.bf16.mxu1 %v4096_v28 }
 0x187   :  { %v8485_v3 = vsel %vm5695_vm0, 4294967295, %v8484_v3  ;;  %vm8488_vm8 = vmpackc.low %vm8486_vm13, %vm8487_vm10  ;;  %v514_v17 = vsel %vm8498_vm11, %v495_v53, %v496_v1  ;;  %v404_v53 = vadd.f32 %v4977_v37, %v5534_v14  ;;  %vm8503_vm7 = vcmp.lt.s32.totalorder %v4924_v35, 8 }
 0x188   :  { %3439 = vmatprep.mubr.msk.bf16.mxu0 %vm8488_vm8, %v3438_v6  ;;  %vm8491_vm8 = vcmp.ge.s32.totalorder %v4833_v12, 0  ;;  %v8492_v6 = vmov 0  ;;  %vm5731_vm10 = vmand %vm5644_vm2, %vm8494_vm15  ;;  %vm8504_vm1 = vcmp.ge.s32.totalorder %v4924_v35, 0  ;;  %v3444_v37 = vpack.c.bf16 %v514_v17, %v5657_v43  ;;  %v4103_v43 = vld [vmem:[%s7668_s2 + $0x1a0] sm:$0xff]  }
 0x189   :  { %vm5723_vm13 = vmand %vm5593_vm4, %vm8491_vm8  ;;  %v8496_v52 = vsel %vm5731_vm10, 4294967295, %v8495_v52  ;;  %vm8499_vm4 = vcmp.lt.s32.totalorder %v4416_v13, 7  ;;  %v498_v35 = vrot.slane %v5711_v10, 7  ;;  %vm8513_vm14 = vcmp.ge.s32.totalorder %v4927_v29, 0  ;;  %3830 = vmatpush3.bf16.msra.mxu0 %v4103_v43 }
 0x18a   :  { %v8493_v6 = vsel %vm5723_vm13, 4294967295, %v8492_v6  ;;  %v5745_v33 = vsel %vm8499_vm4, %v848_v20, %v849_v48  ;;  %vm5762_vm2 = vmand %vm8504_vm1, %vm8503_vm7  ;;  %v8505_v20 = vmov 0  ;;  %vm8512_vm1 = vcmp.lt.s32.totalorder %v4927_v29, 8 }
 0x18b   :  { %8500 = vst [vmem:[#allocation67_spill] sm:$0xff] %v5745_v33  ;;  %v8506_v20 = vsel %vm5762_vm2, 4294967295, %v8505_v20  ;;  %v5775_v14 = vpack.c.bf16 %v5745_v33, %v5661_v41  ;;  %vm8511_vm7 = vmmov %vm8498_vm11  ;;  %v8514_v57 = vmov 0  ;;  %vm8517_vm5 = vnez %v8269_v0  ;;  %v4104_v0 = vld [vmem:[%s7668_s2 + $0x1e8] sm:$0xff]  }
 0x18c   :  { %8507 = vst [vmem:[#allocation62_spill] sm:$0xff] %v8506_v20  ;;  %v5780_v24 = vsel %vm8511_vm7, %v496_v1, %v497_v19  ;;  %vm5789_vm11 = vmand %vm8513_vm14, %vm8512_vm1  ;;  %vm8518_vm4 = vnez %v8266_v42  ;;  %v5806_v29 = vmax.f32 %v402_v39, 0.0  ;;  %v851_v1 = vrot.slane %v5711_v10, 1  ;;  %v8523_v42 = vld [vmem:[#allocation48_spill] sm:$0xff]  ;;  %v4098_v39 = vld [vmem:[%s7668_s2 + $0x128] sm:$0xff]   ;;  %3831 = vmatprep.subr.bf16.mxu0 %v4104_v0 }
 0x18d   :  { %8510 = vst [vmem:[#allocation63_spill] sm:$0xff] %v5775_v14  ;;  %v8515_v57 = vsel %vm5789_vm11, 4294967295, %v8514_v57  ;;  %vm8519_vm7 = vmpackc.low %vm8517_vm5, %vm8518_vm4  ;;  %v5804_v51 = vpack.c.bf16 %v5780_v24, %v514_v17  ;;  %vm8522_vm14 = vcmp.lt.s32.totalorder %v4416_v13, 7  ;;  %vm8527_vm5 = vcmp.lt.s32.totalorder %v4416_v13, 1  ;;  %3768 = vmatpush3.bf16.msra.mxu1 %v4098_v39  ;;  %v8706_v41 = vld [vmem:[#allocation66_spill] sm:$0xff] }
 0x18e   :  { %8516 = vst [vmem:[#allocation68_spill] sm:$0xff] %v8515_v57  ;;  %3394 = vmatmul.mubr.msk.bf16.gmra.mrb[8].mxu1 %vm8519_vm7, %v5403_v2  ;;  %8521 = vst [vmem:[#allocation100_spill] sm:$0xff] %v5806_v29  ;;  %v5811_v33 = vsel %vm8522_vm14, %v849_v48, %v850_v45  ;;  %vm8524_vm7 = vnez %v8278_v38  ;;  %vm8525_vm14 = vnez %v8273_v9  ;;  %v5830_v22 = vsel %vm8527_vm5, %v497_v19, %v498_v35  ;;  %v8540_v19 = vld [vmem:[#allocation59_spill] sm:$0xff] }
 0x18f   :  { %8520 = vst [vmem:[#allocation99_spill] sm:$0xff] %v5804_v51  ;;  %vm8526_vm8 = vmpackc.low %vm8524_vm7, %vm8525_vm14  ;;  %v5832_v48 = vmax.f32 %v403_v8, 0.0  ;;  %v5837_v17 = vmax.f32 %v404_v53, 0.0  ;;  %vm8529_vm1 = vcmp.lt.s32.totalorder %v8408_v7, 8  ;;  %vm8530_vm4 = vcmp.ge.s32.totalorder %v8408_v7, 0  ;;  %v8541_v53 = vld [vmem:[#allocation60_spill] sm:$0xff] }
 0x190   :  { %3397 = vmatprep.mubr.msk.bf16.mxu1 %vm8526_vm8, %v5573_v58  ;;  %vm5843_vm3 = vmand %vm8530_vm4, %vm8529_vm1  ;;  %v8531_v9 = vmov 0  ;;  %vm8533_vm8 = vcmp.lt.s32.totalorder %v8409_v27, 8  ;;  %vm8534_vm5 = vcmp.ge.s32.totalorder %v8409_v27, 0  ;;  %v8535_v38 = vmov 0  ;;  %v8560_v7 = vld [vmem:[#allocation64_spill] sm:$0xff]  ;;  %v4109_v57 = vld [vmem:[%s7668_s2 + $0x1b0] sm:$0xff]  }
 0x191   :  { %8528 = vst [vmem:[#allocation101_spill] sm:$0xff] %v5832_v48  ;;  %v8532_v9 = vsel %vm5843_vm3, 4294967295, %v8531_v9  ;;  %vm5851_vm7 = vmand %vm8534_vm5, %vm8533_vm8  ;;  %v5857_v8 = vpack.c.bf16 %v8538_v32, %v5086_v34  ;;  %vm8542_vm4 = vnez %v8287_v5  ;;  %v5871_v58 = vpack.c.bf16 %v5806_v29, %v5711_v10 }
 0x192   :  { %v8536_v38 = vsel %vm5851_vm7, 4294967295, %v8535_v38  ;;  %vm8543_vm1 = vmpackc.low %vm5277_vm6, %vm8542_vm4  ;;  %vm8545_vm8 = vcmp.lt.s32.totalorder %v4416_v13, 7  ;;  %vm8547_vm5 = vcmp.ge.s32.totalorder %v4833_v12, 0  ;;  %vm8548_vm12 = vnez %v8434_v44  ;;  %v8565_v12 = vld [vmem:[#allocation58_spill] sm:$0xff]  ;;  %v4106_v44 = vld [vmem:[%s7668_s2 + $0x178] sm:$0xff]  }
 0x193   :  { %8537 = vst [vmem:[#allocation102_spill] sm:$0xff] %v8536_v38  ;;  %8539 = vst [vmem:[#allocation103_spill] sm:$0xff] %v5857_v8  ;;  %3442 = vmatmul.mubr.msk.bf16.gmra.mrb[24].mxu0 %vm8543_vm1, %v5653_v11  ;;  %v5875_v2 = vsel %vm8545_vm8, %v850_v45, %v851_v1  ;;  %v499_v8 = vrot.slane %v5806_v29, 7  ;;  %vm8551_vm4 = vcmp.ge.s32.totalorder %v8363_v63, 0  ;;  %vm8552_vm1 = vnez %v8477_v50  ;;  %v4100_v45 = vld [vmem:[%s7668_s2 + $0x170] sm:$0xff]  }
 0x194   :  { %8544 = vst [vmem:[#allocation104_spill] sm:$0xff] %v5871_v58  ;;  %8546 = vst [vmem:[#allocation105_spill] sm:$0xff] %v5875_v2  ;;  %v8553_v5 = vmov 0  ;;  %vm8555_vm8 = vcmp.lt.s32.totalorder %v8415_v21, 8  ;;  %vm8556_vm3 = vcmp.ge.s32.totalorder %v8415_v21, 0  ;;  %v8557_v28 = vmov 0  ;;  %3769 = vmatprep.subr.bf16.mxu1 %v4100_v45 }
 0x195   :  { %vm5882_vm6 = vmand %vm8548_vm12, %vm8547_vm5  ;;  %v5913_v11 = vpack.c.bf16 %v5875_v2, %v5811_v33  ;;  %v500_v63 = vrot.slane %v5832_v48, 7  ;;  %v8568_v21 = vmov 0  ;;  %v8574_v58 = vmov 0  ;;  %v8797_v2 = vld [vmem:[#allocation51_spill] sm:$0xff] }
 0x196   :  { %v8550_v49 = vsel %vm5882_vm6, 4294967295, %v8549_v49  ;;  %vm5890_vm14 = vmand %vm8552_vm1, %vm8551_vm4  ;;  %vm8561_vm6 = vnez %v8341_v62  ;;  %vm8562_vm4 = vnez %v8331_v26  ;;  %v5926_v62 = vpack.c.bf16 %v5837_v17, %v5832_v48 }
 0x197   :  { %v8554_v5 = vsel %vm5890_vm14, 4294967295, %v8553_v5  ;;  %vm5898_vm15 = vmand %vm8556_vm3, %vm8555_vm8  ;;  %8564 = vst [vmem:[#allocation107_spill] sm:$0xff] %v5913_v11  ;;  %vm8566_vm3 = vcmp.lt.s32.totalorder %v8565_v12, 8  ;;  %vm8567_vm8 = vcmp.ge.s32.totalorder %v8565_v12, 0  ;;  %v852_v26 = vrot.slane %v5806_v29, 1  ;;  %v8572_v11 = vld [vmem:[#allocation52_spill] sm:$0xff] }
 0x198   :  { %v8558_v28 = vsel %vm5898_vm15, 4294967295, %v8557_v28  ;;  %vm8563_vm9 = vmpackc.low %vm8561_vm6, %vm8562_vm4  ;;  %8570 = vst [vmem:[#allocation58_spill] sm:$0xff] %v5926_v62  ;;  %v853_v12 = vrot.slane %v5832_v48, 1  ;;  %vm8573_vm6 = vcmp.lt.s32.totalorder %v8572_v11, 8  ;;  %v8576_v62 = vld [vmem:[#allocation53_spill] sm:$0xff]  ;;  %v8578_v43 = vmov 0 }
 0x199   :  { %8559 = vst [vmem:[#allocation106_spill] sm:$0xff] %v8558_v28  ;;  %3445 = vmatprep.mubr.msk.bf16.mxu0 %vm8563_vm9, %v3444_v37  ;;  %vm5920_vm14 = vmand %vm8567_vm8, %vm8566_vm3  ;;  %v4105_v37 = vld [vmem:[%s7668_s2 + $0x1a8] sm:$0xff]   ;;  %vm8571_vm9 = vcmp.lt.s32.totalorder %v4416_v13, 1  ;;  %vm8577_vm3 = vcmp.lt.s32.totalorder %v8576_v62, 8  ;;  %v854_v51 = vrot.slane %v5837_v17, 1  ;;  %v8584_v11 = vmov 0 }
 0x19a   :  { %v8569_v21 = vsel %vm5920_vm14, 4294967295, %v8568_v21  ;;  %v5934_v27 = vsel %vm8571_vm9, %v498_v35, %v499_v8  ;;  %vm5941_vm4 = vmand %vm8548_vm12, %vm8573_vm6  ;;  %v501_v35 = vrot.slane %v5837_v17, 7  ;;  %v8581_v48 = vld [vmem:[#allocation46_spill] sm:$0xff]  ;;  %v4108_v62 = vld [vmem:[%s7668_s2 + $0x1f0] sm:$0xff]   ;;  %vm8589_vm14 = vcmp.lt.s32.totalorder %v4416_v13, 1  ;;  %3832 = vmatpush3.bf16.msra.mxu0 %v4105_v37 }
 0x19b   :  { %v8575_v58 = vsel %vm5941_vm4, 4294967295, %v8574_v58  ;;  %vm5949_vm8 = vmand %vm8552_vm1, %vm8577_vm3  ;;  %vm8582_vm9 = vcmp.lt.s32.totalorder %v8581_v48, 8  ;;  %vm8583_vm5 = vcmp.ge.s32.totalorder %v8581_v48, 0  ;;  %vm8587_vm3 = vnez %v8457_v23  ;;  %3833 = vmatprep.subr.bf16.mxu0 %v4108_v62 }
 0x19c   :  { %v8579_v43 = vsel %vm5949_vm8, 4294967295, %v8578_v43  ;;  %vm5959_vm6 = vmand %vm8583_vm5, %vm8582_vm9  ;;  %vm8588_vm8 = vnez %v8462_v16  ;;  %v5976_v48 = vpack.c.bf16 %v5934_v27, %v5830_v22  ;;  %vm8591_vm5 = vcmp.lt.s32.totalorder %v4416_v13, 7  ;;  %v8732_v16 = vld [vmem:[#allocation104_spill] sm:$0xff] }
 0x19d   :  { %8580 = vst [vmem:[#allocation108_spill] sm:$0xff] %v8579_v43  ;;  %v8585_v11 = vsel %vm5959_vm6, 4294967295, %v8584_v11  ;;  %v5972_v43 = vsel %vm8589_vm14, %v499_v8, %v500_v63  ;;  %v5980_v0 = vsel %vm8591_vm5, %v851_v1, %v852_v26  ;;  %vm8593_vm9 = vcmp.ge.s32.totalorder %v8468_v60, 0  ;;  %v4102_v1 = vld [vmem:[%s7668_s2 + $0x130] sm:$0xff]  }
 0x19e   :  { %8586 = vst [vmem:[#allocation109_spill] sm:$0xff] %v8585_v11  ;;  %8590 = vst [vmem:[#allocation110_spill] sm:$0xff] %v5976_v48  ;;  %v8594_v23 = vmov 0  ;;  %vm8597_vm14 = vcmp.ge.s32.totalorder %v8469_v40, 0  ;;  %v8598_v8 = vmov 0  ;;  %v8601_v39 = vrot.slane %v8538_v32, 7  ;;  %3770 = vmatpush3.bf16.msra.mxu1 %v4102_v1  ;;  %3834 = vmatpush3.bf16.msra.mxu0 %v4109_v57 }
 0x19f   :  { %8592 = vst [vmem:[#allocation111_spill] sm:$0xff] %v5980_v0  ;;  %vm5986_vm6 = vmand %vm5851_vm7, %vm8593_vm9  ;;  %v8602_v38 = vrot.slane %v5086_v34, 7  ;;  %vm8603_vm5 = vcmp.lt.s32.totalorder %v4416_v13, 1  ;;  %v8606_v28 = vmov 0  ;;  %vm8609_vm7 = vcmp.lt.s32.totalorder %v4416_v13, 7  ;;  %3771 = vmatprep.subr.bf16.mxu1 %v4106_v44  ;;  %v8688_v44 = vld [vmem:[#allocation42_spill] sm:$0xff] }
 0x1a0   :  { %v8595_v23 = vsel %vm5986_vm6, 4294967295, %v8594_v23  ;;  %vm5994_vm4 = vmand %vm5898_vm15, %vm8597_vm14  ;;  %v8637_v62 = vmov 0  ;;  %v8693_v57 = vmov 0  ;;  %v8711_v1 = vld [vmem:[#allocation30_spill] sm:$0xff]  ;;  %vm8740_vm6 = vcmp.ge.s32.totalorder %v8560_v7, 0 }
 0x1a1   :  { %8596 = vst [vmem:[#allocation112_spill] sm:$0xff] %v8595_v23  ;;  %v8599_v8 = vsel %vm5994_vm4, 4294967295, %v8598_v8  ;;  %v6007_v48 = vsel %vm8603_vm5, %v8602_v38, %v8601_v39  ;;  %v8604_v23 = vld [vmem:[#allocation27_spill] sm:$0xff]  ;;  %v6025_v38 = vsel %vm8609_vm7, %v852_v26, %v853_v12  ;;  %v8614_v26 = vmov 0 }
 0x1a2   :  { %8600 = vst [vmem:[#allocation113_spill] sm:$0xff] %v8599_v8  ;;  %vm8605_vm9 = vcmp.ge.s32.totalorder %v8604_v23, 0  ;;  %v8610_v23 = vrot.slane %v5086_v34, 7  ;;  %v8612_v8 = vld [vmem:[#allocation28_spill] sm:$0xff]  ;;  %v8742_v50 = vmov 0 }
 0x1a3   :  { %vm6013_vm14 = vmand %vm5762_vm2, %vm8605_vm9  ;;  %vm8613_vm15 = vcmp.ge.s32.totalorder %v8612_v8, 0  ;;  %v8619_v8 = vrot.slane %v5086_v34, 1  ;;  %vm8622_vm2 = vnez %v8358_v56  ;;  %v4110_v56 = vld [vmem:[%s7668_s2 + $0x1f8] sm:$0xff]  }
 0x1a4   :  { %v8607_v28 = vsel %vm6013_vm14, 4294967295, %v8606_v28  ;;  %v6031_v39 = vsel %vm8603_vm5, %v501_v35, %v8610_v23  ;;  %vm8611_vm9 = vmmov %vm8603_vm5  ;;  %vm8635_vm14 = vcmp.lt.s32.totalorder %v8501_v54, 8  ;;  %3835 = vmatprep.subr.bf16.mxu0 %v4110_v56  ;;  %v8704_v56 = vmov 0 }
 0x1a5   :  { %8608 = vst [vmem:[#allocation27_spill] sm:$0xff] %v8607_v28  ;;  %v6035_v20 = vsel %vm8611_vm9, %v500_v63, %v501_v35  ;;  %vm6044_vm7 = vmand %vm5789_vm11, %vm8613_vm15  ;;  %v6054_v63 = vpack.c.bf16 %v6025_v38, %v5980_v0  ;;  %vm8620_vm15 = vcmp.lt.s32.totalorder %v4416_v13, 7  ;;  %vm8623_vm11 = vnez %v8354_v59  ;;  %v8723_v0 = vld [vmem:[#allocation99_spill] sm:$0xff] }
 0x1a6   :  { %v8615_v26 = vsel %vm6044_vm7, 4294967295, %v8614_v26  ;;  %v6060_v35 = vpack.c.bf16 %v6035_v20, %v5972_v43  ;;  %v6066_v23 = vsel %vm8620_vm15, %v854_v51, %v8619_v8  ;;  %vm8624_vm5 = vmpackc.low %vm8622_vm2, %vm8623_vm11  ;;  %v8626_v8 = vld [vmem:[#allocation83_spill] sm:$0xff]  ;;  %v6093_v28 = vpack.c.bf16 %v6007_v48, %v6031_v39 }
 0x1a7   :  { %8616 = vst [vmem:[#allocation28_spill] sm:$0xff] %v8615_v26  ;;  %8618 = vst [vmem:[#allocation114_spill] sm:$0xff] %v6054_v63  ;;  %3400 = vmatmul.mubr.msk.bf16.gmra.mrb[12].mxu1 %vm8624_vm5, %v5676_v36  ;;  %v856_v59 = vrot.slane %v8538_v32, 1  ;;  %vm8628_vm2 = vcmp.lt.s32.totalorder %v8497_v30, 8  ;;  %vm8629_vm11 = vcmp.ge.s32.totalorder %v8497_v30, 0  ;;  %vm8632_vm5 = vnez %v8374_v25  ;;  %v8644_v25 = vld [vmem:[#allocation65_spill] sm:$0xff] }
 0x1a8   :  { %8621 = vst [vmem:[#allocation115_spill] sm:$0xff] %v6066_v23  ;;  %vm8625_vm0 = vmmov %vm8620_vm15  ;;  %vm8633_vm9 = vnez %v8362_v61  ;;  %vm8636_vm7 = vcmp.ge.s32.totalorder %v8501_v54, 0  ;;  %v8641_v30 = vmov 0  ;;  %v4107_v54 = vld [vmem:[%s7668_s2 + $0x138] sm:$0xff]   ;;  %v8651_v36 = vmov 0 }
 0x1a9   :  { %v6087_v37 = vsel %vm8625_vm0, %v853_v12, %v854_v51  ;;  %8627 = vst [vmem:[#allocation83_spill] sm:$0xff] %v6093_v28  ;;  %vm6103_vm0 = vmand %vm8629_vm11, %vm8628_vm2  ;;  %v8630_v51 = vmov 0  ;;  %vm8639_vm2 = vcmp.lt.s32.totalorder %v8502_v31, 8  ;;  %vm8640_vm11 = vcmp.ge.s32.totalorder %v8502_v31, 0  ;;  %v8654_v28 = vld [vmem:[#allocation6_spill] sm:$0xff]  ;;  %3772 = vmatpush3.bf16.msra.mxu1 %v4107_v54 }
 0x1aa   :  { %v8631_v51 = vsel %vm6103_vm0, 4294967295, %v8630_v51  ;;  %vm8634_vm15 = vmpackc.low %vm8632_vm5, %vm8633_vm9  ;;  %v6131_v61 = vpack.c.bf16 %v6066_v23, %v6087_v37  ;;  %vm8653_vm5 = vnez %v8407_v55  ;;  %vm8657_vm9 = vcmp.ge.s32.totalorder %v8468_v60, 0  ;;  %v8665_v55 = vld [vmem:[#allocation76_spill] sm:$0xff] }
 0x1ab   :  { %3403 = vmatprep.mubr.msk.bf16.mxu1 %vm8634_vm15, %v5680_v47  ;;  %vm6117_vm13 = vmand %vm8636_vm7, %vm8635_vm14  ;;  %vm8649_vm14 = vcmp.lt.s32.totalorder %v8508_v46, 8  ;;  %vm8650_vm7 = vcmp.ge.s32.totalorder %v8508_v46, 0  ;;  %v8659_v31 = vmov 0  ;;  %v8663_v46 = vmov 0  ;;  %v6186_v47 = vld [vmem:[%s7668_s2 + $0x200] sm:$0xff]  }
 0x1ac   :  { %v8638_v62 = vsel %vm6117_vm13, 4294967295, %v8637_v62  ;;  %vm6125_vm10 = vmand %vm8640_vm11, %vm8639_vm2  ;;  %8643 = vst [vmem:[#allocation116_spill] sm:$0xff] %v6131_v61  ;;  %vm8655_vm2 = vnez %v8654_v28  ;;  %v8666_v28 = vrot.slane %v8665_v55, 1  ;;  %v8690_v12 = vmov 0  ;;  %3949 = vmatprep.subr.bf16.mxu1 %v6186_v47  ;;  %v8774_v55 = vld [vmem:[#allocation110_spill] sm:$0xff] }
 0x1ad   :  { %v8642_v30 = vsel %vm6125_vm10, 4294967295, %v8641_v30  ;;  %vm6145_vm15 = vmand %vm8650_vm7, %vm8649_vm14  ;;  %vm8658_vm10 = vnez %v8532_v9  ;;  %vm8661_vm14 = vcmp.ge.s32.totalorder %v8469_v40, 0  ;;  %vm8662_vm7 = vnez %v8569_v21 }
 0x1ae   :  { %v8652_v36 = vsel %vm6145_vm15, 4294967295, %v8651_v36  ;;  %vm8656_vm11 = vmpackc.low %vm8653_vm5, %vm8655_vm2  ;;  %vm8667_vm5 = vcmp.lt.s32.totalorder %v4416_v13, 7  ;;  %v8675_v13 = vpack.c.bf16 %v5830_v22, %v5780_v24  ;;  %v8696_v22 = vld [vmem:[#allocation29_spill] sm:$0xff]  ;;  %vm8702_vm2 = vcmp.ge.s32.totalorder %v8560_v7, 0 }
 0x1af   :  { %3448 = vmatmul.mubr.msk.bf16.gmra.mrb[28].mxu0 %vm8656_vm11, %v5775_v14  ;;  %vm6159_vm13 = vmand %vm8658_vm10, %vm8657_vm9  ;;  %v6175_v45 = vsel %vm8667_vm5, %v856_v59, %v8666_v28  ;;  %v8669_v14 = vrot.slane %v5086_v34, 1  ;;  %v8674_v28 = vld [vmem:[#allocation41_spill] sm:$0xff]  ;;  %vm8676_vm11 = vnez %v8424_v15  ;;  %v4111_v15 = vld [vmem:[%s7668_s2 + $0x1b8] sm:$0xff]   ;;  %v8709_v54 = vmov 0 }
 0x1b0   :  { %v8660_v31 = vsel %vm6159_vm13, 4294967295, %v8659_v31  ;;  %vm6167_vm12 = vmand %vm8662_vm7, %vm8661_vm14  ;;  %8668 = vst [vmem:[#allocation6_spill] sm:$0xff] %v6175_v45  ;;  %v1333_v40 = vadd.s32 1, %v8674_v28  ;;  %vm8677_vm14 = vnez %v8414_v18  ;;  %v8697_v28 = vld [vmem:[#allocation67_spill] sm:$0xff]  ;;  %v8698_v18 = vld [vmem:[#allocation8_spill] sm:$0xff]  ;;  %v8712_v24 = vand.u32 7, %v8711_v1  ;;  %3836 = vmatpush3.bf16.msra.mxu0 %v4111_v15 }
 0x1b1   :  { %v8664_v46 = vsel %vm6167_vm12, 4294967295, %v8663_v46  ;;  %vm8670_vm9 = vmmov %vm8667_vm5  ;;  %vm8680_vm12 = vcmp.ge.s32.totalorder %v8523_v42, 0  ;;  %v8719_v1 = vld [vmem:[#allocation34_spill] sm:$0xff]  ;;  %v8727_v15 = vld [vmem:[#allocation113_spill] sm:$0xff]  ;;  %v8730_v23 = vmov 0  ;;  %vm8741_vm4 = vnez %v8638_v62 }
 0x1b2   :  { %v6181_v26 = vsel %vm8670_vm9, %v8669_v14, %v856_v59  ;;  %vm8678_vm5 = vmpackc.low %vm8676_vm11, %vm8677_vm14  ;;  %vm8679_vm9 = vcmp.lt.s32.totalorder %v8523_v42, 8  ;;  %v8681_v14 = vmov 0  ;;  %v1334_v42 = vadd.s32 1, %v8688_v44  ;;  %v6242_v44 = vld [vmem:[%s7670_s4] sm:$0xff]  }
 0x1b3   :  { %8671 = vst [vmem:[#allocation117_spill] sm:$0xff] %v6181_v26  ;;  %3451 = vmatprep.mubr.msk.bf16.mxu0 %vm8678_vm5, %v8675_v13  ;;  %vm6207_vm13 = vmand %vm8680_vm12, %vm8679_vm9  ;;  %v6213_v59 = vpack.c.bf16 %v6175_v45, %v6181_v26  ;;  %vm8689_vm12 = vcmp.lt.s32.totalorder %v8540_v19, 8  ;;  %vm8692_vm14 = vcmp.lt.s32.totalorder %v8541_v53, 8  ;;  %v8695_v13 = vld [vmem:[#allocation79_spill] sm:$0xff]  ;;  %v8699_v53 = vld [vmem:[#allocation69_spill] sm:$0xff]  ;;  %3981 = vmatprep.subr.bf16.mxu0 %v6242_v44  ;;  %v8772_v32 = vmov 0 }
 0x1b4   :  { %v8682_v14 = vsel %vm6207_vm13, 4294967295, %v8681_v14  ;;  %vm6227_vm11 = vmand %vm8658_vm10, %vm8689_vm12  ;;  %vm8701_vm12 = vnez %v8554_v5  ;;  %v8715_v26 = vld [vmem:[#allocation108_spill] sm:$0xff]  ;;  %vm1366_vm10 = vcmp.lt.s32.totalorder %v1334_v42, 8  ;;  %v8783_v7 = vmov 0  ;;  %v8785_v45 = vld [vmem:[#allocation58_spill] sm:$0xff] }
 0x1b5   :  { %8683 = vst [vmem:[#allocation41_spill] sm:$0xff] %v8682_v14  ;;  %8684 = vst [vmem:[#allocation118_spill] sm:$0xff] %v6213_v59  ;;  %v8691_v12 = vsel %vm6227_vm11, 4294967295, %v8690_v12  ;;  %v8717_v14 = vld [vmem:[#allocation33_spill] sm:$0xff]  ;;  %v8791_v5 = vmov 0 }
 0x1b6   :  { %vm6235_vm5 = vmand %vm8662_vm7, %vm8692_vm14  ;;  %vm8708_vm14 = vcmp.ge.s32.totalorder %v8644_v25, 0  ;;  %v8718_v29 = vand.u32 7, %v8717_v14  ;;  %v8733_v14 = vld [vmem:[#allocation12_spill] sm:$0xff] }
 0x1b7   :  { %v8694_v57 = vsel %vm6235_vm5, 4294967295, %v8693_v57  ;;  %vm8703_vm5 = vnez %v8585_v11  ;;  %v6286_v11 = vadd.s32 1, %v8712_v24  ;;  %v8721_v24 = vmov 0  ;;  %vm6350_vm9 = vmand %vm8741_vm4, %vm8740_vm6 }
 0x1b8   :  { %vm6260_vm11 = vmand %vm8703_vm5, %vm8702_vm2  ;;  %v6299_v19 = vadd.s32 1, %v8718_v29  ;;  %v8726_v29 = vld [vmem:[#allocation112_spill] sm:$0xff]  ;;  %vm1350_vm2 = vcmp.ge.s32.totalorder %v1334_v42, 0  ;;  %v8743_v50 = vsel %vm6350_vm9, 4294967295, %v8742_v50  ;;  %v8746_v42 = vmov 0 }
 0x1b9   :  { %v8705_v56 = vsel %vm6260_vm11, 4294967295, %v8704_v56  ;;  %vm6280_vm5 = vmand %vm6207_vm13, %vm8708_vm14  ;;  %vm8720_vm13 = vcmp.ge.s32.totalorder %v8719_v1, 0  ;;  %vm1365_vm11 = vcmp.lt.s32.totalorder %v1333_v40, 8  ;;  %v8728_v1 = vld [vmem:[#allocation36_spill] sm:$0xff]  ;;  %vm8752_vm6 = vnez %v8496_v52 }
 0x1ba   :  { %v8710_v54 = vsel %vm6280_vm5, 4294967295, %v8709_v54  ;;  %vm6305_vm7 = vmand %vm6103_vm0, %vm8720_vm13  ;;  %vm8729_vm5 = vcmp.ge.s32.totalorder %v8728_v1, 0  ;;  %v8736_v1 = vld [vmem:[#allocation107_spill] sm:$0xff]  ;;  %vm8738_vm13 = vnez %v8482_v4  ;;  %v8749_v4 = vmov 0 }
 0x1bb   :  { %v8722_v24 = vsel %vm6305_vm7, 4294967295, %v8721_v24  ;;  %vm8725_vm14 = vmpackc.low %vm8588_vm8, %vm8587_vm3  ;;  %vm8734_vm8 = vnez %v8733_v14  ;;  %v8755_v14 = vmov 0  ;;  %vm8759_vm9 = vcmp.lt.s32.totalorder %v6286_v11, 8 }
 0x1bc   :  { %3406 = vmatmul.mubr.msk.bf16.gmra.mrb[16].mxu1 %vm8725_vm14, %v8723_v0  ;;  %vm6326_vm0 = vmand %vm6145_vm15, %vm8729_vm5  ;;  %vm8737_vm5 = vnez %v8485_v3  ;;  %v8751_v3 = vpack.c.bf16 %v5972_v43, %v5934_v27  ;;  %v8760_v27 = vmov 0  ;;  %v8763_v52 = vmov 0  ;;  %v8765_v43 = vld [vmem:[#allocation45_spill] sm:$0xff] }
 0x1bd   :  { %v8731_v23 = vsel %vm6326_vm0, 4294967295, %v8730_v23  ;;  %vm8735_vm3 = vmpackc.low %vm8552_vm1, %vm8734_vm8  ;;  %vm8744_vm1 = vcmp.ge.s32.totalorder %v8644_v25, 0  ;;  %vm8745_vm8 = vnez %v8642_v30  ;;  %v8781_v25 = vld [vmem:[#allocation37_spill] sm:$0xff]  ;;  %vm8787_vm14 = vnez %v8532_v9 }
 0x1be   :  { %3409 = vmatprep.mubr.msk.bf16.mxu1 %vm8735_vm3, %v8732_v16  ;;  %vm8739_vm15 = vmpackc.low %vm8737_vm5, %vm8738_vm13  ;;  %vm8748_vm13 = vcmp.ge.s32.totalorder %v1333_v40, 0  ;;  %vm8753_vm5 = vnez %v8493_v6  ;;  %v8762_v40 = vld [vmem:[#allocation44_spill] sm:$0xff] }
 0x1bf   :  { %3454 = vmatmul.mubr.msk.bf16.gmra.mrb[32].mxu0 %vm8739_vm15, %v8736_v1  ;;  %vm6358_vm3 = vmand %vm8745_vm8, %vm8744_vm1  ;;  %vm8006_vm1 = vcmp.lt.s32.totalorder %v6299_v19, 8  ;;  %v1335_v6 = vadd.s32 1, %v8762_v40  ;;  %v8768_v40 = vld [vmem:[#allocation15_spill] sm:$0xff] }
 0x1c0   :  { %v8747_v42 = vsel %vm6358_vm3, 4294967295, %v8746_v42  ;;  %vm6364_vm15 = vmand %vm8748_vm13, %vm1365_vm11  ;;  %vm8769_vm11 = vcmp.lt.s32.totalorder %v8768_v40, 8  ;;  %v8770_v1 = vld [vmem:[#allocation35_spill] sm:$0xff] }
 0x1c1   :  { %v8750_v4 = vsel %vm6364_vm15, 4294967295, %v8749_v4  ;;  %vm8754_vm7 = vmpackc.low %vm8752_vm6, %vm8753_vm5  ;;  %vm8771_vm3 = vnez %v8770_v1  ;;  %vm8782_vm6 = vnez %v8781_v25  ;;  %vm1351_vm5 = vcmp.ge.s32.totalorder %v1335_v6, 0 }
 0x1c2   :  { %3457 = vmatprep.mubr.msk.bf16.mxu0 %vm8754_vm7, %v8751_v3  ;;  %vm6377_vm0 = vmand %vm1350_vm2, %vm1366_vm10  ;;  %v1336_v3 = vadd.s32 1, %v8765_v43  ;;  %v8779_v43 = vld [vmem:[#allocation16_spill] sm:$0xff] }
 0x1c3   :  { %v8756_v14 = vsel %vm6377_vm0, 4294967295, %v8755_v14  ;;  %vm6393_vm7 = vmand %vm8741_vm4, %vm8759_vm9  ;;  %vm8780_vm9 = vcmp.lt.s32.totalorder %v8779_v43, 8 }
 0x1c4   :  { %v8761_v27 = vsel %vm6393_vm7, 4294967295, %v8760_v27  ;;  %vm6406_vm2 = vmand %vm8745_vm8, %vm8006_vm1  ;;  %vm8775_vm1 = vnez %v8550_v49  ;;  %v8789_v49 = vld [vmem:[#allocation50_spill] sm:$0xff]  ;;  %vm8794_vm8 = vnez %v8575_v58 }
 0x1c5   :  { %v8764_v52 = vsel %vm6406_vm2, 4294967295, %v8763_v52  ;;  %vm6419_vm10 = vmand %vm8771_vm3, %vm8769_vm11  ;;  %vm8786_vm3 = vnez %v8569_v21  ;;  %v8796_v21 = vld [vmem:[#allocation13_spill] sm:$0xff]  ;;  %v8805_v58 = vld [vmem:[#allocation14_spill] sm:$0xff] }
 0x1c6   :  { %v8773_v32 = vsel %vm6419_vm10, 4294967295, %v8772_v32  ;;  %vm8776_vm4 = vmpackc.low %vm8701_vm12, %vm8775_vm1  ;;  %v1325_v9 = vadd.s32 1, %v8796_v21  ;;  %v8826_v21 = vld [vmem:[#allocation47_spill] sm:$0xff] }
 0x1c7   :  { %3412 = vmatmul.mubr.msk.bf16.gmra.mrb[20].mxu1 %vm8776_vm4, %v8774_v55  ;;  %vm6437_vm11 = vmand %vm8782_vm6, %vm8780_vm9  ;;  %vm8790_vm4 = vcmp.ge.s32.totalorder %v8789_v49, 0  ;;  %vm1367_vm9 = vcmp.lt.s32.totalorder %v1335_v6, 8  ;;  %vm8793_vm6 = vnez %v8715_v26  ;;  %v8799_v49 = vmov 0 }
 0x1c8   :  { %v8784_v7 = vsel %vm6437_vm11, 4294967295, %v8783_v7  ;;  %vm8788_vm12 = vmpackc.low %vm8786_vm3, %vm8787_vm14  ;;  %vm8798_vm14 = vcmp.ge.s32.totalorder %v8797_v2, 0  ;;  %v8801_v6 = vpack.c.bf16 %v6031_v39, %v6035_v20  ;;  %v1326_v26 = vadd.s32 1, %v8805_v58  ;;  %v8815_v39 = vld [vmem:[#allocation21_spill] sm:$0xff]  ;;  %v8851_v58 = vld [vmem:[#allocation55_spill] sm:$0xff] }
 0x1c9   :  { %3415 = vmatprep.mubr.msk.bf16.mxu1 %vm8788_vm12, %v8785_v45  ;;  %vm6451_vm1 = vmand %vm6364_vm15, %vm8790_vm4  ;;  %vm1352_vm12 = vcmp.ge.s32.totalorder %v1336_v3, 0  ;;  %vm1368_vm4 = vcmp.lt.s32.totalorder %v1336_v3, 8  ;;  %vm8802_vm15 = vnez %v8727_v15  ;;  %v8806_v2 = vmov 0  ;;  %v8824_v3 = vld [vmem:[#allocation22_spill] sm:$0xff] }
 0x1ca   :  { %v8792_v5 = vsel %vm6451_vm1, 4294967295, %v8791_v5  ;;  %vm8795_vm13 = vmpackc.low %vm8793_vm6, %vm8794_vm8  ;;  %vm8803_vm8 = vnez %v8726_v29  ;;  %v8810_v20 = vmov 0  ;;  %vm1357_vm6 = vcmp.lt.s32.totalorder %v1325_v9, 8  ;;  %v8817_v29 = vld [vmem:[#allocation43_spill] sm:$0xff] }
 0x1cb   :  { %3460 = vmatmul.mubr.msk.bf16.gmra.mrb[36].mxu0 %vm8795_vm13, %v6054_v63  ;;  %vm6466_vm3 = vmand %vm6377_vm0, %vm8798_vm14  ;;  %vm8818_vm1 = vnez %v8817_v29  ;;  %v8819_v15 = vmov 0  ;;  %vm1358_vm10 = vcmp.lt.s32.totalorder %v1326_v26, 8  ;;  %vm8825_vm2 = vcmp.lt.s32.totalorder %v8824_v3, 8  ;;  %v8881_v63 = vld [vmem:[#allocation17_spill] sm:$0xff] }
 0x1cc   :  { %v8800_v49 = vsel %vm6466_vm3, 4294967295, %v8799_v49  ;;  %vm8804_vm13 = vmpackc.low %vm8802_vm15, %vm8803_vm8  ;;  %vm1342_vm8 = vcmp.ge.s32.totalorder %v1326_v26, 0  ;;  %vm8821_vm15 = vnez %v8664_v46  ;;  %v8834_v46 = vmov 0 }
 0x1cd   :  { %3463 = vmatprep.mubr.msk.bf16.mxu0 %vm8804_vm13, %v8801_v6  ;;  %vm6483_vm14 = vmand %vm1351_vm5, %vm1367_vm9  ;;  %vm1341_vm13 = vcmp.ge.s32.totalorder %v1325_v9, 0  ;;  %vm8822_vm5 = vnez %v8660_v31  ;;  %v8828_v9 = vmov 0  ;;  %v8830_v6 = vld [vmem:[#allocation103_spill] sm:$0xff]  ;;  %v8840_v31 = vmov 0 }
 0x1ce   :  { %v8807_v2 = vsel %vm6483_vm14, 4294967295, %v8806_v2  ;;  %vm6491_vm11 = vmand %vm1352_vm12, %vm1368_vm4  ;;  %vm8816_vm4 = vcmp.lt.s32.totalorder %v8815_v39, 8  ;;  %vm8827_vm12 = vnez %v8826_v21  ;;  %v8863_v26 = vmov 0  ;;  %v8984_v21 = vld [vmem:[#allocation96_spill] sm:$0xff] }
 0x1cf   :  { %v8811_v20 = vsel %vm6491_vm11, 4294967295, %v8810_v20  ;;  %vm6511_vm3 = vmand %vm8818_vm1, %vm8816_vm4  ;;  %vm8831_vm4 = vnez %v8642_v30  ;;  %vm8832_vm1 = vnez %v8638_v62  ;;  %v8843_v62 = vpack.c.bf16 %v8626_v8, %v6007_v48 }
 0x1d0   :  { %v8820_v15 = vsel %vm6511_vm3, 4294967295, %v8819_v15  ;;  %vm8823_vm0 = vmpackc.low %vm8821_vm15, %vm8822_vm5  ;;  %vm8838_vm15 = vnez %v8691_v12  ;;  %v8848_v30 = vmov 0  ;;  %v8850_v12 = vld [vmem:[#allocation19_spill] sm:$0xff]  ;;  %v8853_v48 = vmov 0 }
 0x1d1   :  { %3418 = vmatmul.mubr.msk.bf16.gmra.mrb[24].mxu1 %vm8823_vm0, %v6060_v35  ;;  %vm6525_vm9 = vmand %vm8827_vm12, %vm8825_vm2  ;;  %vm8837_vm0 = vnez %v8694_v57  ;;  %v1327_v57 = vadd.s32 1, %v8850_v12  ;;  %v8869_v12 = vld [vmem:[#allocation26_spill] sm:$0xff] }
 0x1d2   :  { %v8829_v9 = vsel %vm6525_vm9, 4294967295, %v8828_v9  ;;  %vm8833_vm7 = vmpackc.low %vm8831_vm4, %vm8832_vm1  ;;  %vm8845_vm1 = vnez %v8705_v56  ;;  %v8859_v56 = vld [vmem:[#allocation25_spill] sm:$0xff]  ;;  %vm8885_vm9 = vnez %v8764_v52  ;;  %v8898_v52 = vmov 0 }
 0x1d3   :  { %3421 = vmatprep.mubr.msk.bf16.mxu1 %vm8833_vm7, %v8830_v6  ;;  %vm6535_vm3 = vmand %vm1341_vm13, %vm1357_vm6  ;;  %vm8844_vm7 = vnez %v8710_v54  ;;  %vm8847_vm13 = vcmp.ge.s32.totalorder %v8468_v60, 0  ;;  %v8857_v60 = vld [vmem:[#allocation20_spill] sm:$0xff]  ;;  %v8861_v54 = vld [vmem:[#allocation73_spill] sm:$0xff] }
 0x1d4   :  { %v8835_v46 = vsel %vm6535_vm3, 4294967295, %v8834_v46  ;;  %vm8839_vm2 = vmpackc.low %vm8837_vm0, %vm8838_vm15  ;;  %v1328_v8 = vadd.s32 1, %v8857_v60  ;;  %v8873_v60 = vmov 0  ;;  %vm8886_vm15 = vnez %v8761_v27 }
 0x1d5   :  { %8836 = vst [vmem:[#allocation42_spill] sm:$0xff] %v8835_v46  ;;  %3466 = vmatmul.mubr.msk.bf16.gmra.mrb[40].mxu0 %vm8839_vm2, %v6131_v61  ;;  %vm6545_vm5 = vmand %vm1342_vm8, %vm1358_vm10  ;;  %vm8852_vm10 = vcmp.ge.s32.totalorder %v8851_v58, 0  ;;  %vm8866_vm2 = vnez %v8747_v42  ;;  %v8871_v58 = vld [vmem:[#allocation74_spill] sm:$0xff]  ;;  %v8875_v42 = vld [vmem:[#allocation91_spill] sm:$0xff]  ;;  %v8900_v27 = vmov 0 }
 0x1d6   :  { %v8841_v31 = vsel %vm6545_vm5, 4294967295, %v8840_v31  ;;  %vm8846_vm6 = vmpackc.low %vm8844_vm7, %vm8845_vm1  ;;  %v8876_v61 = vld [vmem:[#allocation87_spill] sm:$0xff]  ;;  %vm8882_vm7 = vcmp.ge.s32.totalorder %v8881_v63, 0  ;;  %v8892_v63 = vld [vmem:[#allocation81_spill] sm:$0xff] }
 0x1d7   :  { %8842 = vst [vmem:[#allocation79_spill] sm:$0xff] %v8841_v31  ;;  %3469 = vmatprep.mubr.msk.bf16.mxu0 %vm8846_vm6, %v8843_v62  ;;  %vm6561_vm4 = vmand %vm6483_vm14, %vm8847_vm13  ;;  %vm8860_vm13 = vcmp.lt.s32.totalorder %v8859_v56, 8  ;;  %v8865_v62 = vld [vmem:[#allocation83_spill] sm:$0xff]  ;;  %vm8867_vm14 = vnez %v8743_v50  ;;  %vm8870_vm6 = vcmp.lt.s32.totalorder %v8869_v12, 8  ;;  %v8877_v50 = vpack.c.bf16 %v8875_v42, %v8876_v61  ;;  %v8893_v61 = vld [vmem:[#allocation61_spill] sm:$0xff] }
 0x1d8   :  { %v8849_v30 = vsel %vm6561_vm4, 4294967295, %v8848_v30  ;;  %vm6570_vm8 = vmand %vm6491_vm11, %vm8852_vm10  ;;  %vm8862_vm10 = vnez %v8861_v54  ;;  %vm8872_vm4 = vnez %v8871_v58  ;;  %v8883_v12 = vmov 0  ;;  %v4113_v42 = vld [vmem:[%s7668_s2 + $0x208] sm:$0xff]  }
 0x1d9   :  { %v8854_v48 = vsel %vm6570_vm8, 4294967295, %v8853_v48  ;;  %vm6591_vm11 = vmand %vm8862_vm10, %vm8860_vm13  ;;  %vm1343_vm8 = vcmp.ge.s32.totalorder %v1327_v57, 0  ;;  %vm1359_vm10 = vcmp.lt.s32.totalorder %v1327_v57, 8  ;;  %v8895_v57 = vld [vmem:[#allocation56_spill] sm:$0xff]  ;;  %v9031_v56 = vld [vmem:[#allocation98_spill] sm:$0xff] }
 0x1da   :  { %v8864_v26 = vsel %vm6591_vm11, 4294967295, %v8863_v26  ;;  %vm8868_vm0 = vmpackc.low %vm8866_vm2, %vm8867_vm14  ;;  %vm8878_vm14 = vnez %v8784_v7  ;;  %v8890_v7 = vmov 0 }
 0x1db   :  { %3424 = vmatmul.mubr.msk.bf16.gmra.mrb[28].mxu1 %vm8868_vm0, %v8865_v62  ;;  %vm6609_vm13 = vmand %vm8872_vm4, %vm8870_vm6  ;;  %vm8879_vm0 = vnez %v8773_v32  ;;  %vm1344_vm6 = vcmp.ge.s32.totalorder %v1328_v8, 0  ;;  %vm1360_vm4 = vcmp.lt.s32.totalorder %v1328_v8, 8  ;;  %v8888_v32 = vld [vmem:[#allocation18_spill] sm:$0xff]  ;;  %v8904_v8 = vmov 0 }
 0x1dc   :  { %v8874_v60 = vsel %vm6609_vm13, 4294967295, %v8873_v60  ;;  %vm8880_vm2 = vmpackc.low %vm8878_vm14, %vm8879_vm0  ;;  %vm8889_vm14 = vcmp.ge.s32.totalorder %v8888_v32, 0  ;;  %v8914_v32 = vld [vmem:[#allocation75_spill] sm:$0xff] }
 0x1dd   :  { %3475 = vmatprep.mubr.msk.bf16.mxu1 %vm8880_vm2, %v8877_v50  ;;  %vm6625_vm1 = vmand %vm6535_vm3, %vm8882_vm7  ;;  %vm8894_vm7 = vnez %v8893_v61  ;;  %vm8896_vm2 = vnez %v8895_v57  ;;  %v8913_v50 = vld [vmem:[#allocation49_spill] sm:$0xff]  ;;  %v4124_v57 = vld [vmem:[%s7668_s2 + $0x238] sm:$0xff]  }
 0x1de   :  { %v8884_v12 = vsel %vm6625_vm1, 4294967295, %v8883_v12  ;;  %vm8887_vm13 = vmpackc.low %vm8885_vm9, %vm8886_vm15  ;;  %vm8902_vm15 = vnez %v8817_v29  ;;  %v8921_v61 = vld [vmem:[#allocation85_spill] sm:$0xff] }
 0x1df   :  { %3472 = vmatmul.mubr.msk.bf16.gmra.mrb[44].mxu0 %vm8887_vm13, %v6213_v59  ;;  %vm6639_vm0 = vmand %vm6545_vm5, %vm8889_vm14  ;;  %vm8903_vm14 = vcmp.lt.s32.totalorder %v8768_v40, 8  ;;  %v8909_v40 = vmov 0  ;;  %v8934_v59 = vld [vmem:[#allocation88_spill] sm:$0xff] }
 0x1e0   :  { %v8891_v7 = vsel %vm6639_vm0, 4294967295, %v8890_v7  ;;  %vm8897_vm3 = vmpackc.low %vm8894_vm7, %vm8896_vm2 }
 0x1e1   :  { %3523 = vmatprep.mubr.msk.bf16.mxu0 %vm8897_vm3, %v8892_v63  ;;  %vm6649_vm1 = vmand %vm1343_vm8, %vm1359_vm10  ;;  %vm8907_vm3 = vnez %v8874_v60  ;;  %vm8908_vm8 = vcmp.lt.s32.totalorder %v8779_v43, 8  ;;  %v8915_v63 = vpack.c.bf16 %v8913_v50, %v8914_v32  ;;  %v8919_v43 = vld [vmem:[#allocation31_spill] sm:$0xff]  ;;  %v8993_v60 = vld [vmem:[#allocation52_spill] sm:$0xff] }
 0x1e2   :  { %v8899_v52 = vsel %vm6649_vm1, 4294967295, %v8898_v52  ;;  %vm6653_vm9 = vmand %vm1344_vm6, %vm1360_vm4  ;;  %vm8916_vm4 = vnez %v8781_v25  ;;  %vm8922_vm6 = vnez %v8921_v61  ;;  %v6715_v25 = vld [vmem:[%s7670_s4 + $0x8] sm:$0xff]   ;;  %v8927_v50 = vld [vmem:[#allocation7_spill] sm:$0xff] }
 0x1e3   :  { %v8901_v27 = vsel %vm6653_vm9, 4294967295, %v8900_v27  ;;  %vm6665_vm5 = vmand %vm8896_vm2, %vm8903_vm14  ;;  %vm8920_vm2 = vcmp.lt.s32.totalorder %v8919_v43, 8  ;;  %8925 = vst [vmem:[#allocation8_spill] sm:$0xff] %v6715_v25  ;;  %vm8935_vm14 = vnez %v8934_v59 }
 0x1e4   :  { %v8905_v8 = vsel %vm6665_vm5, 4294967295, %v8904_v8  ;;  %vm6680_vm10 = vmand %vm8894_vm7, %vm8908_vm8  ;;  %vm8917_vm7 = vnez %v8770_v1  ;;  %v8926_v1 = vld [vmem:[#allocation93_spill] sm:$0xff] }
 0x1e5   :  { %8906 = vst [vmem:[#allocation29_spill] sm:$0xff] %v8905_v8  ;;  %v8910_v40 = vsel %vm6680_vm10, 4294967295, %v8909_v40  ;;  %vm8918_vm8 = vmpackc.low %vm8916_vm4, %vm8917_vm7  ;;  %v8928_v32 = vpack.c.bf16 %v8926_v1, %v8927_v50  ;;  %vm8929_vm4 = vnez %v8829_v9  ;;  %vm8930_vm7 = vnez %v8820_v15  ;;  %v8938_v8 = vld [vmem:[#allocation90_spill] sm:$0xff]  ;;  %v4114_v15 = vld [vmem:[%s7668_s2 + $0x210] sm:$0xff]  }
 0x1e6   :  { %8911 = vst [vmem:[#allocation67_spill] sm:$0xff] %v8910_v40  ;;  %3478 = vmatmul.mubr.msk.bf16.vlgmr.msra.gmra.mrb[32].mxu1 %vm8918_vm8, %v8915_v63  ;;  %vm6708_vm0 = vmand %vm8922_vm6, %vm8920_vm2  ;;  %v8932_v63 = vld [vmem:[#allocation32_spill] sm:$0xff]  ;;  %v8944_v9 = vld [vmem:[#allocation23_spill] sm:$0xff] }
 0x1e7   :  { %3950 = vmatpush3.bf16.msra.mxu1 %v6186_v47  ;;  %vm8931_vm8 = vmpackc.low %vm8929_vm4, %vm8930_vm7  ;;  %vm8933_vm2 = vcmp.lt.s32.totalorder %v8932_v63, 8  ;;  %v8939_v40 = vld [vmem:[#allocation72_spill] sm:$0xff]  ;;  %v8941_v47 = vld [vmem:[#allocation71_spill] sm:$0xff]  ;;  %vm8945_vm4 = vcmp.ge.s32.totalorder %v8944_v9, 0  ;;  %v8959_v9 = vmov 0 }
 0x1e8   :  { %3481 = vmatprep.mubr.msk.bf16.mxu1 %vm8931_vm8, %v8928_v32  ;;  %vm6730_vm13 = vmand %vm8935_vm14, %vm8933_vm2  ;;  %vm8940_vm5 = vnez %v8939_v40  ;;  %vm8942_vm10 = vnez %v8941_v47  ;;  %3951 = vmatprep.subr.bf16.mxu1 %v4113_v42  ;;  %v8948_v50 = vld [vmem:[#allocation84_spill] sm:$0xff]  ;;  %vm8949_vm8 = vnez %v8841_v31  ;;  %vm8950_vm2 = vnez %v8835_v46  ;;  %v6770_v32 = vld [vmem:[%s7670_s4 + $0x10] sm:$0xff]  }
 0x1e9   :  { %vm8943_vm6 = vmpackc.low %vm8940_vm5, %vm8942_vm10  ;;  %v8957_v47 = vld [vmem:[#allocation62_spill] sm:$0xff]  ;;  %v8982_v46 = vmov 0  ;;  %v9042_v1 = vld [vmem:[#allocation105_spill] sm:$0xff] }
 0x1ea   :  { %3526 = vmatmul.mubr.msk.bf16.vlgmr.msra.gmra.mrb[48].mxu0 %vm8943_vm6, %v8938_v8  ;;  %vm6747_vm7 = vmand %vm6649_vm1, %vm8945_vm4  ;;  %v8952_v8 = vld [vmem:[#allocation24_spill] sm:$0xff]  ;;  %vm8956_vm4 = vcmp.lt.s32.totalorder %v8919_v43, 8  ;;  %vm8964_vm1 = vcmp.lt.s32.totalorder %v8932_v63, 8  ;;  %v8970_v43 = vld [vmem:[#allocation39_spill] sm:$0xff]  ;;  %v8973_v63 = vmov 0 }
 0x1eb   :  { %vm8951_vm5 = vmpackc.low %vm8949_vm8, %vm8950_vm2  ;;  %3982 = vmatpush3.bf16.msra.mxu0 %v6242_v44  ;;  %vm8953_vm10 = vcmp.ge.s32.totalorder %v8952_v8, 0  ;;  %3952 = vmatpush3.bf16.msra.mxu1 %v4113_v42  ;;  %vm8963_vm2 = vnez %v8871_v58  ;;  %v8967_v8 = vmov 0  ;;  %v4116_v42 = vld [vmem:[%s7668_s2 + $0x218] sm:$0xff]   ;;  %v8975_v31 = vld [vmem:[#allocation78_spill] sm:$0xff] }
 0x1ec   :  { %3529 = vmatprep.mubr.msk.bf16.mxu0 %vm8951_vm5, %v8948_v50  ;;  %vm6762_vm6 = vmand %vm6653_vm9, %vm8953_vm10  ;;  %3983 = vmatprep.subr.bf16.mxu0 %v6715_v25  ;;  %vm8958_vm5 = vnez %v8957_v47  ;;  %vm8962_vm10 = vnez %v8861_v54  ;;  %v8965_v50 = vld [vmem:[#allocation68_spill] sm:$0xff]  ;;  %v9036_v54 = vld [vmem:[#allocation11_spill] sm:$0xff] }
 0x1ed   :  { %vm6776_vm8 = vmand %vm8958_vm5, %vm8956_vm4  ;;  %vm8966_vm9 = vnez %v8965_v50  ;;  %3953 = vmatprep.subr.bf16.mxu1 %v4114_v15  ;;  %vm8971_vm5 = vcmp.lt.s32.totalorder %v8970_v43, 8  ;;  %vm8972_vm4 = vnez %v8631_v51  ;;  %v6970_v58 = vld [vmem:[%s7670_s4 + $0x30] sm:$0xff]  }
 0x1ee   :  { %v8960_v9 = vsel %vm6776_vm8, 4294967295, %v8959_v9  ;;  %vm6788_vm11 = vmand %vm8966_vm9, %vm8964_vm1  ;;  %vm8981_vm1 = vnez %v8652_v36  ;;  %v9057_v36 = vpack.c.bf16 %v5711_v10, %v8706_v41  ;;  %v9069_v41 = vld [vmem:[#allocation106_spill] sm:$0xff] }
 0x1ef   :  { %8961 = vst [vmem:[#allocation69_spill] sm:$0xff] %v8960_v9  ;;  %v8968_v8 = vsel %vm6788_vm11, 4294967295, %v8967_v8  ;;  %3984 = vmatpush3.bf16.msra.mxu0 %v6715_v25  ;;  %vm6812_vm9 = vmand %vm8972_vm4, %vm8971_vm5  ;;  %v8976_v9 = vld [vmem:[#allocation38_spill] sm:$0xff]  ;;  %v8979_v25 = vld [vmem:[#allocation40_spill] sm:$0xff]  ;;  %3954 = vmatpush3.bf16.msra.mxu1 %v4114_v15  ;;  %vm8991_vm11 = vnez %v8884_v12  ;;  %v8996_v15 = vmov 0 }
 0x1f0   :  { %8969 = vst [vmem:[#allocation66_spill] sm:$0xff] %v8968_v8  ;;  %v8974_v63 = vsel %vm6812_vm9, 4294967295, %v8973_v63  ;;  %v8977_v3 = vpack.c.bf16 %v8975_v31, %v8976_v9  ;;  %vm8978_vm14 = vmpackc.low %vm8827_vm12, %vm8902_vm15  ;;  %3985 = vmatprep.subr.bf16.mxu0 %v6770_v32  ;;  %v6828_v8 = vld [vmem:[%s7670_s4 + $0x18] sm:$0xff]   ;;  %vm8980_vm5 = vcmp.lt.s32.totalorder %v8979_v25, 8  ;;  %v8985_v31 = vld [vmem:[#allocation70_spill] sm:$0xff]  ;;  %vm8987_vm12 = vnez %v8864_v26  ;;  %3955 = vmatprep.subr.bf16.mxu1 %v4116_v42 }
 0x1f1   :  { %vm6834_vm8 = vmand %vm8981_vm1, %vm8980_vm5  ;;  %v8986_v29 = vpack.c.bf16 %v8984_v21, %v8985_v31  ;;  %vm8990_vm5 = vnez %v8891_v7  ;;  %v4118_v26 = vld [vmem:[%s7668_s2 + $0x220] sm:$0xff]   ;;  %v8999_v9 = vld [vmem:[#allocation10_spill] sm:$0xff]  ;;  %vm9001_vm9 = vnez %v8899_v52  ;;  %v9006_v7 = vmov 0 }
 0x1f2   :  { %3484 = vmatmul.mubr.msk.bf16.gmra.mrb[36].mxu1 %vm8978_vm14, %v8977_v3  ;;  %v8983_v46 = vsel %vm6834_vm8, 4294967295, %v8982_v46  ;;  %vm8988_vm15 = vmpackc.low %vm8907_vm3, %vm8987_vm12  ;;  %v8989_v3 = vld [vmem:[#allocation92_spill] sm:$0xff]  ;;  %vm8994_vm3 = vcmp.lt.s32.totalorder %v8993_v60, 8  ;;  %vm8995_vm12 = vnez %v8750_v4  ;;  %vm9000_vm14 = vnez %v8901_v27  ;;  %v9003_v12 = vld [vmem:[#allocation53_spill] sm:$0xff] }
 0x1f3   :  { %3487 = vmatprep.mubr.msk.bf16.mxu1 %vm8988_vm15, %v8986_v29  ;;  %vm8992_vm4 = vmpackc.low %vm8990_vm5, %vm8991_vm11  ;;  %3986 = vmatpush3.bf16.msra.mxu0 %v6770_v32  ;;  %vm9005_vm5 = vnez %v8756_v14  ;;  %v6886_v21 = vld [vmem:[%s7670_s4 + $0x20] sm:$0xff]   ;;  %v9009_v31 = vld [vmem:[#allocation59_spill] sm:$0xff]  ;;  %v9012_v29 = vmov 0 }
 0x1f4   :  { %3532 = vmatmul.mubr.msk.bf16.gmra.mrb[52].mxu0 %vm8992_vm4, %v8989_v3  ;;  %vm6863_vm15 = vmand %vm8995_vm12, %vm8994_vm3  ;;  %vm9004_vm4 = vcmp.lt.s32.totalorder %v9003_v12, 8  ;;  %3987 = vmatprep.subr.bf16.mxu0 %v6828_v8  ;;  %v4120_v3 = vld [vmem:[%s7668_s2 + $0x228] sm:$0xff]   ;;  %vm9017_vm12 = vnez %v8811_v20  ;;  %v9093_v20 = vpack.c.bf16 %v5086_v34, %v5837_v17  ;;  %v9101_v34 = vld [vmem:[#allocation64_spill] sm:$0xff] }
 0x1f5   :  { %v8997_v15 = vsel %vm6863_vm15, 4294967295, %v8996_v15  ;;  %vm9002_vm11 = vmpackc.low %vm9000_vm14, %vm9001_vm9  ;;  %3956 = vmatpush3.bf16.msra.mxu1 %v4116_v42  ;;  %v9020_v42 = vpack.c.bf16 %v8696_v22, %v8695_v13  ;;  %v9024_v22 = vld [vmem:[#allocation97_spill] sm:$0xff]  ;;  %v9071_v10 = vld [vmem:[#allocation46_spill] sm:$0xff] }
 0x1f6   :  { %8998 = vst [vmem:[#allocation30_spill] sm:$0xff] %v8997_v15  ;;  %3535 = vmatprep.mubr.msk.bf16.mxu0 %vm9002_vm11, %v8999_v9  ;;  %vm6878_vm8 = vmand %vm9005_vm5, %vm9004_vm4  ;;  %vm9010_vm11 = vcmp.lt.s32.totalorder %v9009_v31, 8  ;;  %vm9011_vm4 = vnez %v8807_v2  ;;  %3957 = vmatprep.subr.bf16.mxu1 %v4118_v26  ;;  %v9015_v9 = vld [vmem:[#allocation60_spill] sm:$0xff]  ;;  %v9018_v15 = vmov 0  ;;  %v9027_v13 = vld [vmem:[#allocation9_spill] sm:$0xff] }
 0x1f7   :  { %v9007_v7 = vsel %vm6878_vm8, 4294967295, %v9006_v7  ;;  %vm6896_vm14 = vmand %vm9011_vm4, %vm9010_vm11  ;;  %vm9016_vm9 = vcmp.lt.s32.totalorder %v9015_v9, 8  ;;  %3988 = vmatpush3.bf16.msra.mxu0 %v6828_v8  ;;  %v9094_v2 = vld [vmem:[#allocation82_spill] sm:$0xff]  ;;  %v9103_v17 = vld [vmem:[#allocation65_spill] sm:$0xff] }
 0x1f8   :  { %9008 = vst [vmem:[#allocation108_spill] sm:$0xff] %v9007_v7  ;;  %v9013_v29 = vsel %vm6896_vm14, 4294967295, %v9012_v29  ;;  %vm6907_vm5 = vmand %vm9017_vm12, %vm9016_vm9  ;;  %3989 = vmatprep.subr.bf16.mxu0 %v6886_v21  ;;  %v6928_v7 = vld [vmem:[%s7670_s4 + $0x28] sm:$0xff]   ;;  %vm9039_vm14 = vnez %v8934_v59  ;;  %v6989_v59 = vld [vmem:[%s7670_s4 + $0x38] sm:$0xff]  }
 0x1f9   :  { %9014 = vst [vmem:[#allocation33_spill] sm:$0xff] %v9013_v29  ;;  %v9019_v15 = vsel %vm6907_vm5, 4294967295, %v9018_v15  ;;  %vm9021_vm3 = vmpackc.low %vm8963_vm2, %vm8962_vm10  ;;  %v9022_v29 = vpack.c.bf16 %v5811_v33, %v8697_v28  ;;  %3958 = vmatpush3.bf16.msra.mxu1 %v4118_v26  ;;  %vm9026_vm10 = vcmp.lt.s32.totalorder %v8970_v43, 8  ;;  %v4122_v28 = vld [vmem:[%s7668_s2 + $0x230] sm:$0xff]   ;;  %vm9054_vm5 = vcmp.lt.s32.totalorder %v9003_v12, 8  ;;  %v9083_v43 = vld [vmem:[#allocation109_spill] sm:$0xff] }
 0x1fa   :  { %3490 = vmatmul.mubr.msk.bf16.gmra.mrb[40].mxu1 %vm9021_vm3, %v9020_v42  ;;  %vm9023_vm9 = vmpackc.low %vm6730_vm13, %vm6708_vm0  ;;  %vm9028_vm3 = vnez %v9027_v13  ;;  %3959 = vmatprep.subr.bf16.mxu1 %v4120_v3  ;;  %vm9032_vm0 = vnez %v8965_v50  ;;  %vm9033_vm13 = vnez %v8957_v47  ;;  %v9044_v47 = vld [vmem:[#allocation28_spill] sm:$0xff]  ;;  %v9046_v50 = vld [vmem:[#allocation27_spill] sm:$0xff] }
 0x1fb   :  { %3493 = vmatprep.mubr.msk.bf16.mxu1 %vm9023_vm9, %v9022_v29  ;;  %vm9025_vm2 = vmpackc.low %vm6762_vm6, %vm6747_vm7  ;;  %vm9035_vm6 = vcmp.lt.s32.totalorder %v8979_v25, 8  ;;  %vm9037_vm9 = vnez %v9036_v54  ;;  %3990 = vmatpush3.bf16.msra.mxu0 %v6886_v21  ;;  %v9040_v25 = vpack.c.bf16 %v8699_v53, %v8698_v18  ;;  %v9050_v53 = vld [vmem:[#allocation57_spill] sm:$0xff]  ;;  %v9055_v18 = vld [vmem:[#allocation95_spill] sm:$0xff] }
 0x1fc   :  { %3538 = vmatmul.mubr.msk.bf16.gmra.mrb[56].mxu0 %vm9025_vm2, %v9024_v22  ;;  %vm6948_vm11 = vmand %vm9028_vm3, %vm9026_vm10  ;;  %3991 = vmatprep.subr.bf16.mxu0 %v6928_v7  ;;  %vm9038_vm10 = vnez %v8921_v61  ;;  %v9041_v61 = vld [vmem:[#allocation111_spill] sm:$0xff]  ;;  %vm9056_vm15 = vnez %v9055_v18  ;;  %v9109_v12 = vld [vmem:[#allocation77_spill] sm:$0xff] }
 0x1fd   :  { %vm9034_vm7 = vmpackc.low %vm9032_vm0, %vm9033_vm13  ;;  %3960 = vmatpush3.bf16.msra.mxu1 %v4120_v3  ;;  %v9043_v40 = vpack.c.bf16 %v9041_v61, %v9042_v1  ;;  %v9111_v29 = vld [vmem:[#allocation22_spill] sm:$0xff]  ;;  %v9113_v3 = vld [vmem:[#allocation79_spill] sm:$0xff] }
 0x1fe   :  { %3541 = vmatprep.mubr.msk.bf16.mxu0 %vm9034_vm7, %v9031_v56  ;;  %vm1260_vm2 = vmand %vm9037_vm9, %vm9035_vm6  ;;  %3961 = vmatprep.subr.bf16.mxu1 %v4122_v28  ;;  %vm9049_vm6 = vcmp.lt.s32.totalorder %v8993_v60, 8  ;;  %v9100_v60 = vld [vmem:[#allocation80_spill] sm:$0xff]  ;;  %v9116_v42 = vld [vmem:[#allocation67_spill] sm:$0xff] }
 0x1ff   :  { %vm3494_vm0 = vmpackc.low %vm9039_vm14, %vm9038_vm10  ;;  %3992 = vmatpush3.bf16.msra.mxu0 %v6928_v7  ;;  %vm9045_vm14 = vnez %v9044_v47  ;;  %v9118_v22 = vld [vmem:[#allocation29_spill] sm:$0xff]  ;;  %v9125_v33 = vld [vmem:[#allocation26_spill] sm:$0xff] }
 0x200   :  { %vm3497_vm13 = vmpackc.low %vm1260_vm2, %vm6948_vm11  ;;  %3993 = vmatprep.subr.bf16.mxu0 %v6970_v58  ;;  %vm9047_vm11 = vnez %v9046_v50  ;;  %vm9051_vm2 = vnez %v9050_v53  ;;  %v9122_v13 = vld [vmem:[#allocation25_spill] sm:$0xff]  ;;  %v4130_v56 = vld [vmem:[%s7669_s3 + $0x10] sm:$0xff]  }
 0x201   :  { %3962 = vmatpush3.bf16.msra.mxu1 %v4122_v28  ;;  %vm9048_vm7 = vmpackc.low %vm9045_vm14, %vm9047_vm11  ;;  %v4129_v28 = vld [vmem:[%s7669_s3 + $0x8] sm:$0xff]   ;;  %v9134_v1 = vld [vmem:[#allocation69_spill] sm:$0xff] }
 0x202   :  { %3496 = vmatmul.mubr.msk.bf16.gmra.mrb[44].mxu1 %vm3494_vm0, %v9040_v25  ;;  %vm1261_vm10 = vmand %vm9051_vm2, %vm9049_vm6  ;;  %3963 = vmatprep.subr.bf16.mxu1 %v4124_v57  ;;  %vm9052_vm0 = vnez %v8631_v51  ;;  %v9063_v51 = vld [vmem:[#allocation102_spill] sm:$0xff]  ;;  %vm9065_vm6 = vnez %v8756_v14  ;;  %v9131_v25 = vld [vmem:[#allocation107_spill] sm:$0xff] }
 0x203   :  { %3499 = vmatprep.mubr.msk.bf16.mxu1 %vm3497_vm13, %v9043_v40  ;;  %vm9053_vm13 = vmpackc.low %vm8981_vm1, %vm9052_vm0  ;;  %3994 = vmatpush3.bf16.msra.mxu0 %v6970_v58  ;;  %vm9059_vm1 = vnez %v8731_v23  ;;  %v9072_v23 = vld [vmem:[#allocation48_spill] sm:$0xff]  ;;  %v9128_v54 = vld [vmem:[#allocation54_spill] sm:$0xff] }
 0x204   :  { %3544 = vmatmul.mubr.msk.bf16.gmra.mrb[60].mxu0 %vm9048_vm7, %v8723_v0  ;;  %vm1262_vm8 = vmand %vm9056_vm15, %vm9054_vm5  ;;  %3995 = vmatprep.subr.bf16.mxu0 %v6989_v59  ;;  %v9058_v0 = vpack.c.bf16 %v6087_v37, %v6025_v38  ;;  %vm9060_vm5 = vnez %v8722_v24  ;;  %v1337_v38 = vadd.s32 1, %v9071_v10  ;;  %v1338_v37 = vadd.s32 1, %v9072_v23  ;;  %v9074_v24 = vld [vmem:[#allocation100_spill] sm:$0xff]  ;;  %v9132_v61 = vld [vmem:[#allocation66_spill] sm:$0xff] }
 0x205   :  { %3547 = vmatprep.mubr.msk.bf16.mxu0 %vm9053_vm13, %v8732_v16  ;;  %vm3500_vm14 = vmpackc.low %vm9037_vm9, %vm9028_vm3  ;;  %3964 = vmatpush3.bf16.msra.mxu1 %v4124_v57  ;;  %vm9064_vm9 = vnez %v9063_v51  ;;  %vm9068_vm13 = vcmp.lt.s32.totalorder %v9015_v9, 8  ;;  %v9115_v9 = vld [vmem:[#allocation5_spill] sm:$0xff]  ;;  %v9130_v57 = vld [vmem:[#allocation8_spill] sm:$0xff] }
 0x206   :  { %vm3503_vm11 = vmpackc.low %vm1262_vm8, %vm1261_vm10  ;;  %4013 = vmatprep.subr.bf16.mxu1 %v6242_v44  ;;  %vm9062_vm8 = vcmp.lt.s32.totalorder %v9009_v31, 8  ;;  %vm9066_vm10 = vnez %v8750_v4  ;;  %v9077_v4 = vld [vmem:[#allocation115_spill] sm:$0xff]  ;;  %v9141_v40 = vld [vmem:[#allocation116_spill] sm:$0xff] }
 0x207   :  { %3996 = vmatpush3.bf16.msra.mxu0 %v6989_v59  ;;  %vm9061_vm3 = vmpackc.low %vm9059_vm1, %vm9060_vm5  ;;  %v9142_v47 = vld [vmem:[#allocation108_spill] sm:$0xff]  ;;  %v9144_v50 = vld [vmem:[#allocation30_spill] sm:$0xff] }
 0x208   :  { %vm1263_vm7 = vmand %vm9064_vm9, %vm9062_vm8  ;;  %vm1353_vm8 = vcmp.ge.s32.totalorder %v1337_v38, 0 }
 0x209   :  { %vm9067_vm0 = vmpackc.low %vm9065_vm6, %vm9066_vm10  ;;  %vm9082_vm10 = vcmp.lt.s32.totalorder %v6286_v11, 8 }
 0x20a   :  { %3502 = vmatmul.mubr.msk.bf16.gmra.mrb[48].mxu1 %vm3500_vm14, %v9057_v36  ;;  %vm9070_vm14 = vnez %v9069_v41  ;;  %vm3506_vm1 = vmpackc.low %vm9056_vm15, %vm9051_vm2  ;;  %vm1369_vm15 = vcmp.lt.s32.totalorder %v1337_v38, 8  ;;  %vm9079_vm2 = vnez %v8800_v49  ;;  %v9087_v49 = vld [vmem:[#allocation41_spill] sm:$0xff] }
 0x20b   :  { %3505 = vmatprep.mubr.msk.bf16.mxu1 %vm3503_vm11, %v9058_v0  ;;  %vm1264_vm11 = vmand %vm9070_vm14, %vm9068_vm13 }
 0x20c   :  { %3550 = vmatmul.mubr.msk.bf16.gmra.mrb[64].mxu0 %vm9061_vm3, %v8774_v55  ;;  %vm3509_vm5 = vmpackc.low %vm1264_vm11, %vm1263_vm7  ;;  %v9073_v55 = vld [vmem:[#allocation101_spill] sm:$0xff]  ;;  %vm9080_vm7 = vnez %v8792_v5  ;;  %vm1354_vm11 = vcmp.ge.s32.totalorder %v1338_v37, 0 }
 0x20d   :  { %3553 = vmatprep.mubr.msk.bf16.mxu0 %vm9067_vm0, %v8785_v45  ;;  %v9075_v16 = vpack.c.bf16 %v9073_v55, %v9074_v24  ;;  %v9076_v45 = vld [vmem:[#allocation117_spill] sm:$0xff]  ;;  %vm3512_vm3 = vmpackc.low %vm9070_vm14, %vm9064_vm9  ;;  %vm9084_vm0 = vnez %v9083_v43  ;;  %vm9086_vm14 = vcmp.lt.s32.totalorder %v6299_v19, 8 }
 0x20e   :  { %v9078_v14 = vpack.c.bf16 %v9076_v45, %v9077_v4  ;;  %vm9081_vm6 = vmpackc.low %vm9079_vm2, %vm9080_vm7 }
 0x20f   :  { %vm1265_vm13 = vmand %vm9084_vm0, %vm9082_vm10 }
 0x210   :  { %vm9085_vm9 = vmpackc.low %vm9017_vm12, %vm9011_vm4  ;;  %vm9097_vm4 = vnez %v8854_v48  ;;  %v9106_v48 = vld [vmem:[#allocation42_spill] sm:$0xff] }
 0x211   :  { %vm7084_vm7 = vmand %vm1353_vm8, %vm1369_vm15  ;;  %vm9098_vm8 = vnez %v8849_v30  ;;  %v4128_v30 = vld [vmem:[%s7669_s3] sm:$0xff]  }
 0x212   :  { %3508 = vmatmul.mubr.msk.bf16.gmra.mrb[52].mxu1 %vm3506_vm1, %v9075_v16  ;;  %vm1370_vm1 = vcmp.lt.s32.totalorder %v1338_v37, 8  ;;  %vm9099_vm15 = vmpackc.low %vm9097_vm4, %vm9098_vm8  ;;  %vm9112_vm4 = vcmp.lt.s32.totalorder %v9111_v29, 8  ;;  %vm9114_vm8 = vnez %v9113_v3 }
 0x213   :  { %3511 = vmatprep.mubr.msk.bf16.mxu1 %vm3509_vm5, %v9078_v14  ;;  %vm9088_vm5 = vnez %v9087_v49 }
 0x214   :  { %3556 = vmatmul.mubr.msk.bf16.gmra.mrb[68].mxu0 %vm9081_vm6, %v6060_v35  ;;  %vm1266_vm2 = vmand %vm9088_vm5, %vm9086_vm14 }
 0x215   :  { %3559 = vmatprep.mubr.msk.bf16.mxu0 %vm9085_vm9, %v8830_v6  ;;  %vm7088_vm6 = vmand %vm1354_vm11, %vm1370_vm1  ;;  %v9095_v6 = vld [vmem:[#allocation6_spill] sm:$0xff]  ;;  %vm9104_vm11 = vcmp.ge.s32.totalorder %v9103_v17, 0 }
 0x216   :  { %vm3515_vm10 = vmpackc.low %vm1266_vm2, %vm1265_vm13  ;;  %v9096_v26 = vpack.c.bf16 %v9094_v2, %v9095_v6  ;;  %vm9105_vm2 = vcmp.lt.s32.totalorder %v8815_v39, 8  ;;  %v9121_v39 = vld [vmem:[#allocation86_spill] sm:$0xff] }
 0x217   :  { %vm3563_vm12 = vmpackc.low %vm7088_vm6, %vm7084_vm7 }
 0x218   :  { %vm1402_vm1 = vmand %vm7088_vm6, %vm9104_vm11  ;;  %vm9124_vm11 = vnez %v8899_v52  ;;  %v9129_v52 = vld [vmem:[#allocation63_spill] sm:$0xff] }
 0x219   :  { %vm3518_vm9 = vmpackc.low %vm9088_vm5, %vm9084_vm0  ;;  %vm9117_vm0 = vnez %v9116_v42  ;;  %vm9119_vm5 = vnez %v9118_v22 }
 0x21a   :  { %3514 = vmatmul.mubr.msk.bf16.gmra.mrb[56].mxu1 %vm3512_vm3, %v9093_v20  ;;  %vm9102_vm3 = vcmp.ge.s32.totalorder %v9101_v34, 0 }
 0x21b   :  { %3517 = vmatprep.mubr.msk.bf16.mxu1 %vm3515_vm10, %v9096_v26  ;;  %vm1401_vm13 = vmand %vm7084_vm7, %vm9102_vm3  ;;  %vm9107_vm10 = vnez %v9106_v48 }
 0x21c   :  { %3562 = vmatmul.mubr.msk.bf16.gmra.mrb[72].mxu0 %vm9099_vm15, %v8865_v62  ;;  %vm3566_vm14 = vmpackc.low %vm1402_vm1, %vm1401_vm13  ;;  %v9108_v62 = vld [vmem:[#allocation76_spill] sm:$0xff]  ;;  %vm9123_vm13 = vcmp.lt.s32.totalorder %v9122_v13, 8 }
 0x21d   :  { %3565 = vmatprep.mubr.msk.bf16.mxu0 %vm3563_vm12, %v9100_v60  ;;  %vm1581_vm12 = vmand %vm9107_vm10, %vm9105_vm2  ;;  %v9110_v31 = vpack.c.bf16 %v9108_v62, %v9109_v12  ;;  %vm9127_vm2 = vnez %v8901_v27  ;;  %v4131_v27 = vld [vmem:[%s7669_s3 + $0x18] sm:$0xff]  }
 0x21e   :  { %vm1582_vm15 = vmand %vm9114_vm8, %vm9112_vm4 }
 0x21f   :  { %vm9120_vm3 = vmpackc.low %vm9117_vm0, %vm9119_vm5  ;;  %vm9138_vm0 = vnez %v8983_v46  ;;  %vm9139_vm5 = vnez %v8974_v63  ;;  %v9147_v46 = vld [vmem:[#allocation118_spill] sm:$0xff]  ;;  %v4134_v63 = vld [vmem:[%s7669_s3 + $0x30] sm:$0xff]  }
 0x220   :  { %vm1583_vm1 = vmand %vm9124_vm11, %vm9123_vm13  ;;  %vm9143_vm13 = vnez %v9142_v47  ;;  %vm9145_vm11 = vnez %v9144_v50 }
 0x221   :  { %vm3572_vm4 = vmpackc.low %vm1582_vm15, %vm1581_vm12  ;;  %vm9135_vm12 = vnez %v9134_v1 }
 0x222   :  { %3520 = vmatmul.mubr.msk.bf16.gmra.mrb[60].mxu1 %vm3518_vm9, %v9110_v31  ;;  %vm9126_vm9 = vcmp.lt.s32.totalorder %v9125_v33, 8 }
 0x223   :  { %3965 = vmatprep.mubr.msk.bf16.mxu1 %vm9120_vm3, %v9115_v9  ;;  %vm1584_vm10 = vmand %vm9127_vm2, %vm9126_vm9  ;;  %vm9148_vm9 = vnez %v9019_v15  ;;  %v4135_v15 = vld [vmem:[%s7669_s3 + $0x38] sm:$0xff]  }
 0x224   :  { %3568 = vmatmul.mubr.msk.bf16.gmra.mrb[76].mxu0 %vm3566_vm14, %v9121_v39  ;;  %vm3575_vm8 = vmpackc.low %vm1584_vm10, %vm1583_vm1  ;;  %vm9133_vm14 = vnez %v9132_v61 }
 0x225   :  { %3997 = vmatprep.mubr.bf16.mxu0 %v4128_v30  ;;  %vm9136_vm15 = vmpackc.low %vm9133_vm14, %vm9135_vm12  ;;  %vm9153_vm14 = vcmp.lt.s32.totalorder %v6299_v19, 8  ;;  %v4133_v19 = vld [vmem:[%s7669_s3 + $0x28] sm:$0xff]  }
 0x226   :  { %vm9140_vm3 = vmpackc.low %vm9138_vm0, %vm9139_vm5 }
 0x227   :  { %vm9146_vm1 = vmpackc.low %vm9143_vm13, %vm9145_vm11 }
 0x228   :  { %vm1594_vm12 = vmand %vm7088_vm6, %vm9153_vm14 }
 0x22a   :  { %3966 = vmatmul.mubr.msk.bf16.vlgmr.msra.gmra.mrb[64].mxu1 %vm3572_vm4, %v9128_v54  ;;  %vm9152_vm4 = vcmp.lt.s32.totalorder %v6286_v11, 8  ;;  %v9154_v11 = vld [vmem:[#allocation89_spill] sm:$0xff] }
 0x22b   :  { %4021 = vmatpush3.bf16.msra.mxu1 %v6242_v44  ;;  %3969 = vmatprep.mubr.msk.bf16.mxu1 %vm3575_vm8, %v9129_v52  ;;  %v9137_v44 = vld [vmem:[#allocation114_spill] sm:$0xff]  ;;  %vm1593_vm8 = vmand %vm7084_vm7, %vm9152_vm4 }
 0x22c   :  { %4014 = vmatprep.subr.bf16.mxu1 %v9130_v57  ;;  %3998 = vmatmul.mubr.bf16.vlgmr.msra.gmra.mrb[80].mxu0 %v4129_v28 }
 0x22d   :  { %4001 = vmatprep.mubr.bf16.mxu0 %v4130_v56 }
 0x22f   :  { %4022 = vmatpush3.bf16.msra.mxu1 %v9130_v57 }
 0x230   :  { %4015 = vmatprep.subr.bf16.mxu1 %v6770_v32 }
 0x232   :  { %3970 = vmatmul.mubr.msk.bf16.gmra.mrb[68].mxu1 %vm9136_vm15, %v9131_v25  ;;  %vm3590_vm15 = vmpackc.low %vm1594_vm12, %vm1593_vm8 }
 0x233   :  { %4023 = vmatpush3.bf16.msra.mxu1 %v6770_v32  ;;  %3973 = vmatprep.mubr.msk.bf16.mxu1 %vm9140_vm3, %v9137_v44  ;;  %v9149_v32 = vld [vmem:[#allocation33_spill] sm:$0xff] }
 0x234   :  { %4016 = vmatprep.subr.bf16.mxu1 %v6828_v8  ;;  %4002 = vmatmul.mubr.bf16.gmra.mrb[84].mxu0 %v4131_v27  ;;  %vm9150_vm2 = vnez %v9149_v32 }
 0x235   :  { %vm9151_vm10 = vmpackc.low %vm9148_vm9, %vm9150_vm2 }
 0x237   :  { %4024 = vmatpush3.bf16.msra.mxu1 %v6828_v8  ;;  %v4132_v8 = vld [vmem:[%s7669_s3 + $0x20] sm:$0xff]  }
 0x238   :  { %4017 = vmatprep.subr.bf16.mxu1 %v6886_v21 }
 0x23a   :  { %3974 = vmatmul.mubr.msk.bf16.gmra.mrb[72].mxu1 %vm9146_vm1, %v9141_v40  ;;  %v3709_v53 = vpop.f32.mrb[16].mxu0 }
 0x23b   :  { %4025 = vmatpush3.bf16.msra.mxu1 %v6886_v21  ;;  %3977 = vmatprep.mubr.msk.bf16.mxu1 %vm9151_vm10, %v9147_v46  ;;  %v3710_v36 = vpop.f32.mrb[17].mxu0 }
 0x23c   :  { %4018 = vmatprep.subr.bf16.mxu1 %v6928_v7  ;;  %v3711_v51 = vadd.f32 %v3710_v36, %v3709_v53  ;;  %v3712_v41 = vpop.f32.mrb[18].mxu0 }
 0x23d   :  { %v3713_v10 = vpop.f32.mrb[19].mxu0 }
 0x23e   :  { %v3714_v23 = vadd.f32 %v3713_v10, %v3712_v41 }
 0x23f   :  { %4026 = vmatpush3.bf16.msra.mxu1 %v6928_v7  ;;  %v3645_v7 = vpop.f32.mrb[0].mxu1 }
 0x240   :  { %4019 = vmatprep.subr.bf16.mxu1 %v6970_v58  ;;  %v3646_v21 = vpop.f32.mrb[1].mxu1 }
 0x241   :  { %v3648_v18 = vpop.f32.mrb[2].mxu1 }
 0x242   :  { %3978 = vmatmul.mubr.msk.bf16.gmra.mrb[76].mxu1 %vm3590_vm15, %v9154_v11  ;;  %v3649_v0 = vpop.f32.mrb[3].mxu1 }
 0x243   :  { %4027 = vmatpush3.bf16.msra.mxu1 %v6970_v58  ;;  %4005 = vmatprep.mubr.bf16.mxu1 %v4132_v8  ;;  %v3647_v58 = vadd.f32 %v3646_v21, %v3645_v7 }
 0x244   :  { %4020 = vmatprep.subr.bf16.mxu1 %v6989_v59 }
 0x245   :  { %v7221_v38 = vadd.f32 %v3711_v51, %v3647_v58 }
 0x247   :  { %4028 = vmatpush3.bf16.msra.mxu1 %v6989_v59  ;;  %v3650_v59 = vadd.f32 %v3649_v0, %v3648_v18 }
 0x249   :  { %v7223_v37 = vadd.f32 %v3714_v23, %v3650_v59 }
 0x24a   :  { %4006 = vmatmul.mubr.bf16.vlgmr.msra.gmra.mrb[80].mxu1 %v4133_v19  ;;  %v3651_v55 = vpop.f32.mrb[4].mxu1 }
 0x24b   :  { %4009 = vmatprep.mubr.bf16.mxu1 %v4134_v63  ;;  %v3652_v24 = vpop.f32.mrb[5].mxu1 }
 0x24c   :  { %v3653_v16 = vadd.f32 %v3652_v24, %v3651_v55  ;;  %v3654_v4 = vpop.f32.mrb[6].mxu1 }
 0x24d   :  { %v3655_v43 = vpop.f32.mrb[7].mxu1 }
 0x24e   :  { %v3656_v35 = vadd.f32 %v3655_v43, %v3654_v4 }
 0x250   :  { %v3715_v45 = vpop.f32.mrb[20].mxu0 }
 0x251   :  { %v3716_v14 = vpop.f32.mrb[21].mxu0 }
 0x252   :  { %4010 = vmatmul.mubr.bf16.gmra.mrb[84].mxu1 %v4135_v15  ;;  %v3717_v49 = vadd.f32 %v3716_v14, %v3715_v45  ;;  %v3718_v5 = vpop.f32.mrb[22].mxu0 }
 0x253   :  { %v3719_v20 = vpop.f32.mrb[23].mxu0 }
 0x254   :  { %v7225_v2 = vadd.f32 %v3717_v49, %v3653_v16  ;;  %v3720_v6 = vadd.f32 %v3719_v20, %v3718_v5 }
 0x256   :  { %v7227_v26 = vadd.f32 %v3720_v6, %v3656_v35 }
 0x261   :  { %v3657_v60 = vpop.f32.mrb[8].mxu1 }
 0x262   :  { %v3658_v34 = vpop.f32.mrb[9].mxu1 }
 0x263   :  { %v3659_v17 = vadd.f32 %v3658_v34, %v3657_v60  ;;  %v3660_v48 = vpop.f32.mrb[10].mxu1 }
 0x264   :  { %v3661_v12 = vpop.f32.mrb[11].mxu1 }
 0x265   :  { %v3662_v29 = vadd.f32 %v3661_v12, %v3660_v48 }
 0x266   :  { %v3721_v30 = vpop.f32.mrb[24].mxu0 }
 0x267   :  { %v3722_v62 = vpop.f32.mrb[25].mxu0 }
 0x268   :  { %v3723_v31 = vadd.f32 %v3722_v62, %v3721_v30  ;;  %v3724_v3 = vpop.f32.mrb[26].mxu0 }
 0x269   :  { %v3725_v9 = vpop.f32.mrb[27].mxu0 }
 0x26a   :  { %v7229_v42 = vadd.f32 %v3723_v31, %v3659_v17  ;;  %v3726_v22 = vadd.f32 %v3725_v9, %v3724_v3 }
 0x26c   :  { %v7231_v39 = vadd.f32 %v3726_v22, %v3662_v29 }
 0x27a   :  { %v3663_v13 = vpop.f32.mrb[12].mxu1 }
 0x27b   :  { %v3664_v33 = vpop.f32.mrb[13].mxu1 }
 0x27c   :  { %v3665_v28 = vadd.f32 %v3664_v33, %v3663_v13  ;;  %v3666_v54 = vpop.f32.mrb[14].mxu1 }
 0x27d   :  { %v3667_v57 = vpop.f32.mrb[15].mxu1 }
 0x27e   :  { %v3668_v25 = vadd.f32 %v3667_v57, %v3666_v54 }
 0x282   :  { %v3727_v56 = vpop.f32.mrb[28].mxu0 }
 0x283   :  { %v3728_v52 = vpop.f32.mrb[29].mxu0 }
 0x284   :  { %v3729_v27 = vadd.f32 %v3728_v52, %v3727_v56  ;;  %v3730_v61 = vpop.f32.mrb[30].mxu0 }
 0x285   :  { %v3731_v1 = vpop.f32.mrb[31].mxu0 }
 0x286   :  { %v7233_v44 = vadd.f32 %v3729_v27, %v3665_v28  ;;  %v3732_v40 = vadd.f32 %v3731_v1, %v3730_v61 }
 0x288   :  { %v7235_v47 = vadd.f32 %v3732_v40, %v3668_v25 }
 0x28f   :  { %v3669_v50 = vpop.f32.mrb[16].mxu1 }
 0x290   :  { %v3670_v46 = vpop.f32.mrb[17].mxu1 }
 0x291   :  { %v3671_v32 = vadd.f32 %v3670_v46, %v3669_v50  ;;  %v3672_v11 = vpop.f32.mrb[18].mxu1 }
 0x292   :  { %v3733_v8 = vpop.f32.mrb[32].mxu0  ;;  %v3673_v63 = vpop.f32.mrb[19].mxu1 }
 0x293   :  { %v3734_v19 = vpop.f32.mrb[33].mxu0  ;;  %v3674_v7 = vadd.f32 %v3673_v63, %v3672_v11 }
 0x294   :  { %v3735_v15 = vadd.f32 %v3734_v19, %v3733_v8  ;;  %v3736_v21 = vpop.f32.mrb[34].mxu0 }
 0x295   :  { %v3737_v58 = vpop.f32.mrb[35].mxu0 }
 0x296   :  { %v7237_v53 = vadd.f32 %v3735_v15, %v3671_v32  ;;  %v3738_v18 = vadd.f32 %v3737_v58, %v3736_v21 }
 0x298   :  { %v7239_v36 = vadd.f32 %v3738_v18, %v3674_v7 }
 0x29a   :  { %v3675_v0 = vpop.f32.mrb[20].mxu1 }
 0x29b   :  { %v3676_v51 = vpop.f32.mrb[21].mxu1 }
 0x29c   :  { %v3677_v59 = vadd.f32 %v3676_v51, %v3675_v0  ;;  %v3678_v10 = vpop.f32.mrb[22].mxu1 }
 0x29d   :  { %v3679_v55 = vpop.f32.mrb[23].mxu1 }
 0x29e   :  { %v3739_v41 = vpop.f32.mrb[36].mxu0  ;;  %v3680_v16 = vadd.f32 %v3679_v55, %v3678_v10 }
 0x29f   :  { %v3740_v23 = vpop.f32.mrb[37].mxu0 }
 0x2a0   :  { %v3741_v24 = vadd.f32 %v3740_v23, %v3739_v41  ;;  %v3742_v45 = vpop.f32.mrb[38].mxu0 }
 0x2a1   :  { %v3743_v4 = vpop.f32.mrb[39].mxu0 }
 0x2a2   :  { %v7241_v14 = vadd.f32 %v3741_v24, %v3677_v59  ;;  %v3744_v43 = vadd.f32 %v3743_v4, %v3742_v45 }
 0x2a4   :  { %v7243_v49 = vadd.f32 %v3744_v43, %v3680_v16  ;;  %v3681_v35 = vpop.f32.mrb[24].mxu1 }
 0x2a5   :  { %v3682_v5 = vpop.f32.mrb[25].mxu1 }
 0x2a6   :  { %v3683_v20 = vadd.f32 %v3682_v5, %v3681_v35  ;;  %v3684_v60 = vpop.f32.mrb[26].mxu1 }
 0x2a7   :  { %v3685_v17 = vpop.f32.mrb[27].mxu1 }
 0x2a8   :  { %v3745_v6 = vpop.f32.mrb[40].mxu0  ;;  %v3686_v48 = vadd.f32 %v3685_v17, %v3684_v60 }
 0x2a9   :  { %v3746_v34 = vpop.f32.mrb[41].mxu0 }
 0x2aa   :  { %v3747_v30 = vadd.f32 %v3746_v34, %v3745_v6  ;;  %v3748_v62 = vpop.f32.mrb[42].mxu0 }
 0x2ab   :  { %v3749_v12 = vpop.f32.mrb[43].mxu0 }
 0x2ac   :  { %v7245_v31 = vadd.f32 %v3747_v30, %v3683_v20  ;;  %v3750_v29 = vadd.f32 %v3749_v12, %v3748_v62 }
 0x2ae   :  { %v7247_v3 = vadd.f32 %v3750_v29, %v3686_v48  ;;  %v3687_v9 = vpop.f32.mrb[28].mxu1 }
 0x2af   :  { %v3688_v22 = vpop.f32.mrb[29].mxu1 }
 0x2b0   :  { %v3689_v13 = vadd.f32 %v3688_v22, %v3687_v9  ;;  %v3690_v28 = vpop.f32.mrb[30].mxu1 }
 0x2b1   :  { %v3691_v54 = vpop.f32.mrb[31].mxu1 }
 0x2b2   :  { %v3751_v33 = vpop.f32.mrb[44].mxu0  ;;  %v3692_v57 = vadd.f32 %v3691_v54, %v3690_v28 }
 0x2b3   :  { %v3752_v56 = vpop.f32.mrb[45].mxu0 }
 0x2b4   :  { %v3753_v52 = vadd.f32 %v3752_v56, %v3751_v33  ;;  %v3754_v27 = vpop.f32.mrb[46].mxu0 }
 0x2b5   :  { %v3755_v25 = vpop.f32.mrb[47].mxu0 }
 0x2b6   :  { %v7249_v61 = vadd.f32 %v3753_v52, %v3689_v13  ;;  %v3756_v1 = vadd.f32 %v3755_v25, %v3754_v27 }
 0x2b8   :  { %v7251_v40 = vadd.f32 %v3756_v1, %v3692_v57 }
 0x2b9   :  { %v3773_v50 = vpop.f32.mrb[32].mxu1 }
 0x2ba   :  { %v3774_v46 = vpop.f32.mrb[33].mxu1 }
 0x2bb   :  { %v3775_v32 = vadd.f32 %v3774_v46, %v3773_v50  ;;  %v3776_v11 = vpop.f32.mrb[34].mxu1 }
 0x2bc   :  { %v3777_v63 = vpop.f32.mrb[35].mxu1 }
 0x2bd   :  { %v3837_v8 = vpop.f32.mrb[48].mxu0  ;;  %v2456_v15 = vadd.f32 %v3775_v32, %v7221_v38  ;;  %v3778_v21 = vadd.f32 %v3777_v63, %v3776_v11 }
 0x2be   :  { %v3838_v19 = vpop.f32.mrb[49].mxu0 }
 0x2bf   :  { %v3839_v7 = vadd.f32 %v3838_v19, %v3837_v8  ;;  %v3840_v58 = vpop.f32.mrb[50].mxu0  ;;  %v2459_v0 = vadd.f32 %v3778_v21, %v7223_v37 }
 0x2c0   :  { %v3841_v18 = vpop.f32.mrb[51].mxu0 }
 0x2c1   :  { %v3842_v51 = vadd.f32 %v3841_v18, %v3840_v58  ;;  %v7255_v59 = vadd.f32 %v3839_v7, %v2456_v15 }
 0x2c3   :  { %v7257_v10 = vadd.f32 %v3842_v51, %v2459_v0 }
 0x2c5   :  { %v3779_v41 = vpop.f32.mrb[36].mxu1 }
 0x2c6   :  { %v3780_v23 = vpop.f32.mrb[37].mxu1 }
 0x2c7   :  { %v3781_v55 = vadd.f32 %v3780_v23, %v3779_v41  ;;  %v3843_v24 = vpop.f32.mrb[52].mxu0  ;;  %v3782_v16 = vpop.f32.mrb[38].mxu1 }
 0x2c8   :  { %v3844_v45 = vpop.f32.mrb[53].mxu0  ;;  %v3783_v4 = vpop.f32.mrb[39].mxu1 }
 0x2c9   :  { %v2464_v38 = vadd.f32 %v3781_v55, %v7225_v2  ;;  %v3845_v43 = vadd.f32 %v3844_v45, %v3843_v24  ;;  %v3784_v35 = vadd.f32 %v3783_v4, %v3782_v16  ;;  %v3846_v5 = vpop.f32.mrb[54].mxu0 }
 0x2ca   :  { %v3847_v20 = vpop.f32.mrb[55].mxu0 }
 0x2cb   :  { %v2467_v37 = vadd.f32 %v3784_v35, %v7227_v26  ;;  %v3848_v6 = vadd.f32 %v3847_v20, %v3846_v5  ;;  %v7261_v60 = vadd.f32 %v3845_v43, %v2464_v38 }
 0x2cd   :  { %v3785_v34 = vpop.f32.mrb[40].mxu1  ;;  %v7263_v17 = vadd.f32 %v3848_v6, %v2467_v37 }
 0x2ce   :  { %v3786_v30 = vpop.f32.mrb[41].mxu1 }
 0x2cf   :  { %v3787_v48 = vadd.f32 %v3786_v30, %v3785_v34  ;;  %v3849_v62 = vpop.f32.mrb[56].mxu0  ;;  %v3788_v12 = vpop.f32.mrb[42].mxu1 }
 0x2d0   :  { %v3850_v29 = vpop.f32.mrb[57].mxu0  ;;  %v3789_v9 = vpop.f32.mrb[43].mxu1 }
 0x2d1   :  { %v2472_v2 = vadd.f32 %v3787_v48, %v7229_v42  ;;  %v3851_v22 = vadd.f32 %v3850_v29, %v3849_v62  ;;  %v3790_v13 = vadd.f32 %v3789_v9, %v3788_v12  ;;  %v3852_v33 = vpop.f32.mrb[58].mxu0 }
 0x2d2   :  { %v3853_v28 = vpop.f32.mrb[59].mxu0 }
 0x2d3   :  { %v2475_v26 = vadd.f32 %v3790_v13, %v7231_v39  ;;  %v3854_v56 = vadd.f32 %v3853_v28, %v3852_v33  ;;  %v7267_v54 = vadd.f32 %v3851_v22, %v2472_v2 }
 0x2d5   :  { %v3791_v52 = vpop.f32.mrb[44].mxu1  ;;  %v7269_v57 = vadd.f32 %v3854_v56, %v2475_v26 }
 0x2d6   :  { %v3792_v27 = vpop.f32.mrb[45].mxu1 }
 0x2d7   :  { %v3793_v25 = vadd.f32 %v3792_v27, %v3791_v52  ;;  %v3855_v1 = vpop.f32.mrb[60].mxu0  ;;  %v3794_v50 = vpop.f32.mrb[46].mxu1 }
 0x2d8   :  { %v3856_v46 = vpop.f32.mrb[61].mxu0  ;;  %v3795_v32 = vpop.f32.mrb[47].mxu1 }
 0x2d9   :  { %v2480_v42 = vadd.f32 %v3793_v25, %v7233_v44  ;;  %v3857_v8 = vadd.f32 %v3856_v46, %v3855_v1  ;;  %v3796_v11 = vadd.f32 %v3795_v32, %v3794_v50  ;;  %v3858_v19 = vpop.f32.mrb[62].mxu0 }
 0x2da   :  { %v3859_v63 = vpop.f32.mrb[63].mxu0 }
 0x2db   :  { %v2483_v39 = vadd.f32 %v3796_v11, %v7235_v47  ;;  %v3860_v15 = vadd.f32 %v3859_v63, %v3858_v19  ;;  %v7273_v7 = vadd.f32 %v3857_v8, %v2480_v42 }
 0x2dd   :  { %v3797_v21 = vpop.f32.mrb[48].mxu1  ;;  %v7275_v58 = vadd.f32 %v3860_v15, %v2483_v39 }
 0x2de   :  { %v3798_v18 = vpop.f32.mrb[49].mxu1 }
 0x2df   :  { %v3799_v0 = vadd.f32 %v3798_v18, %v3797_v21  ;;  %v3861_v51 = vpop.f32.mrb[64].mxu0  ;;  %v3800_v41 = vpop.f32.mrb[50].mxu1 }
 0x2e0   :  { %v3862_v23 = vpop.f32.mrb[65].mxu0  ;;  %v3801_v55 = vpop.f32.mrb[51].mxu1 }
 0x2e1   :  { %v2488_v44 = vadd.f32 %v3799_v0, %v7237_v53  ;;  %v3863_v24 = vadd.f32 %v3862_v23, %v3861_v51  ;;  %v3802_v16 = vadd.f32 %v3801_v55, %v3800_v41  ;;  %v3864_v45 = vpop.f32.mrb[66].mxu0 }
 0x2e2   :  { %v3865_v4 = vpop.f32.mrb[67].mxu0 }
 0x2e3   :  { %v2491_v47 = vadd.f32 %v3802_v16, %v7239_v36  ;;  %v3866_v38 = vadd.f32 %v3865_v4, %v3864_v45  ;;  %v7279_v43 = vadd.f32 %v3863_v24, %v2488_v44 }
 0x2e5   :  { %v3803_v35 = vpop.f32.mrb[52].mxu1  ;;  %v7281_v5 = vadd.f32 %v3866_v38, %v2491_v47 }
 0x2e6   :  { %v3804_v20 = vpop.f32.mrb[53].mxu1 }
 0x2e7   :  { %v3805_v37 = vadd.f32 %v3804_v20, %v3803_v35  ;;  %v3867_v6 = vpop.f32.mrb[68].mxu0  ;;  %v3806_v34 = vpop.f32.mrb[54].mxu1 }
 0x2e8   :  { %v3868_v30 = vpop.f32.mrb[69].mxu0  ;;  %v3807_v48 = vpop.f32.mrb[55].mxu1 }
 0x2e9   :  { %v2496_v53 = vadd.f32 %v3805_v37, %v7241_v14  ;;  %v3869_v62 = vadd.f32 %v3868_v30, %v3867_v6  ;;  %v3808_v12 = vadd.f32 %v3807_v48, %v3806_v34  ;;  %v3870_v29 = vpop.f32.mrb[70].mxu0 }
 0x2ea   :  { %v3871_v9 = vpop.f32.mrb[71].mxu0 }
 0x2eb   :  { %v2499_v36 = vadd.f32 %v3808_v12, %v7243_v49  ;;  %v3872_v2 = vadd.f32 %v3871_v9, %v3870_v29  ;;  %v7285_v22 = vadd.f32 %v3869_v62, %v2496_v53 }
 0x2ed   :  { %v3809_v13 = vpop.f32.mrb[56].mxu1  ;;  %v7287_v33 = vadd.f32 %v3872_v2, %v2499_v36 }
 0x2ee   :  { %v3810_v28 = vpop.f32.mrb[57].mxu1 }
 0x2ef   :  { %v3811_v26 = vadd.f32 %v3810_v28, %v3809_v13  ;;  %v3873_v56 = vpop.f32.mrb[72].mxu0  ;;  %v3812_v52 = vpop.f32.mrb[58].mxu1 }
 0x2f0   :  { %v3874_v27 = vpop.f32.mrb[73].mxu0  ;;  %v3813_v25 = vpop.f32.mrb[59].mxu1 }
 0x2f1   :  { %v2504_v14 = vadd.f32 %v3811_v26, %v7245_v31  ;;  %v3875_v1 = vadd.f32 %v3874_v27, %v3873_v56  ;;  %v3814_v50 = vadd.f32 %v3813_v25, %v3812_v52  ;;  %v3876_v46 = vpop.f32.mrb[74].mxu0 }
 0x2f2   :  { %v3877_v32 = vpop.f32.mrb[75].mxu0 }
 0x2f3   :  { %v2507_v49 = vadd.f32 %v3814_v50, %v7247_v3  ;;  %v3878_v42 = vadd.f32 %v3877_v32, %v3876_v46  ;;  %v7291_v8 = vadd.f32 %v3875_v1, %v2504_v14 }
 0x2f5   :  { %v3815_v11 = vpop.f32.mrb[60].mxu1  ;;  %v7293_v19 = vadd.f32 %v3878_v42, %v2507_v49 }
 0x2f6   :  { %v3816_v63 = vpop.f32.mrb[61].mxu1 }
 0x2f7   :  { %v3817_v39 = vadd.f32 %v3816_v63, %v3815_v11  ;;  %v3879_v15 = vpop.f32.mrb[76].mxu0  ;;  %v3818_v21 = vpop.f32.mrb[62].mxu1 }
 0x2f8   :  { %v3880_v18 = vpop.f32.mrb[77].mxu0  ;;  %v3819_v0 = vpop.f32.mrb[63].mxu1 }
 0x2f9   :  { %v2512_v31 = vadd.f32 %v3817_v39, %v7249_v61  ;;  %v3881_v51 = vadd.f32 %v3880_v18, %v3879_v15  ;;  %v3820_v41 = vadd.f32 %v3819_v0, %v3818_v21  ;;  %v3882_v23 = vpop.f32.mrb[78].mxu0 }
 0x2fa   :  { %v3883_v55 = vpop.f32.mrb[79].mxu0 }
 0x2fb   :  { %v2515_v3 = vadd.f32 %v3820_v41, %v7251_v40  ;;  %v3884_v44 = vadd.f32 %v3883_v55, %v3882_v23  ;;  %v7297_v24 = vadd.f32 %v3881_v51, %v2512_v31 }
 0x2fd   :  { %v3967_v16 = vpop.f32.mrb[64].mxu1  ;;  %v7299_v45 = vadd.f32 %v3884_v44, %v2515_v3 }
 0x2fe   :  { %v7302_v4 = vadd.f32 %v3967_v16, %v7261_v60  ;;  %v2649_v47 = vpop.f32.mrb[65].mxu1 }
 0x2ff   :  { %v7305_v38 = vadd.f32 %v2649_v47, %v7255_v59  ;;  %v3968_v61 = vpop.f32.mrb[66].mxu1  ;;  %v7307_v35 = vpop.f32.mrb[80].mxu0 }
 0x300   :  { %v7310_v20 = vadd.f32 %v3968_v61, %v7263_v17  ;;  %v2652_v40 = vpop.f32.mrb[67].mxu1  ;;  %v7312_v37 = vpop.f32.mrb[81].mxu0  ;;  %v3105_v30 = vmul.f32 %v7307_v35, %v7307_v35  ;;  %v2737_v12 = vmul.f32 %v7302_v4, %v7302_v4 }
 0x301   :  { %v7315_v6 = vadd.f32 %v2652_v40, %v7257_v10  ;;  %v3103_v60 = vmul.f32 %v7312_v37, %v7312_v37  ;;  %v7319_v34 = vpop.f32.mrb[82].mxu0  ;;  %v2735_v59 = vmul.f32 %v7305_v38, %v7305_v38 }
 0x302   :  { %v7325_v48 = vpop.f32.mrb[83].mxu0  ;;  %v2738_v28 = vmul.f32 %v7310_v20, %v7310_v20  ;;  %v3106_v52 = vmul.f32 %v7319_v34, %v7319_v34 }
 0x303   :  { %v2714_v17 = vadd.f32 %v7315_v6, %v7305_v38  ;;  %v2736_v10 = vmul.f32 %v7315_v6, %v7315_v6  ;;  %v3082_v53 = vadd.f32 %v7325_v48, %v7312_v37  ;;  %v3104_v62 = vmul.f32 %v7325_v48, %v7325_v48 }
 0x305   :  { %v2715_v29 = vadd.f32 %v2714_v17, %v7302_v4  ;;  %v2751_v9 = vadd.f32 %v2736_v10, %v2735_v59  ;;  %v3971_v36 = vpop.f32.mrb[68].mxu1  ;;  %v3083_v2 = vadd.f32 %v7307_v35, %v3082_v53  ;;  %v3119_v13 = vadd.f32 %v3104_v62, %v3103_v60 }
 0x306   :  { %v7342_v26 = vadd.f32 %v3971_v36, %v7273_v7  ;;  %v2665_v56 = vpop.f32.mrb[69].mxu1 }
 0x307   :  { %v2752_v27 = vadd.f32 %v2751_v9, %v2737_v12  ;;  %v7347_v25 = vadd.f32 %v2665_v56, %v7267_v54  ;;  %v2716_v14 = vadd.f32 %v2715_v29, %v7310_v20  ;;  %v3972_v1 = vpop.f32.mrb[70].mxu1  ;;  %v3120_v50 = vadd.f32 %v3119_v13, %v3105_v30  ;;  %v7350_v46 = vpop.f32.mrb[84].mxu0 }
 0x308   :  { %v7353_v32 = vadd.f32 %v3972_v1, %v7275_v58  ;;  %v2668_v49 = vpop.f32.mrb[71].mxu1  ;;  %v7355_v7 = vpop.f32.mrb[85].mxu0  ;;  %v3084_v42 = vadd.f32 %v7319_v34, %v3083_v2  ;;  %v2741_v44 = vmul.f32 %v7342_v26, %v7342_v26 }
 0x309   :  { %v2717_v11 = vadd.f32 %v2716_v14, %v7347_v25  ;;  %v2739_v54 = vmul.f32 %v7347_v25, %v7347_v25  ;;  %v2753_v63 = vadd.f32 %v2752_v27, %v2738_v28  ;;  %v7362_v39 = vadd.f32 %v2668_v49, %v7269_v57  ;;  %v7364_v15 = vpop.f32.mrb[86].mxu0 }
 0x30a   :  { %v3085_v21 = vadd.f32 %v3084_v42, %v7355_v7  ;;  %v3107_v58 = vmul.f32 %v7355_v7, %v7355_v7  ;;  %v3121_v18 = vadd.f32 %v3120_v50, %v3106_v52  ;;  %v7369_v0 = vpop.f32.mrb[87].mxu0  ;;  %v3109_v57 = vmul.f32 %v7350_v46, %v7350_v46 }
 0x30b   :  { %v2754_v31 = vadd.f32 %v2753_v63, %v2739_v54  ;;  %v2718_v51 = vadd.f32 %v2717_v11, %v7362_v39  ;;  %v2740_v41 = vmul.f32 %v7362_v39, %v7362_v39  ;;  %v3108_v3 = vmul.f32 %v7369_v0, %v7369_v0 }
 0x30c   :  { %v3122_v23 = vadd.f32 %v3121_v18, %v3107_v58  ;;  %v3086_v55 = vadd.f32 %v3085_v21, %v7369_v0  ;;  %v3110_v59 = vmul.f32 %v7364_v15, %v7364_v15  ;;  %v2742_v10 = vmul.f32 %v7353_v32, %v7353_v32 }
 0x30d   :  { %v2719_v16 = vadd.f32 %v2718_v51, %v7342_v26  ;;  %v2755_v47 = vadd.f32 %v2754_v31, %v2740_v41  ;;  %v3975_v61 = vpop.f32.mrb[72].mxu1 }
 0x30e   :  { %v7383_v40 = vadd.f32 %v3975_v61, %v7285_v22  ;;  %v2681_v60 = vpop.f32.mrb[73].mxu1  ;;  %v3087_v30 = vadd.f32 %v7350_v46, %v3086_v55  ;;  %v3123_v17 = vadd.f32 %v3122_v23, %v3108_v3 }
 0x30f   :  { %v2756_v53 = vadd.f32 %v2755_v47, %v2741_v44  ;;  %v7391_v62 = vadd.f32 %v2681_v60, %v7279_v43  ;;  %v2720_v12 = vadd.f32 %v2719_v16, %v7353_v32  ;;  %v3976_v29 = vpop.f32.mrb[74].mxu1 }
 0x310   :  { %v7395_v22 = vadd.f32 %v3976_v29, %v7287_v33  ;;  %v2684_v9 = vpop.f32.mrb[75].mxu1  ;;  %v3124_v36 = vadd.f32 %v3123_v17, %v3109_v57  ;;  %v3088_v2 = vadd.f32 %v7364_v15, %v3087_v30  ;;  %v2745_v1 = vmul.f32 %v7383_v40, %v7383_v40 }
 0x311   :  { %v2721_v13 = vadd.f32 %v2720_v12, %v7391_v62  ;;  %v2743_v28 = vmul.f32 %v7391_v62, %v7391_v62  ;;  %v2757_v56 = vadd.f32 %v2756_v53, %v2742_v10  ;;  %v7402_v52 = vadd.f32 %v2684_v9, %v7281_v5 }
 0x312   :  { %v3125_v43 = vadd.f32 %v3124_v36, %v3110_v59  ;;  %v2746_v5 = vmul.f32 %v7395_v22, %v7395_v22 }
 0x313   :  { %v2758_v27 = vadd.f32 %v2757_v56, %v2743_v28  ;;  %v2722_v14 = vadd.f32 %v2721_v13, %v7402_v52  ;;  %v2744_v33 = vmul.f32 %v7402_v52, %v7402_v52 }
 0x315   :  { %v2723_v50 = vadd.f32 %v2722_v14, %v7383_v40  ;;  %v2759_v49 = vadd.f32 %v2758_v27, %v2744_v33  ;;  %v3979_v42 = vpop.f32.mrb[76].mxu1 }
 0x316   :  { %v7411_v11 = vadd.f32 %v3979_v42, %v7297_v24  ;;  %v2697_v54 = vpop.f32.mrb[77].mxu1 }
 0x317   :  { %v2760_v63 = vadd.f32 %v2759_v49, %v2745_v1  ;;  %v7416_v21 = vadd.f32 %v2697_v54, %v7291_v8  ;;  %v2724_v58 = vadd.f32 %v2723_v50, %v7395_v22  ;;  %v3980_v18 = vpop.f32.mrb[78].mxu1 }
 0x318   :  { %v7420_v31 = vadd.f32 %v3980_v18, %v7299_v45  ;;  %v2700_v51 = vpop.f32.mrb[79].mxu1  ;;  %v2749_v45 = vmul.f32 %v7411_v11, %v7411_v11 }
 0x319   :  { %v2725_v41 = vadd.f32 %v2724_v58, %v7416_v21  ;;  %v2747_v24 = vmul.f32 %v7416_v21, %v7416_v21  ;;  %v2761_v57 = vadd.f32 %v2760_v63, %v2746_v5  ;;  %v7426_v23 = vadd.f32 %v2700_v51, %v7293_v19 }
 0x31a   :  { %v2750_v61 = vmul.f32 %v7420_v31, %v7420_v31 }
 0x31b   :  { %v2762_v55 = vadd.f32 %v2761_v57, %v2747_v24  ;;  %v2726_v8 = vadd.f32 %v2725_v41, %v7426_v23  ;;  %v2748_v3 = vmul.f32 %v7426_v23, %v7426_v23 }
 0x31d   :  { %v2727_v44 = vadd.f32 %v2726_v8, %v7411_v11  ;;  %v2763_v16 = vadd.f32 %v2762_v55, %v2748_v3  ;;  %v7434_v47 = vpop.f32.mrb[80].mxu1 }
 0x31e   :  { %v7438_v60 = vpop.f32.mrb[81].mxu1 }
 0x31f   :  { %v2728_v19 = vadd.f32 %v2727_v44, %v7420_v31  ;;  %v2764_v59 = vadd.f32 %v2763_v16, %v2749_v45  ;;  %v3089_v30 = vadd.f32 %v3088_v2, %v7438_v60  ;;  %v3111_v17 = vmul.f32 %v7438_v60, %v7438_v60  ;;  %v7444_v10 = vpop.f32.mrb[82].mxu1 }
 0x320   :  { %v7446_v53 = vpop.f32.mrb[83].mxu1  ;;  %v3113_v2 = vmul.f32 %v7434_v47, %v7434_v47 }
 0x321   :  { %v2729_v12 = vrot.slane %v2728_v19, 4  ;;  %v2765_v29 = vadd.f32 %v2764_v59, %v2750_v61  ;;  %v3126_v9 = vadd.f32 %v3125_v43, %v3111_v17  ;;  %v3090_v36 = vadd.f32 %v3089_v30, %v7446_v53 }
 0x322   :  { %v3112_v13 = vmul.f32 %v7446_v53, %v7446_v53  ;;  %v3114_v43 = vmul.f32 %v7444_v10, %v7444_v10 }
 0x323   :  { %v2730_v28 = vadd.f32 %v2729_v12, %v2728_v19  ;;  %v2766_v56 = vrot.slane %v2765_v29, 4  ;;  %v3091_v27 = vadd.f32 %v7434_v47, %v3090_v36 }
 0x324   :  { %v3127_v14 = vadd.f32 %v3126_v9, %v3112_v13 }
 0x325   :  { %v2731_v33 = vrot.slane %v2730_v28, 2  ;;  %v2767_v1 = vadd.f32 %v2766_v56, %v2765_v29  ;;  %v7454_v50 = vpop.f32.mrb[84].mxu1  ;;  %v3092_v49 = vadd.f32 %v7444_v10, %v3091_v27 }
 0x326   :  { %v3128_v42 = vadd.f32 %v3127_v14, %v3113_v2  ;;  %v7459_v54 = vpop.f32.mrb[85].mxu1  ;;  %v3117_v19 = vmul.f32 %v7454_v50, %v7454_v50 }
 0x327   :  { %v2732_v5 = vadd.f32 %v2731_v33, %v2730_v28  ;;  %v2768_v63 = vrot.slane %v2767_v1, 2  ;;  %v3093_v58 = vadd.f32 %v3092_v49, %v7459_v54  ;;  %v3115_v18 = vmul.f32 %v7459_v54, %v7459_v54  ;;  %v7464_v51 = vpop.f32.mrb[86].mxu1 }
 0x328   :  { %v3129_v41 = vadd.f32 %v3128_v42, %v3114_v43  ;;  %v7466_v24 = vpop.f32.mrb[87].mxu1  ;;  %v3118_v29 = vmul.f32 %v7464_v51, %v7464_v51 }
 0x329   :  { %v2733_v57 = vrot.slane %v2732_v5, 1  ;;  %v2769_v55 = vadd.f32 %v2768_v63, %v2767_v1  ;;  %v3094_v8 = vadd.f32 %v3093_v58, %v7466_v24  ;;  %v3116_v3 = vmul.f32 %v7466_v24, %v7466_v24 }
 0x32a   :  { %v3130_v45 = vadd.f32 %v3129_v41, %v3115_v18 }
 0x32b   :  { %v2734_v44 = vadd.f32 %v2733_v57, %v2732_v5  ;;  %v2770_v16 = vrot.slane %v2769_v55, 1  ;;  %v3095_v61 = vadd.f32 %v7454_v50, %v3094_v8 }
 0x32c   :  { %v3131_v59 = vadd.f32 %v3130_v45, %v3116_v3 }
 0x32d   :  { %v2771_v30 = vadd.f32 %v2770_v16, %v2769_v55  ;;  %v7474_v17 = vmul.f32 0.0078125, %v2734_v44  ;;  %v3096_v12 = vadd.f32 %v7464_v51, %v3095_v61 }
 0x32e   :  { %v3132_v9 = vadd.f32 %v3131_v59, %v3117_v19 }
 0x32f   :  { %v2773_v36 = vmul.f32 0.0078125, %v2771_v30  ;;  %v2774_v13 = vmul.f32 %v7474_v17, %v7474_v17  ;;  %v2790_v28 = vsub.f32 %v7426_v23, %v7474_v17  ;;  %v3097_v56 = vrot.slane %v3096_v12, 4 }
 0x330   :  { %v3133_v27 = vadd.f32 %v3132_v9, %v3118_v29  ;;  %v2777_v2 = vsub.f32 %v7305_v38, %v7474_v17  ;;  %v2778_v14 = vsub.f32 %v7315_v6, %v7474_v17  ;;  %v2779_v33 = vsub.f32 %v7302_v4, %v7474_v17 }
 0x331   :  { %v2775_v1 = vsub.f32 %v2773_v36, %v2774_v13  ;;  %v3098_v49 = vadd.f32 %v3097_v56, %v3096_v12  ;;  %v2780_v43 = vsub.f32 %v7310_v20, %v7474_v17  ;;  %v2781_v42 = vsub.f32 %v7347_v25, %v7474_v17 }
 0x332   :  { %v3134_v23 = vrot.slane %v3133_v27, 4  ;;  %v2782_v5 = vsub.f32 %v7362_v39, %v7474_v17  ;;  %v2783_v38 = vsub.f32 %v7342_v26, %v7474_v17  ;;  %v2784_v6 = vsub.f32 %v7353_v32, %v7474_v17 }
 0x333   :  { %v2776_v63 = vmax.f32 %v2775_v1, 0.0  ;;  %v3099_v4 = vrot.slane %v3098_v49, 2  ;;  %v2785_v58 = vsub.f32 %v7391_v62, %v7474_v17  ;;  %v2786_v20 = vsub.f32 %v7402_v52, %v7474_v17 }
 0x334   :  { %v3135_v18 = vadd.f32 %v3134_v23, %v3133_v27  ;;  %v2787_v25 = vsub.f32 %v7383_v40, %v7474_v17  ;;  %v2788_v39 = vsub.f32 %v7395_v22, %v7474_v17  ;;  %v2789_v26 = vsub.f32 %v7416_v21, %v7474_v17 }
 0x335   :  { %v2793_v41 = vadd.f32 1e-05, %v2776_v63  ;;  %v3100_v32 = vadd.f32 %v3099_v4, %v3098_v49  ;;  %v2791_v57 = vsub.f32 %v7411_v11, %v7474_v17  ;;  %v2792_v62 = vsub.f32 %v7420_v31, %v7474_v17  ;;  %v3593_v49 = vld [vmem:[%s7673_s7] ss:$0 sm:$0xff] }
 0x336   :  { %v3136_v55 = vrot.slane %v3135_v18, 2 }
 0x337   :  { %4138 = vrsqrt.f32 %v2793_v41  ;;  %v3101_v52 = vrot.slane %v3100_v32, 1 }
 0x338   :  { %v3137_v8 = vadd.f32 %v3136_v55, %v3135_v18 }
 0x339   :  { %v3102_v3 = vadd.f32 %v3101_v52, %v3100_v32 }
 0x33a   :  { %v3138_v40 = vrot.slane %v3137_v8, 1 }
 0x33b   :  { %v7513_v45 = vmul.f32 0.0078125, %v3102_v3 }
 0x33c   :  { %v3139_v22 = vadd.f32 %v3138_v40, %v3137_v8 }
 0x33d   :  { %v3142_v21 = vmul.f32 %v7513_v45, %v7513_v45  ;;  %v3158_v44 = vsub.f32 %v7466_v24, %v7513_v45  ;;  %v3145_v11 = vsub.f32 %v7312_v37, %v7513_v45  ;;  %v3146_v31 = vsub.f32 %v7325_v48, %v7513_v45 }
 0x33e   :  { %v3141_v16 = vmul.f32 0.0078125, %v3139_v22  ;;  %v3147_v61 = vsub.f32 %v7307_v35, %v7513_v45  ;;  %v3148_v19 = vsub.f32 %v7319_v34, %v7513_v45  ;;  %v3149_v59 = vsub.f32 %v7355_v7, %v7513_v45 }
 0x33f   :  { %v3150_v30 = vsub.f32 %v7369_v0, %v7513_v45  ;;  %v3151_v17 = vsub.f32 %v7350_v46, %v7513_v45  ;;  %v3152_v12 = vsub.f32 %v7364_v15, %v7513_v45  ;;  %v3153_v29 = vsub.f32 %v7438_v60, %v7513_v45 }
 0x340   :  { %v3143_v9 = vsub.f32 %v3141_v16, %v3142_v21  ;;  %v3154_v36 = vsub.f32 %v7446_v53, %v7513_v45  ;;  %v3155_v13 = vsub.f32 %v7434_v47, %v7513_v45  ;;  %v9155_v46 = vsub.f32 %v7444_v10, %v7513_v45 }
 0x341   :  { %v4139_v27 = vpop.eup %4138  ;;  %v9156_v15 = vsub.f32 %v7459_v54, %v7513_v45  ;;  %v9157_v60 = vsub.f32 %v7454_v50, %v7513_v45  ;;  %v9158_v53 = vsub.f32 %v7464_v51, %v7513_v45 }
 0x342   :  { %v2808_v63 = vmul.f32 %v4139_v27, %v2790_v28  ;;  %v3144_v4 = vmax.f32 %v3143_v9, 0.0  ;;  %v2795_v18 = vmul.f32 %v4139_v27, %v2777_v2  ;;  %v2796_v41 = vmul.f32 %v4139_v27, %v2778_v14 }
 0x343   :  { %v2797_v32 = vmul.f32 %v4139_v27, %v2779_v33  ;;  %v2798_v55 = vmul.f32 %v4139_v27, %v2780_v43  ;;  %v2799_v52 = vmul.f32 %v4139_v27, %v2781_v42  ;;  %v2800_v8 = vmul.f32 %v4139_v27, %v2782_v5  ;;  %v3594_v5 = vld [vmem:[%s7674_s8] ss:$0 sm:$0xff] }
 0x344   :  { %v3161_v3 = vadd.f32 1e-05, %v3144_v4  ;;  %v2801_v40 = vmul.f32 %v4139_v27, %v2783_v38  ;;  %v2802_v22 = vmul.f32 %v4139_v27, %v2784_v6  ;;  %v2803_v21 = vmul.f32 %v4139_v27, %v2785_v58 }
 0x345   :  { %v2804_v16 = vmul.f32 %v4139_v27, %v2786_v20  ;;  %v2805_v1 = vmul.f32 %v4139_v27, %v2787_v25  ;;  %v2806_v56 = vmul.f32 %v4139_v27, %v2788_v39  ;;  %v2807_v28 = vmul.f32 %v4139_v27, %v2789_v26 }
 0x346   :  { %4140 = vrsqrt.f32 %v3161_v3  ;;  %v2809_v9 = vmul.f32 %v4139_v27, %v2791_v57  ;;  %v2810_v2 = vmul.f32 %v4139_v27, %v2792_v62  ;;  %v2830_v14 = vmul.f32 %v3593_v49, %v2808_v63 }
 0x347   :  { %v2817_v33 = vmul.f32 %v3593_v49, %v2795_v18  ;;  %v2818_v43 = vmul.f32 %v3593_v49, %v2796_v41  ;;  %v2819_v42 = vmul.f32 %v3593_v49, %v2797_v32  ;;  %v2820_v38 = vmul.f32 %v3593_v49, %v2798_v55 }
 0x348   :  { %v2821_v6 = vmul.f32 %v3593_v49, %v2799_v52  ;;  %v2822_v58 = vmul.f32 %v3593_v49, %v2800_v8  ;;  %v2823_v20 = vmul.f32 %v3593_v49, %v2801_v40  ;;  %v2824_v25 = vmul.f32 %v3593_v49, %v2802_v22 }
 0x349   :  { %v2825_v39 = vmul.f32 %v3593_v49, %v2803_v21  ;;  %v2826_v4 = vmul.f32 %v3593_v49, %v2804_v16  ;;  %v2827_v23 = vmul.f32 %v3593_v49, %v2805_v1  ;;  %v2828_v3 = vmul.f32 %v3593_v49, %v2806_v56  ;;  %v3611_v21 = vld [vmem:[%s7675_s9] ss:$0 sm:$0xff] }
 0x34a   :  { %v2829_v26 = vmul.f32 %v3593_v49, %v2807_v28  ;;  %v2831_v57 = vmul.f32 %v3593_v49, %v2809_v9  ;;  %v2832_v62 = vmul.f32 %v3593_v49, %v2810_v2  ;;  %v2852_v27 = vadd.f32 %v3594_v5, %v2830_v14 }
 0x34b   :  { %v7555_v63 = vadd.f32 %v3594_v5, %v2817_v33  ;;  %v7557_v18 = vadd.f32 %v3594_v5, %v2818_v43  ;;  %v7559_v41 = vadd.f32 %v3594_v5, %v2819_v42  ;;  %v7561_v32 = vadd.f32 %v3594_v5, %v2820_v38  ;;  %v3612_v42 = vld [vmem:[%s7676_s10] ss:$0 sm:$0xff]  ;;  %s4166_s10 = smov [#allocation2]  }
 0x34c   :  { %v7563_v55 = vadd.f32 %v3594_v5, %v2821_v6  ;;  %v7565_v52 = vadd.f32 %v3594_v5, %v2822_v58  ;;  %v7567_v8 = vadd.f32 %v3594_v5, %v2823_v20  ;;  %v7569_v1 = vadd.f32 %v3594_v5, %v2824_v25  ;;  %s3276_s14 = sshll.u32 %s4166_s10, 4  ;;  %s3277_s14 = int_to_ptr.vmem [resolvable:$true] %s3276_s14 }
 0x34d   :  { %v7571_v56 = vadd.f32 %v3594_v5, %v2825_v39  ;;  %v7573_v49 = vadd.f32 %v3594_v5, %v2826_v4  ;;  %v7575_v40 = vadd.f32 %v3594_v5, %v2827_v23  ;;  %v7580_v16 = vadd.f32 %v3594_v5, %v2828_v3  ;;  %s4142_s15 = scalar_lea.vmem %s3277_s14, 2048  ;;  %p4147_p1 = scmp.lt.s32.totalorder %s3277_s14, %s3277_s14 }
 0x34e   :  { %v7582_v28 = vadd.f32 %v3594_v5, %v2829_v26  ;;  %v7584_v9 = vadd.f32 %v3594_v5, %v2831_v57  ;;  %v7586_v2 = vadd.f32 %v3594_v5, %v2832_v62  ;;  %p4143_p0 = scmp.ne.s32.totalorder %s3277_s14, %s4142_s15  ;;  %p4148_p2 = scmp.lt.s32.totalorder %s4142_s15, %s4142_s15 }
 0x350   :  { %v4141_v22 = vpop.eup %4140  ;;  %p4149_p3 = por %p4148_p2, %p4147_p1 }
 0x351   :  { %v3176_v14 = vmul.f32 %v4141_v22, %v3158_v44  ;;  %v3163_v23 = vmul.f32 %v4141_v22, %v3145_v11  ;;  %v3164_v33 = vmul.f32 %v4141_v22, %v3146_v31  ;;  %v3165_v43 = vmul.f32 %v4141_v22, %v3147_v61 }
 0x352   :  { %v3166_v24 = vmul.f32 %v4141_v22, %v3148_v19  ;;  %v3167_v37 = vmul.f32 %v4141_v22, %v3149_v59  ;;  %v3168_v48 = vmul.f32 %v4141_v22, %v3150_v30  ;;  %v3169_v35 = vmul.f32 %v4141_v22, %v3151_v17  ;;  %p4150_p4 = pnand %p4149_p3, %p4143_p0 }
 0x353   :  { %v3198_v44 = vmul.f32 %v3611_v21, %v3176_v14  ;;  %v3170_v11 = vmul.f32 %v4141_v22, %v3152_v12  ;;  %v3171_v34 = vmul.f32 %v4141_v22, %v3153_v29  ;;  %v3172_v7 = vmul.f32 %v4141_v22, %v3154_v36 }
 0x354   :  { %v3173_v0 = vmul.f32 %v4141_v22, %v3155_v13  ;;  %v3174_v31 = vmul.f32 %v4141_v22, %v9155_v46  ;;  %v3175_v61 = vmul.f32 %v4141_v22, %v9156_v15  ;;  %v3177_v19 = vmul.f32 %v4141_v22, %v9157_v60 }
 0x355   :  { %v3220_v59 = vadd.f32 %v3612_v42, %v3198_v44  ;;  %v3178_v30 = vmul.f32 %v4141_v22, %v9158_v53  ;;  %v3185_v17 = vmul.f32 %v3611_v21, %v3163_v23  ;;  %v3186_v47 = vmul.f32 %v3611_v21, %v3164_v33 }
 0x356   :  { %v3187_v12 = vmul.f32 %v3611_v21, %v3165_v43  ;;  %v3188_v29 = vmul.f32 %v3611_v21, %v3166_v24  ;;  %v3189_v36 = vmul.f32 %v3611_v21, %v3167_v37  ;;  %v3190_v10 = vmul.f32 %v3611_v21, %v3168_v48 }
 0x357   :  { %v3236_v13 = vadd.f32 %v3220_v59, %v2852_v27  ;;  %v3191_v5 = vmul.f32 %v3611_v21, %v3169_v35  ;;  %v3192_v38 = vmul.f32 %v3611_v21, %v3170_v11  ;;  %v3193_v54 = vmul.f32 %v3611_v21, %v3171_v34 }
 0x358   :  { %v3194_v6 = vmul.f32 %v3611_v21, %v3172_v7  ;;  %v3195_v58 = vmul.f32 %v3611_v21, %v3173_v0  ;;  %v3196_v20 = vmul.f32 %v3611_v21, %v3174_v31  ;;  %v3197_v50 = vmul.f32 %v3611_v21, %v3175_v61 }
 0x359   :  { %v3252_v25 = vmax.f32 %v3236_v13, 0.0  ;;  %v3199_v39 = vmul.f32 %v3611_v21, %v3177_v19  ;;  %v3200_v4 = vmul.f32 %v3611_v21, %v3178_v30  ;;  %v3207_v3 = vadd.f32 %v3612_v42, %v3185_v17 }
 0x35a   :  { %v3208_v51 = vadd.f32 %v3612_v42, %v3186_v47  ;;  %v3209_v45 = vadd.f32 %v3612_v42, %v3187_v12  ;;  %v3210_v26 = vadd.f32 %v3612_v42, %v3188_v29  ;;  %v3211_v57 = vadd.f32 %v3612_v42, %v3189_v36 }
 0x35b   :  { %3268 = vst [vmem:[#allocation2 + $0x68] sm:$0xff] %v3252_v25  ;;  %v3212_v62 = vadd.f32 %v3612_v42, %v3190_v10  ;;  %v3213_v22 = vadd.f32 %v3612_v42, %v3191_v5  ;;  %v3214_v14 = vadd.f32 %v3612_v42, %v3192_v38  ;;  %v3215_v27 = vadd.f32 %v3612_v42, %v3193_v54 }
 0x35c   :  { %v3216_v23 = vadd.f32 %v3612_v42, %v3194_v6  ;;  %v3217_v33 = vadd.f32 %v3612_v42, %v3195_v58  ;;  %v3218_v43 = vadd.f32 %v3612_v42, %v3196_v20  ;;  %v3219_v24 = vadd.f32 %v3612_v42, %v3197_v50 }
 0x35d   :  { %v3221_v37 = vadd.f32 %v3612_v42, %v3199_v39  ;;  %v3222_v48 = vadd.f32 %v3612_v42, %v3200_v4  ;;  %v3223_v35 = vadd.f32 %v3207_v3, %v7555_v63  ;;  %v3224_v21 = vadd.f32 %v3208_v51, %v7557_v18 }
 0x35e   :  { %v3225_v44 = vadd.f32 %v3209_v45, %v7559_v41  ;;  %v3226_v11 = vadd.f32 %v3210_v26, %v7561_v32  ;;  %v3227_v34 = vadd.f32 %v3211_v57, %v7563_v55  ;;  %v3228_v7 = vadd.f32 %v3212_v62, %v7565_v52 }
 0x35f   :  { %v3229_v0 = vadd.f32 %v3213_v22, %v7567_v8  ;;  %v3230_v46 = vadd.f32 %v3214_v14, %v7569_v1  ;;  %v3231_v31 = vadd.f32 %v3215_v27, %v7571_v56  ;;  %v3232_v42 = vadd.f32 %v3216_v23, %v7573_v49 }
 0x360   :  { %v3233_v63 = vadd.f32 %v3217_v33, %v7575_v40  ;;  %v3234_v18 = vadd.f32 %v3218_v43, %v7580_v16  ;;  %v3235_v41 = vadd.f32 %v3219_v24, %v7582_v28  ;;  %v3237_v32 = vadd.f32 %v3221_v37, %v7584_v9 }
 0x361   :  { %v3238_v55 = vadd.f32 %v3222_v48, %v7586_v2  ;;  %v3239_v15 = vmax.f32 %v3223_v35, 0.0  ;;  %v3240_v52 = vmax.f32 %v3224_v21, 0.0  ;;  %v3241_v61 = vmax.f32 %v3225_v44, 0.0 }
 0x362   :  { %v3242_v8 = vmax.f32 %v3226_v11, 0.0  ;;  %v3243_v1 = vmax.f32 %v3227_v34, 0.0  ;;  %v3244_v56 = vmax.f32 %v3228_v7, 0.0  ;;  %v3245_v60 = vmax.f32 %v3229_v0, 0.0 }
 0x363   :  { %v3246_v49 = vmax.f32 %v3230_v46, 0.0  ;;  %v3247_v19 = vmax.f32 %v3231_v31, 0.0  ;;  %v3248_v40 = vmax.f32 %v3232_v42, 0.0  ;;  %v3249_v59 = vmax.f32 %v3233_v63, 0.0  ;;  %3255 = vst [vmem:[#allocation2] sm:$0xff] %v3239_v15  ;;  %3256 = vst [vmem:[#allocation2 + $0x8] sm:$0xff] %v3240_v52 }
 0x364   :  { %3257 = vst [vmem:[#allocation2 + $0x10] sm:$0xff] %v3241_v61  ;;  %v3250_v16 = vmax.f32 %v3234_v18, 0.0  ;;  %v3251_v28 = vmax.f32 %v3235_v41, 0.0  ;;  %v3253_v9 = vmax.f32 %v3237_v32, 0.0  ;;  %v3254_v2 = vmax.f32 %v3238_v55, 0.0  ;;  %3258 = vst [vmem:[#allocation2 + $0x18] sm:$0xff] %v3242_v8 }
 0x365   :  { %3259 = vst [vmem:[#allocation2 + $0x20] sm:$0xff] %v3243_v1  ;;  %3260 = vst [vmem:[#allocation2 + $0x28] sm:$0xff] %v3244_v56 }
 0x366   :  { %3261 = vst [vmem:[#allocation2 + $0x30] sm:$0xff] %v3245_v60  ;;  %3262 = vst [vmem:[#allocation2 + $0x38] sm:$0xff] %v3246_v49 }
 0x367   :  { %3263 = vst [vmem:[#allocation2 + $0x40] sm:$0xff] %v3247_v19  ;;  %3264 = vst [vmem:[#allocation2 + $0x48] sm:$0xff] %v3248_v40 }
 0x368   :  { %3265 = vst [vmem:[#allocation2 + $0x50] sm:$0xff] %v3249_v59  ;;  %3266 = vst [vmem:[#allocation2 + $0x58] sm:$0xff] %v3250_v16 }
 0x369   :  { %3267 = vst [vmem:[#allocation2 + $0x60] sm:$0xff] %v3251_v28  ;;  %3269 = vst [vmem:[#allocation2 + $0x70] sm:$0xff] %v3253_v9 }
 0x36a   :  { %3270 = vst [vmem:[#allocation2 + $0x78] sm:$0xff] %v3254_v2 }
 0x36b   :  { %4153 = shalt.err (!%p4150_p4)
}
 0x36c   :  { %s4154_s17 = scalar_lea.hbm %s7677_s11, 2048 }
 0x36d   :  { %p4155_p5 = scmp.ne.s32.totalorder %s7677_s11, %s4154_s17  ;;  %p4158_p6 = scmp.lt.u32.totalorder %s4154_s17, %s7677_s11 }
 0x36f   :  { %p4160_p7 = pnand %p4158_p6, %p4155_p5 }
 0x371   :  { %4163 = shalt.err (!%p4160_p7)
}
 0x372   :  { %s4167_s18 = smov 128   ;;  %s4168_s19 = smov 8  }
 0x373   :  { %3282 = dma.vmem_to_hbm [thread:$0]  %s3277_s14, 2048, %s7677_s11, [#allocation3], %s4167_s18, %s4167_s18, %s4168_s19  }
 0x374   :  { %4164 = dma.done.wait [#allocation3], 2048  }
 0x375   :  { %4165 = vsyncadd [#allocation3], 4294965248 }
 0x376   :  { %3286 = vsyncpa [#allocation3], 1 }

</bundles_post_ra>
